<compile_context>
chip_gen: v6e
topology: v6e:2x2x1
jax: 0.10.0
libtpu: 0.0.40
codegen_flags: <defaults>
</compile_context>

<pallas_src>
import functools

import jax
import jax.numpy as jnp
from jax import lax
from jax.experimental import pallas as pl
from jax.experimental.pallas import tpu as pltpu

EPS = 1e-5

_CompilerParams = getattr(pltpu, "CompilerParams", None)
if _CompilerParams is None:  # fallback for older jax releases
    _CompilerParams = getattr(pltpu, "TPUCompilerParams")


@functools.lru_cache(maxsize=1)
def _vmem_limit_bytes():
    # ~3/4 of physical VMEM: 48 MiB on v7x (64 MiB), 96 MiB on v5e/v6e (128 MiB).
    try:
        cap = getattr(pltpu.get_tpu_info(), "vmem_capacity_bytes", None)
        if cap:
            return int(min(cap * 3 // 4, 96 * 1024 * 1024))
    except Exception:
        pass
    return 48 * 1024 * 1024


def _cparams(n_axes):
    return _CompilerParams(
        dimension_semantics=("parallel",) * n_axes,
        vmem_limit_bytes=_vmem_limit_bytes(),
    )


def _pick_row_tile(p, target):
    """Largest multiple-of-8 divisor of p that is <= target (p % 8 == 0)."""
    if p <= target:
        return p
    for t in range(target - target % 8, 7, -8):
        if p % t == 0:
            return t
    return 8


def _pick_lane_tile(hw, target):
    """Largest multiple-of-128 divisor of hw that is <= target, else hw (full)."""
    if hw <= target:
        return hw
    for t in range(target - target % 128, 127, -128):
        if hw % t == 0:
            return t
    return hw


# --------------------------------------------------------------------------
# Kernels
# --------------------------------------------------------------------------

def _stats_epilogue(psum_ref, psq_ref, yb):
    # Stats from the bf16-rounded activation (exactly what the next kernel
    # normalizes); two full-block stores, no concat.
    ys = yb.astype(jnp.float32)
    psum_ref[0] = jnp.sum(ys, axis=0, keepdims=True)
    psq_ref[0] = jnp.sum(ys * ys, axis=0, keepdims=True)


def _conv1_stats_kernel(x_ref, w_ref, y_ref, psum_ref, psq_ref):
    # x_ref: (1, Cin, thw) f32 block of the NCHW input.  The NCHW->rows
    # transpose and the f32->bf16 cast are folded in-kernel (no extra HBM pass).
    a = x_ref[0].T.astype(jnp.bfloat16)                      # (thw, Cin)
    y = jnp.dot(a, w_ref[...], preferred_element_type=jnp.float32)
    yb = y.astype(jnp.bfloat16)
    y_ref[...] = yb
    _stats_epilogue(psum_ref, psq_ref, yb)


def _bn_relu_conv3x3_stats_kernel(y1_ref, sc_ref, sh_ref, w2_ref,
                                  y2_ref, psum_ref, psq_ref, *, H, W, C):
    HW = H * W
    # bn1 folded into a single scale/shift (precomputed), then relu (f32).
    a = jnp.maximum(
        y1_ref[...].astype(jnp.float32) * sc_ref[...] + sh_ref[...], 0.0)

    # 3x3 conv (stride=1, pad=1, groups=1) on one image, grouped by dy into
    # three K = 3*C MXU matmuls.  dy shifts are aligned slices of an
    # activation padded with W zero rows top/bottom (zero rows realize the
    # vertical padding, so no h-mask is needed); dx = +-1 shifts use
    # pltpu.roll along the flattened row axis plus two image-column masks.
    zpad = jnp.zeros((W, C), jnp.float32)
    aflat = jnp.concatenate([zpad, a, zpad], axis=0)          # (HW + 2W, C)

    col = lax.broadcasted_iota(jnp.int32, (HW, 1), 0) % W     # image column w
    m_left = col >= 1                                         # dx = -1 valid
    m_right = col <= W - 2                                    # dx = +1 valid

    acc = None
    for i in range(3):                                        # i = dy + 1
        base = aflat[i * W:i * W + HW, :]                     # (HW, C) aligned
        tap_m1 = jnp.where(m_left, pltpu.roll(base, 1, 0), 0.0)
        tap_p1 = jnp.where(m_right, pltpu.roll(base, HW - 1, 0), 0.0)
        im2col = jnp.concatenate([tap_m1, base, tap_p1], axis=1)   # (HW, 3C)
        part = jnp.dot(im2col.astype(jnp.bfloat16),
                       w2_ref[i * 3 * C:(i + 1) * 3 * C, :],
                       preferred_element_type=jnp.float32)
        acc = part if acc is None else acc + part

    yb = acc.astype(jnp.bfloat16)
    y2_ref[...] = yb
    _stats_epilogue(psum_ref, psq_ref, yb)


def _bn_relu_conv1x1_stats_kernel(y2_ref, sc_ref, sh_ref, w_ref,
                                  y_ref, psum_ref, psq_ref):
    # bn2 (folded scale/shift) + relu, then conv3 (1x1).
    a = jnp.maximum(
        y2_ref[...].astype(jnp.float32) * sc_ref[...] + sh_ref[...], 0.0)
    y = jnp.dot(a.astype(jnp.bfloat16), w_ref[...],
                preferred_element_type=jnp.float32)
    yb = y.astype(jnp.bfloat16)
    y_ref[...] = yb
    _stats_epilogue(psum_ref, psq_ref, yb)


def _bn_residual_relu_kernel(y3_ref, sc_ref, sh_ref, x_ref, o_ref):
    # bn3 (folded scale/shift) + identity residual add + relu.  The rows->NCHW
    # transpose is fused into the store: identity is read straight from the
    # NCHW input, and the output block is a lane-dense (Cout, thw) f32 store.
    y = y3_ref[...].astype(jnp.float32) * sc_ref[...] + sh_ref[...]   # (thw, Cout)
    o_ref[0] = jnp.maximum(y.T + x_ref[0], 0.0)


# --------------------------------------------------------------------------
# Wrapper
# --------------------------------------------------------------------------

def _bn_scale_shift(sums, sqs, tile_count, total_count, gamma, beta):
    """Per-tile (sum, sum_sq) -> per-channel BN scale/shift (Chan's formula)."""
    s = sums[:, 0, :].astype(jnp.float32)                     # (T, C)
    q = sqs[:, 0, :].astype(jnp.float32)                      # (T, C)
    n_i = float(tile_count)
    mean_i = s / n_i
    m2_i = jnp.maximum(q - n_i * mean_i * mean_i, 0.0)        # per-tile centered SS
    mean = jnp.sum(s, axis=0) / float(total_count)
    m2 = jnp.sum(m2_i, axis=0) + n_i * jnp.sum(
        jnp.square(mean_i - mean[None, :]), axis=0)
    var = m2 / float(total_count)
    scale = gamma.reshape(1, -1) * lax.rsqrt(var + EPS).reshape(1, -1)
    shift = beta.reshape(1, -1) - mean.reshape(1, -1) * scale
    return scale, shift


def bottleneck_forward(x_nchw, params, *, row_tile=1024, lane_tile=512):
    """Bottleneck.forward with stride=1, downsample=None (identity residual)."""
    N, Cin, H, W = x_nchw.shape
    width = params["w1"].shape[1]
    Cout = params["w3"].shape[1]
    assert Cin == Cout, "identity residual needs inplanes == planes * expansion"
    HW = H * W
    P = N * HW
    # TODO(synk): pad HW to a multiple of 8 (ResNet 7x7 stages) instead of asserting.
    assert HW % 8 == 0, "per-image spatial size must be a sublane multiple"

    # Free metadata reshape: NCHW stays in place, spatial flattened to the lane dim.
    x3d = x_nchw.astype(jnp.float32).reshape(N, Cin, HW)

    w1 = params["w1"].astype(jnp.bfloat16)                       # (Cin, width)
    w2 = params["w2_hwio"].reshape(9 * width, width).astype(jnp.bfloat16)
    w3 = params["w3"].astype(jnp.bfloat16)                       # (width, Cout)

    thw = _pick_lane_tile(HW, lane_tile)     # lane tile for NCHW-facing kernels
    nj = HW // thw
    tp3 = _pick_row_tile(P, row_tile)        # row tile for the 1x1 pass
    g3 = P // tp3

    # --- k1: conv1 (1x1) + bn1 partial stats (transpose + bf16 cast fused) ---
    # TODO(synk): when width < 128 (ResNet stage 1), y1/y2 stores are masked
    # (lane dim < 128); a lane-dense aliased (P*width/128, 128) view would
    # remove the vst.msk penalty for that stage only.
    y1, s1, q1 = pl.pallas_call(
        _conv1_stats_kernel,
        grid=(N, nj),
        in_specs=[
            pl.BlockSpec((1, Cin, thw), lambda n, j: (n, 0, j)),
            pl.BlockSpec((Cin, width), lambda n, j: (0, 0)),
        ],
        out_specs=(
            pl.BlockSpec((thw, width), lambda n, j: (n * nj + j, 0)),
            pl.BlockSpec((1, 1, width), lambda n, j: (n * nj + j, 0, 0)),
            pl.BlockSpec((1, 1, width), lambda n, j: (n * nj + j, 0, 0)),
        ),
        out_shape=(
            jax.ShapeDtypeStruct((P, width), jnp.bfloat16),
            jax.ShapeDtypeStruct((N * nj, 1, width), jnp.float32),
            jax.ShapeDtypeStruct((N * nj, 1, width), jnp.float32),
        ),
        compiler_params=_cparams(2),
    )(x3d, w1)
    sc1, sh1 = _bn_scale_shift(s1, q1, thw, P, params["g1"], params["b1"])

    # --- k2: bn1 + relu + conv2 (3x3, per image) + bn2 partial stats --------
    # TODO(synk): on v7x, row-band this grid into (N, H//th) with a 1-row halo
    # to keep both TensorCores busy at small batch.
    conv2_kernel = functools.partial(
        _bn_relu_conv3x3_stats_kernel, H=H, W=W, C=width)
    y2, s2, q2 = pl.pallas_call(
        conv2_kernel,
        grid=(N,),
        in_specs=[
            pl.BlockSpec((HW, width), lambda n: (n, 0)),
            pl.BlockSpec((1, width), lambda n: (0, 0)),
            pl.BlockSpec((1, width), lambda n: (0, 0)),
            pl.BlockSpec((9 * width, width), lambda n: (0, 0)),
        ],
        out_specs=(
            pl.BlockSpec((HW, width), lambda n: (n, 0)),
            pl.BlockSpec((1, 1, width), lambda n: (n, 0, 0)),
            pl.BlockSpec((1, 1, width), lambda n: (n, 0, 0)),
        ),
        out_shape=(
            jax.ShapeDtypeStruct((P, width), jnp.bfloat16),
            jax.ShapeDtypeStruct((N, 1, width), jnp.float32),
            jax.ShapeDtypeStruct((N, 1, width), jnp.float32),
        ),
        compiler_params=_cparams(1),
    )(y1, sc1, sh1, w2)
    sc2, sh2 = _bn_scale_shift(s2, q2, HW, P, params["g2"], params["b2"])

    # --- k3: bn2 + relu + conv3 (1x1) + bn3 partial stats -------------------
    y3, s3, q3 = pl.pallas_call(
        _bn_relu_conv1x1_stats_kernel,
        grid=(g3,),
        in_specs=[
            pl.BlockSpec((tp3, width), lambda i: (i, 0)),
            pl.BlockSpec((1, width), lambda i: (0, 0)),
            pl.BlockSpec((1, width), lambda i: (0, 0)),
            pl.BlockSpec((width, Cout), lambda i: (0, 0)),
        ],
        out_specs=(
            pl.BlockSpec((tp3, Cout), lambda i: (i, 0)),
            pl.BlockSpec((1, 1, Cout), lambda i: (i, 0, 0)),
            pl.BlockSpec((1, 1, Cout), lambda i: (i, 0, 0)),
        ),
        out_shape=(
            jax.ShapeDtypeStruct((P, Cout), jnp.bfloat16),
            jax.ShapeDtypeStruct((g3, 1, Cout), jnp.float32),
            jax.ShapeDtypeStruct((g3, 1, Cout), jnp.float32),
        ),
        compiler_params=_cparams(1),
    )(y2, sc2, sh2, w3)
    sc3, sh3 = _bn_scale_shift(s3, q3, tp3, P, params["g3"], params["b3"])

    # --- k4: bn3 + residual add + relu (rows->NCHW transpose fused) ---------
    out3d = pl.pallas_call(
        _bn_residual_relu_kernel,
        grid=(N, nj),
        in_specs=[
            pl.BlockSpec((thw, Cout), lambda n, j: (n * nj + j, 0)),
            pl.BlockSpec((1, Cout), lambda n, j: (0, 0)),
            pl.BlockSpec((1, Cout), lambda n, j: (0, 0)),
            pl.BlockSpec((1, Cout, thw), lambda n, j: (n, 0, j)),
        ],
        out_specs=pl.BlockSpec((1, Cout, thw), lambda n, j: (n, 0, j)),
        out_shape=jax.ShapeDtypeStruct((N, Cout, HW), jnp.float32),
        compiler_params=_cparams(2),
    )(y3, sc3, sh3, x3d)

    return out3d.reshape(N, Cout, H, W)


# --------------------------------------------------------------------------
# Pure-JAX reference (full f32, HIGHEST precision) for verification
# --------------------------------------------------------------------------

def bottleneck_reference(x_nchw, params):
    x = jnp.transpose(x_nchw, (0, 2, 3, 1)).astype(jnp.float32)

    def bn(y, g, b):
        mu = jnp.mean(y, axis=(0, 1, 2), keepdims=True)
        var = jnp.mean(jnp.square(y - mu), axis=(0, 1, 2), keepdims=True)
        return (y - mu) * lax.rsqrt(var + EPS) * g.reshape(1, 1, 1, -1) \
            + b.reshape(1, 1, 1, -1)

    y = jnp.einsum("nhwc,cd->nhwd", x, params["w1"],
                   precision=lax.Precision.HIGHEST)
    y = jnp.maximum(bn(y, params["g1"], params["b1"]), 0.0)
    y = lax.conv_general_dilated(
        y, params["w2_hwio"], window_strides=(1, 1), padding=((1, 1), (1, 1)),
        dimension_numbers=("NHWC", "HWIO", "NHWC"),
        precision=lax.Precision.HIGHEST)
    y = jnp.maximum(bn(y, params["g2"], params["b2"]), 0.0)
    y = jnp.einsum("nhwc,cd->nhwd", y, params["w3"],
                   precision=lax.Precision.HIGHEST)
    y = bn(y, params["g3"], params["b3"])
    y = jnp.maximum(y + x, 0.0)
    return jnp.transpose(y, (0, 3, 1, 2))


def init_params(key, inplanes, planes, base_width=64, groups=1):
    expansion = 4
    width = int(planes * (base_width / 64.0)) * groups
    cout = planes * expansion
    ks = jax.random.split(key, 9)
    return {
        # conv1: PyTorch (width, inplanes, 1, 1) -> kernel layout (inplanes, width)
        "w1": 0.1 * jax.random.normal(ks[0], (inplanes, width), jnp.float32),
        "g1": 1.0 + 0.1 * jax.random.normal(ks[1], (1, width), jnp.float32),
        "b1": 0.1 * jax.random.normal(ks[2], (1, width), jnp.float32),
        # conv2: PyTorch (width, width, 3, 3) -> HWIO (3, 3, width, width)
        "w2_hwio": 0.1 * jax.random.normal(ks[3], (3, 3, width, width), jnp.float32),
        "g2": 1.0 + 0.1 * jax.random.normal(ks[4], (1, width), jnp.float32),
        "b2": 0.1 * jax.random.normal(ks[5], (1, width), jnp.float32),
        # conv3: PyTorch (cout, width, 1, 1) -> kernel layout (width, cout)
        "w3": 0.1 * jax.random.normal(ks[6], (width, cout), jnp.float32),
        "g3": 1.0 + 0.1 * jax.random.normal(ks[7], (1, cout), jnp.float32),
        "b3": 0.1 * jax.random.normal(ks[8], (1, cout), jnp.float32),
    }


if __name__ == "__main__":
    # Small shapes consistent with the module: planes=32, expansion=4 =>
    # inplanes = Cout = 128 (valid identity residual), width = 32, P = 512 rows.
    N, H, W = 2, 16, 16
    planes = 32
    inplanes = planes * 4  # 128

    key = jax.random.PRNGKey(0)
    kx, kp = jax.random.split(key)
    x = jax.random.normal(kx, (N, inplanes, H, W), jnp.float32)  # NCHW
    params = init_params(kp, inplanes, planes)

    fwd = jax.jit(bottleneck_forward)
    out = jax.block_until_ready(fwd(x, params))
    ref = jax.block_until_ready(bottleneck_reference(x, params))

    assert out.shape == (N, inplanes, H, W), out.shape
    err = float(jnp.max(jnp.abs(out - ref)))
    # bf16 MXU inputs (f32 accumulation) vs. a HIGHEST-precision f32 reference:
    # use a scale-relative tolerance.
    tol = 5e-2 * (float(jnp.max(jnp.abs(ref))) + 1.0)
    assert err < tol, f"max abs error too large: {err} (tol {tol})"

    print("KERNEL_OK")
</pallas_src>

<mosaic_0001>
module attributes {stable_mosaic.version = 11 : i64} {
  func.func @_bn_residual_relu_kernel(%arg0: i32, %arg1: i32, %arg2: memref<256x128xbf16, #tpu.memory_space<vmem>>, %arg3: memref<1x128xf32, #tpu.memory_space<vmem>>, %arg4: memref<1x128xf32, #tpu.memory_space<vmem>>, %arg5: memref<1x128x256xf32, #tpu.memory_space<vmem>>, %arg6: memref<1x128x256xf32, #tpu.memory_space<vmem>>) attributes {dimension_semantics = [#tpu.dimension_semantics<parallel>, #tpu.dimension_semantics<parallel>], iteration_bounds = array<i64: 2, 1>, scalar_prefetch = 0 : i64, scratch_operands = 0 : i64, tpu.core_type = #tpu.core_type<tc>, window_params = [{transform_indices = @transform_0, window_bounds = array<i64: 256, 128>}, {pipeline_mode = #tpu.pipeline_mode<synchronous>, transform_indices = @transform_1, window_bounds = array<i64: 1, 128>}, {pipeline_mode = #tpu.pipeline_mode<synchronous>, transform_indices = @transform_2, window_bounds = array<i64: 1, 128>}, {transform_indices = @transform_3, window_bounds = array<i64: 1, 128, 256>}, {transform_indices = @transform_4, window_bounds = array<i64: 1, 128, 256>}]} {
    %c0 = arith.constant 0 : index
    %c0_0 = arith.constant 0 : index
    %0 = vector.load %arg2[%c0, %c0_0] : memref<256x128xbf16, #tpu.memory_space<vmem>>, vector<256x128xbf16>
    %1 = arith.extf %0 : vector<256x128xbf16> to vector<256x128xf32>
    %c0_1 = arith.constant 0 : index
    %c0_2 = arith.constant 0 : index
    %2 = vector.load %arg3[%c0_1, %c0_2] : memref<1x128xf32, #tpu.memory_space<vmem>>, vector<1x128xf32>
    %3 = vector.broadcast %2 : vector<1x128xf32> to vector<256x128xf32>
    %4 = arith.mulf %1, %3 : vector<256x128xf32>
    %c0_3 = arith.constant 0 : index
    %c0_4 = arith.constant 0 : index
    %5 = vector.load %arg4[%c0_3, %c0_4] : memref<1x128xf32, #tpu.memory_space<vmem>>, vector<1x128xf32>
    %6 = vector.broadcast %5 : vector<1x128xf32> to vector<256x128xf32>
    %7 = arith.addf %4, %6 : vector<256x128xf32>
    %8 = tpu.transpose %7, [1, 0] : vector<256x128xf32> -> vector<128x256xf32>
    %c0_5 = arith.constant 0 : index
    %c0_6 = arith.constant 0 : index
    %c0_7 = arith.constant 0 : index
    %9 = vector.load %arg5[%c0_5, %c0_6, %c0_7] : memref<1x128x256xf32, #tpu.memory_space<vmem>>, vector<1x128x256xf32>
    %10 = vector.shape_cast %9 : vector<1x128x256xf32> to vector<128x256xf32>
    %11 = arith.addf %8, %10 : vector<128x256xf32>
    %cst = arith.constant 0.000000e+00 : f32
    %12 = vector.broadcast %cst : f32 to vector<128x256xf32>
    %13 = arith.maximumf %11, %12 : vector<128x256xf32>
    %c0_8 = arith.constant 0 : index
    %c0_9 = arith.constant 0 : index
    %c0_10 = arith.constant 0 : index
    %14 = vector.load %arg6[%c0_8, %c0_9, %c0_10] : memref<1x128x256xf32, #tpu.memory_space<vmem>>, vector<1x128x256xf32>
    %15 = vector.shape_cast %14 : vector<1x128x256xf32> to vector<128x256xf32>
    %16 = vector.shape_cast %13 : vector<128x256xf32> to vector<1x128x256xf32>
    tpu.vector_store %arg6[%c0_8, %c0_9, %c0_10], %16 {strides = array<i32>} : memref<1x128x256xf32, #tpu.memory_space<vmem>>, vector<1x128x256xf32>,
    return
  }
  func.func @transform_0(%arg0: i32, %arg1: i32) -> (i32, i32) {
    %c1_i32 = arith.constant 1 : i32
    %0 = arith.muli %arg0, %c1_i32 : i32
    %1 = arith.addi %0, %arg1 : i32
    %c0_i32 = arith.constant 0 : i32
    %c0_i32_0 = arith.constant 0 : i32
    return %1, %c0_i32 : i32, i32
  }
  func.func @transform_1(%arg0: i32, %arg1: i32) -> (i32, i32) {
    %c0_i32 = arith.constant 0 : i32
    %c0_i32_0 = arith.constant 0 : i32
    %c0_i32_1 = arith.constant 0 : i32
    return %c0_i32, %c0_i32_0 : i32, i32
  }
  func.func @transform_2(%arg0: i32, %arg1: i32) -> (i32, i32) {
    %c0_i32 = arith.constant 0 : i32
    %c0_i32_0 = arith.constant 0 : i32
    %c0_i32_1 = arith.constant 0 : i32
    return %c0_i32, %c0_i32_0 : i32, i32
  }
  func.func @transform_3(%arg0: i32, %arg1: i32) -> (i32, i32, i32) {
    %c0_i32 = arith.constant 0 : i32
    %c0_i32_0 = arith.constant 0 : i32
    return %arg0, %c0_i32, %arg1 : i32, i32, i32
  }
  func.func @transform_4(%arg0: i32, %arg1: i32) -> (i32, i32, i32) {
    %c0_i32 = arith.constant 0 : i32
    %c0_i32_0 = arith.constant 0 : i32
    return %arg0, %c0_i32, %arg1 : i32, i32, i32
  }
}

module attributes {stable_mosaic.version = 11 : i64} {
  func.func @_conv1_stats_kernel(%arg0: i32, %arg1: i32, %arg2: memref<1x128x256xf32, #tpu.memory_space<vmem>>, %arg3: memref<128x32xbf16, #tpu.memory_space<vmem>>, %arg4: memref<256x32xbf16, #tpu.memory_space<vmem>>, %arg5: memref<1x1x32xf32, #tpu.memory_space<vmem>>, %arg6: memref<1x1x32xf32, #tpu.memory_space<vmem>>) attributes {dimension_semantics = [#tpu.dimension_semantics<parallel>, #tpu.dimension_semantics<parallel>], iteration_bounds = array<i64: 2, 1>, scalar_prefetch = 0 : i64, scratch_operands = 0 : i64, tpu.core_type = #tpu.core_type<tc>, window_params = [{transform_indices = @transform_0, window_bounds = array<i64: 1, 128, 256>}, {pipeline_mode = #tpu.pipeline_mode<synchronous>, transform_indices = @transform_1, window_bounds = array<i64: 128, 32>}, {transform_indices = @transform_2, window_bounds = array<i64: 256, 32>}, {transform_indices = @transform_3, window_bounds = array<i64: 1, 1, 32>}, {transform_indices = @transform_4, window_bounds = array<i64: 1, 1, 32>}]} {
    %c0 = arith.constant 0 : index
    %c0_0 = arith.constant 0 : index
    %c0_1 = arith.constant 0 : index
    %0 = vector.load %arg2[%c0, %c0_0, %c0_1] : memref<1x128x256xf32, #tpu.memory_space<vmem>>, vector<1x128x256xf32>
    %1 = vector.shape_cast %0 : vector<1x128x256xf32> to vector<128x256xf32>
    %2 = tpu.transpose %1, [1, 0] : vector<128x256xf32> -> vector<256x128xf32>
    %3 = arith.truncf %2 : vector<256x128xf32> to vector<256x128xbf16>
    %c0_2 = arith.constant 0 : index
    %c0_3 = arith.constant 0 : index
    %4 = vector.load %arg3[%c0_2, %c0_3] : memref<128x32xbf16, #tpu.memory_space<vmem>>, vector<128x32xbf16>
    %cst = arith.constant dense<0.000000e+00> : vector<256x32xf32>
    %5 = tpu.matmul %3, %4, %cst {dimension_numbers = #tpu.dot_dimension_numbers<[1], [0], [0], [1], [0, 0, 1, 1], [], []>} : vector<256x128xbf16>, vector<128x32xbf16>, vector<256x32xf32> -> vector<256x32xf32>
    %6 = arith.truncf %5 : vector<256x32xf32> to vector<256x32xbf16>
    %c0_4 = arith.constant 0 : index
    %c0_5 = arith.constant 0 : index
    %7 = vector.load %arg4[%c0_4, %c0_5] : memref<256x32xbf16, #tpu.memory_space<vmem>>, vector<256x32xbf16>
    tpu.vector_store %arg4[%c0_4, %c0_5], %6 {strides = array<i32>} : memref<256x32xbf16, #tpu.memory_space<vmem>>, vector<256x32xbf16>,
    %8 = arith.extf %6 : vector<256x32xbf16> to vector<256x32xf32>
    %cst_6 = arith.constant dense<0.000000e+00> : vector<32xf32>
    %9 = vector.multi_reduction <add>, %8, %cst_6 [0] : vector<256x32xf32> to vector<32xf32>
    %10 = vector.shape_cast %9 : vector<32xf32> to vector<1x32xf32>
    %c0_7 = arith.constant 0 : index
    %c0_8 = arith.constant 0 : index
    %c0_9 = arith.constant 0 : index
    %11 = vector.load %arg5[%c0_7, %c0_8, %c0_9] : memref<1x1x32xf32, #tpu.memory_space<vmem>>, vector<1x1x32xf32>
    %12 = vector.shape_cast %11 : vector<1x1x32xf32> to vector<1x32xf32>
    %13 = vector.shape_cast %10 : vector<1x32xf32> to vector<1x1x32xf32>
    tpu.vector_store %arg5[%c0_7, %c0_8, %c0_9], %13 {strides = array<i32>} : memref<1x1x32xf32, #tpu.memory_space<vmem>>, vector<1x1x32xf32>,
    %14 = arith.mulf %8, %8 : vector<256x32xf32>
    %cst_10 = arith.constant dense<0.000000e+00> : vector<32xf32>
    %15 = vector.multi_reduction <add>, %14, %cst_10 [0] : vector<256x32xf32> to vector<32xf32>
    %16 = vector.shape_cast %15 : vector<32xf32> to vector<1x32xf32>
    %c0_11 = arith.constant 0 : index
    %c0_12 = arith.constant 0 : index
    %c0_13 = arith.constant 0 : index
    %17 = vector.load %arg6[%c0_11, %c0_12, %c0_13] : memref<1x1x32xf32, #tpu.memory_space<vmem>>, vector<1x1x32xf32>
    %18 = vector.shape_cast %17 : vector<1x1x32xf32> to vector<1x32xf32>
    %19 = vector.shape_cast %16 : vector<1x32xf32> to vector<1x1x32xf32>
    tpu.vector_store %arg6[%c0_11, %c0_12, %c0_13], %19 {strides = array<i32>} : memref<1x1x32xf32, #tpu.memory_space<vmem>>, vector<1x1x32xf32>,
    return
  }
  func.func @transform_0(%arg0: i32, %arg1: i32) -> (i32, i32, i32) {
    %c0_i32 = arith.constant 0 : i32
    %c0_i32_0 = arith.constant 0 : i32
    return %arg0, %c0_i32, %arg1 : i32, i32, i32
  }
  func.func @transform_1(%arg0: i32, %arg1: i32) -> (i32, i32) {
    %c0_i32 = arith.constant 0 : i32
    %c0_i32_0 = arith.constant 0 : i32
    %c0_i32_1 = arith.constant 0 : i32
    return %c0_i32, %c0_i32_0 : i32, i32
  }
  func.func @transform_2(%arg0: i32, %arg1: i32) -> (i32, i32) {
    %c1_i32 = arith.constant 1 : i32
    %0 = arith.muli %arg0, %c1_i32 : i32
    %1 = arith.addi %0, %arg1 : i32
    %c0_i32 = arith.constant 0 : i32
    %c0_i32_0 = arith.constant 0 : i32
    return %1, %c0_i32 : i32, i32
  }
  func.func @transform_3(%arg0: i32, %arg1: i32) -> (i32, i32, i32) {
    %c1_i32 = arith.constant 1 : i32
    %0 = arith.muli %arg0, %c1_i32 : i32
    %1 = arith.addi %0, %arg1 : i32
    %c0_i32 = arith.constant 0 : i32
    %c0_i32_0 = arith.constant 0 : i32
    %c0_i32_1 = arith.constant 0 : i32
    return %1, %c0_i32, %c0_i32_0 : i32, i32, i32
  }
  func.func @transform_4(%arg0: i32, %arg1: i32) -> (i32, i32, i32) {
    %c1_i32 = arith.constant 1 : i32
    %0 = arith.muli %arg0, %c1_i32 : i32
    %1 = arith.addi %0, %arg1 : i32
    %c0_i32 = arith.constant 0 : i32
    %c0_i32_0 = arith.constant 0 : i32
    %c0_i32_1 = arith.constant 0 : i32
    return %1, %c0_i32, %c0_i32_0 : i32, i32, i32
  }
}

module attributes {stable_mosaic.version = 11 : i64} {
  func.func @_bn_relu_conv3x3_stats_kernel(%arg0: i32, %arg1: memref<256x32xbf16, #tpu.memory_space<vmem>>, %arg2: memref<1x32xf32, #tpu.memory_space<vmem>>, %arg3: memref<1x32xf32, #tpu.memory_space<vmem>>, %arg4: memref<288x32xbf16, #tpu.memory_space<vmem>>, %arg5: memref<256x32xbf16, #tpu.memory_space<vmem>>, %arg6: memref<1x1x32xf32, #tpu.memory_space<vmem>>, %arg7: memref<1x1x32xf32, #tpu.memory_space<vmem>>) attributes {dimension_semantics = [#tpu.dimension_semantics<parallel>], iteration_bounds = array<i64: 2>, scalar_prefetch = 0 : i64, scratch_operands = 0 : i64, tpu.core_type = #tpu.core_type<tc>, window_params = [{transform_indices = @transform_0, window_bounds = array<i64: 256, 32>}, {pipeline_mode = #tpu.pipeline_mode<synchronous>, transform_indices = @transform_1, window_bounds = array<i64: 1, 32>}, {pipeline_mode = #tpu.pipeline_mode<synchronous>, transform_indices = @transform_2, window_bounds = array<i64: 1, 32>}, {pipeline_mode = #tpu.pipeline_mode<synchronous>, transform_indices = @transform_3, window_bounds = array<i64: 288, 32>}, {transform_indices = @transform_4, window_bounds = array<i64: 256, 32>}, {transform_indices = @transform_5, window_bounds = array<i64: 1, 1, 32>}, {transform_indices = @transform_6, window_bounds = array<i64: 1, 1, 32>}]} {
    %c0 = arith.constant 0 : index
    %c0_0 = arith.constant 0 : index
    %0 = vector.load %arg1[%c0, %c0_0] : memref<256x32xbf16, #tpu.memory_space<vmem>>, vector<256x32xbf16>
    %1 = arith.extf %0 : vector<256x32xbf16> to vector<256x32xf32>
    %c0_1 = arith.constant 0 : index
    %c0_2 = arith.constant 0 : index
    %2 = vector.load %arg2[%c0_1, %c0_2] : memref<1x32xf32, #tpu.memory_space<vmem>>, vector<1x32xf32>
    %3 = vector.broadcast %2 : vector<1x32xf32> to vector<256x32xf32>
    %4 = arith.mulf %1, %3 : vector<256x32xf32>
    %c0_3 = arith.constant 0 : index
    %c0_4 = arith.constant 0 : index
    %5 = vector.load %arg3[%c0_3, %c0_4] : memref<1x32xf32, #tpu.memory_space<vmem>>, vector<1x32xf32>
    %6 = vector.broadcast %5 : vector<1x32xf32> to vector<256x32xf32>
    %7 = arith.addf %4, %6 : vector<256x32xf32>
    %cst = arith.constant 0.000000e+00 : f32
    %8 = vector.broadcast %cst : f32 to vector<256x32xf32>
    %9 = arith.maximumf %7, %8 : vector<256x32xf32>
    %cst_5 = arith.constant 0.000000e+00 : f32
    %10 = vector.broadcast %cst_5 : f32 to vector<16x32xf32>
    %11 = tpu.concatenate %10, %9, %10 in 0 : vector<16x32xf32>, vector<256x32xf32>, vector<16x32xf32> -> vector<288x32xf32>
    %12 = tpu.iota {dimensions = array<i32: 0>} : vector<256x1xi32>
    %c16_i32 = arith.constant 16 : i32
    %c0_i32 = arith.constant 0 : i32
    %13 = arith.cmpi eq, %c16_i32, %c0_i32 : i32
    %c1_i32 = arith.constant 1 : i32
    %14 = arith.select %13, %c1_i32, %c16_i32 : i32
    %15 = vector.broadcast %14 : i32 to vector<256x1xi32>
    %16 = arith.remsi %12, %15 : vector<256x1xi32>
    %c0_i32_6 = arith.constant 0 : i32
    %17 = vector.broadcast %c0_i32_6 : i32 to vector<256x1xi32>
    %18 = arith.cmpi ne, %16, %17 : vector<256x1xi32>
    %c0_i32_7 = arith.constant 0 : i32
    %19 = vector.broadcast %c0_i32_7 : i32 to vector<256x1xi32>
    %20 = arith.cmpi slt, %16, %19 : vector<256x1xi32>
    %c0_i32_8 = arith.constant 0 : i32
    %21 = arith.cmpi slt, %14, %c0_i32_8 : i32
    %22 = vector.broadcast %21 : i1 to vector<256x1xi1>
    %23 = vector.broadcast %22 : vector<256x1xi1> to vector<256x1xi1>
    %24 = arith.xori %20, %23 : vector<256x1xi1>
    %25 = arith.andi %24, %18 : vector<256x1xi1>
    %26 = vector.broadcast %14 : i32 to vector<256x1xi32>
    %27 = arith.addi %16, %26 : vector<256x1xi32>
    %28 = arith.select %25, %27, %16 : vector<256x1xi1>, vector<256x1xi32>
    %c1_i32_9 = arith.constant 1 : i32
    %29 = vector.broadcast %c1_i32_9 : i32 to vector<256x1xi32>
    %30 = arith.cmpi sge, %28, %29 : vector<256x1xi32>
    %c14_i32 = arith.constant 14 : i32
    %31 = vector.broadcast %c14_i32 : i32 to vector<256x1xi32>
    %32 = arith.cmpi sle, %28, %31 : vector<256x1xi32>
    %33 = vector.extract_strided_slice %11 {offsets = [0, 0], sizes = [256, 32], strides = [1, 1]} : vector<288x32xf32> to vector<256x32xf32>
    %c1_i32_10 = arith.constant 1 : i32
    %34 = tpu.dynamic_rotate %33 by %c1_i32_10 dim 0 : vector<256x32xf32>, i32 -> vector<256x32xf32>
    %cst_11 = arith.constant 0.000000e+00 : f32
    %35 = vector.shape_cast %30 : vector<256x1xi1> to vector<256x1xi1>
    %36 = vector.broadcast %35 : vector<256x1xi1> to vector<256x32xi1>
    %37 = vector.broadcast %cst_11 : f32 to vector<256x32xf32>
    %38 = arith.select %36, %34, %37 : vector<256x32xi1>, vector<256x32xf32>
    %c255_i32 = arith.constant 255 : i32
    %39 = tpu.dynamic_rotate %33 by %c255_i32 dim 0 : vector<256x32xf32>, i32 -> vector<256x32xf32>
    %cst_12 = arith.constant 0.000000e+00 : f32
    %40 = vector.shape_cast %32 : vector<256x1xi1> to vector<256x1xi1>
    %41 = vector.broadcast %40 : vector<256x1xi1> to vector<256x32xi1>
    %42 = vector.broadcast %cst_12 : f32 to vector<256x32xf32>
    %43 = arith.select %41, %39, %42 : vector<256x32xi1>, vector<256x32xf32>
    %44 = tpu.concatenate %38, %33, %43 in 1 : vector<256x32xf32>, vector<256x32xf32>, vector<256x32xf32> -> vector<256x96xf32>
    %45 = arith.truncf %44 : vector<256x96xf32> to vector<256x96xbf16>
    %c0_13 = arith.constant 0 : index
    %c0_14 = arith.constant 0 : index
    %46 = vector.load %arg4[%c0_13, %c0_14] : memref<288x32xbf16, #tpu.memory_space<vmem>>, vector<96x32xbf16>
    %cst_15 = arith.constant dense<0.000000e+00> : vector<256x32xf32>
    %47 = tpu.matmul %45, %46, %cst_15 {dimension_numbers = #tpu.dot_dimension_numbers<[1], [0], [0], [1], [0, 0, 1, 1], [], []>} : vector<256x96xbf16>, vector<96x32xbf16>, vector<256x32xf32> -> vector<256x32xf32>
    %48 = vector.extract_strided_slice %11 {offsets = [16, 0], sizes = [256, 32], strides = [1, 1]} : vector<288x32xf32> to vector<256x32xf32>
    %c1_i32_16 = arith.constant 1 : i32
    %49 = tpu.dynamic_rotate %48 by %c1_i32_16 dim 0 : vector<256x32xf32>, i32 -> vector<256x32xf32>
    %cst_17 = arith.constant 0.000000e+00 : f32
    %50 = vector.shape_cast %30 : vector<256x1xi1> to vector<256x1xi1>
    %51 = vector.broadcast %50 : vector<256x1xi1> to vector<256x32xi1>
    %52 = vector.broadcast %cst_17 : f32 to vector<256x32xf32>
    %53 = arith.select %51, %49, %52 : vector<256x32xi1>, vector<256x32xf32>
    %c255_i32_18 = arith.constant 255 : i32
    %54 = tpu.dynamic_rotate %48 by %c255_i32_18 dim 0 : vector<256x32xf32>, i32 -> vector<256x32xf32>
    %cst_19 = arith.constant 0.000000e+00 : f32
    %55 = vector.shape_cast %32 : vector<256x1xi1> to vector<256x1xi1>
    %56 = vector.broadcast %55 : vector<256x1xi1> to vector<256x32xi1>
    %57 = vector.broadcast %cst_19 : f32 to vector<256x32xf32>
    %58 = arith.select %56, %54, %57 : vector<256x32xi1>, vector<256x32xf32>
    %59 = tpu.concatenate %53, %48, %58 in 1 : vector<256x32xf32>, vector<256x32xf32>, vector<256x32xf32> -> vector<256x96xf32>
    %60 = arith.truncf %59 : vector<256x96xf32> to vector<256x96xbf16>
    %c96 = arith.constant 96 : index
    %c0_20 = arith.constant 0 : index
    %61 = vector.load %arg4[%c96, %c0_20] : memref<288x32xbf16, #tpu.memory_space<vmem>>, vector<96x32xbf16>
    %cst_21 = arith.constant dense<0.000000e+00> : vector<256x32xf32>
    %62 = tpu.matmul %60, %61, %cst_21 {dimension_numbers = #tpu.dot_dimension_numbers<[1], [0], [0], [1], [0, 0, 1, 1], [], []>} : vector<256x96xbf16>, vector<96x32xbf16>, vector<256x32xf32> -> vector<256x32xf32>
    %63 = arith.addf %47, %62 : vector<256x32xf32>
    %64 = vector.extract_strided_slice %11 {offsets = [32, 0], sizes = [256, 32], strides = [1, 1]} : vector<288x32xf32> to vector<256x32xf32>
    %c1_i32_22 = arith.constant 1 : i32
    %65 = tpu.dynamic_rotate %64 by %c1_i32_22 dim 0 : vector<256x32xf32>, i32 -> vector<256x32xf32>
    %cst_23 = arith.constant 0.000000e+00 : f32
    %66 = vector.shape_cast %30 : vector<256x1xi1> to vector<256x1xi1>
    %67 = vector.broadcast %66 : vector<256x1xi1> to vector<256x32xi1>
    %68 = vector.broadcast %cst_23 : f32 to vector<256x32xf32>
    %69 = arith.select %67, %65, %68 : vector<256x32xi1>, vector<256x32xf32>
    %c255_i32_24 = arith.constant 255 : i32
    %70 = tpu.dynamic_rotate %64 by %c255_i32_24 dim 0 : vector<256x32xf32>, i32 -> vector<256x32xf32>
    %cst_25 = arith.constant 0.000000e+00 : f32
    %71 = vector.shape_cast %32 : vector<256x1xi1> to vector<256x1xi1>
    %72 = vector.broadcast %71 : vector<256x1xi1> to vector<256x32xi1>
    %73 = vector.broadcast %cst_25 : f32 to vector<256x32xf32>
    %74 = arith.select %72, %70, %73 : vector<256x32xi1>, vector<256x32xf32>
    %75 = tpu.concatenate %69, %64, %74 in 1 : vector<256x32xf32>, vector<256x32xf32>, vector<256x32xf32> -> vector<256x96xf32>
    %76 = arith.truncf %75 : vector<256x96xf32> to vector<256x96xbf16>
    %c192 = arith.constant 192 : index
    %c0_26 = arith.constant 0 : index
    %77 = vector.load %arg4[%c192, %c0_26] : memref<288x32xbf16, #tpu.memory_space<vmem>>, vector<96x32xbf16>
    %cst_27 = arith.constant dense<0.000000e+00> : vector<256x32xf32>
    %78 = tpu.matmul %76, %77, %cst_27 {dimension_numbers = #tpu.dot_dimension_numbers<[1], [0], [0], [1], [0, 0, 1, 1], [], []>} : vector<256x96xbf16>, vector<96x32xbf16>, vector<256x32xf32> -> vector<256x32xf32>
    %79 = arith.addf %63, %78 : vector<256x32xf32>
    %80 = arith.truncf %79 : vector<256x32xf32> to vector<256x32xbf16>
    %c0_28 = arith.constant 0 : index
    %c0_29 = arith.constant 0 : index
    %81 = vector.load %arg5[%c0_28, %c0_29] : memref<256x32xbf16, #tpu.memory_space<vmem>>, vector<256x32xbf16>
    tpu.vector_store %arg5[%c0_28, %c0_29], %80 {strides = array<i32>} : memref<256x32xbf16, #tpu.memory_space<vmem>>, vector<256x32xbf16>,
    %82 = arith.extf %80 : vector<256x32xbf16> to vector<256x32xf32>
    %cst_30 = arith.constant dense<0.000000e+00> : vector<32xf32>
    %83 = vector.multi_reduction <add>, %82, %cst_30 [0] : vector<256x32xf32> to vector<32xf32>
    %84 = vector.shape_cast %83 : vector<32xf32> to vector<1x32xf32>
    %c0_31 = arith.constant 0 : index
    %c0_32 = arith.constant 0 : index
    %c0_33 = arith.constant 0 : index
    %85 = vector.load %arg6[%c0_31, %c0_32, %c0_33] : memref<1x1x32xf32, #tpu.memory_space<vmem>>, vector<1x1x32xf32>
    %86 = vector.shape_cast %85 : vector<1x1x32xf32> to vector<1x32xf32>
    %87 = vector.shape_cast %84 : vector<1x32xf32> to vector<1x1x32xf32>
    tpu.vector_store %arg6[%c0_31, %c0_32, %c0_33], %87 {strides = array<i32>} : memref<1x1x32xf32, #tpu.memory_space<vmem>>, vector<1x1x32xf32>,
    %88 = arith.mulf %82, %82 : vector<256x32xf32>
    %cst_34 = arith.constant dense<0.000000e+00> : vector<32xf32>
    %89 = vector.multi_reduction <add>, %88, %cst_34 [0] : vector<256x32xf32> to vector<32xf32>
    %90 = vector.shape_cast %89 : vector<32xf32> to vector<1x32xf32>
    %c0_35 = arith.constant 0 : index
    %c0_36 = arith.constant 0 : index
    %c0_37 = arith.constant 0 : index
    %91 = vector.load %arg7[%c0_35, %c0_36, %c0_37] : memref<1x1x32xf32, #tpu.memory_space<vmem>>, vector<1x1x32xf32>
    %92 = vector.shape_cast %91 : vector<1x1x32xf32> to vector<1x32xf32>
    %93 = vector.shape_cast %90 : vector<1x32xf32> to vector<1x1x32xf32>
    tpu.vector_store %arg7[%c0_35, %c0_36, %c0_37], %93 {strides = array<i32>} : memref<1x1x32xf32, #tpu.memory_space<vmem>>, vector<1x1x32xf32>,
    return
  }
  func.func @transform_0(%arg0: i32) -> (i32, i32) {
    %c0_i32 = arith.constant 0 : i32
    %c0_i32_0 = arith.constant 0 : i32
    return %arg0, %c0_i32 : i32, i32
  }
  func.func @transform_1(%arg0: i32) -> (i32, i32) {
    %c0_i32 = arith.constant 0 : i32
    %c0_i32_0 = arith.constant 0 : i32
    %c0_i32_1 = arith.constant 0 : i32
    return %c0_i32, %c0_i32_0 : i32, i32
  }
  func.func @transform_2(%arg0: i32) -> (i32, i32) {
    %c0_i32 = arith.constant 0 : i32
    %c0_i32_0 = arith.constant 0 : i32
    %c0_i32_1 = arith.constant 0 : i32
    return %c0_i32, %c0_i32_0 : i32, i32
  }
  func.func @transform_3(%arg0: i32) -> (i32, i32) {
    %c0_i32 = arith.constant 0 : i32
    %c0_i32_0 = arith.constant 0 : i32
    %c0_i32_1 = arith.constant 0 : i32
    return %c0_i32, %c0_i32_0 : i32, i32
  }
  func.func @transform_4(%arg0: i32) -> (i32, i32) {
    %c0_i32 = arith.constant 0 : i32
    %c0_i32_0 = arith.constant 0 : i32
    return %arg0, %c0_i32 : i32, i32
  }
  func.func @transform_5(%arg0: i32) -> (i32, i32, i32) {
    %c0_i32 = arith.constant 0 : i32
    %c0_i32_0 = arith.constant 0 : i32
    %c0_i32_1 = arith.constant 0 : i32
    return %arg0, %c0_i32, %c0_i32_0 : i32, i32, i32
  }
  func.func @transform_6(%arg0: i32) -> (i32, i32, i32) {
    %c0_i32 = arith.constant 0 : i32
    %c0_i32_0 = arith.constant 0 : i32
    %c0_i32_1 = arith.constant 0 : i32
    return %arg0, %c0_i32, %c0_i32_0 : i32, i32, i32
  }
}

module attributes {stable_mosaic.version = 11 : i64} {
  func.func @_bn_relu_conv1x1_stats_kernel(%arg0: i32, %arg1: memref<512x32xbf16, #tpu.memory_space<vmem>>, %arg2: memref<1x32xf32, #tpu.memory_space<vmem>>, %arg3: memref<1x32xf32, #tpu.memory_space<vmem>>, %arg4: memref<32x128xbf16, #tpu.memory_space<vmem>>, %arg5: memref<512x128xbf16, #tpu.memory_space<vmem>>, %arg6: memref<1x1x128xf32, #tpu.memory_space<vmem>>, %arg7: memref<1x1x128xf32, #tpu.memory_space<vmem>>) attributes {dimension_semantics = [#tpu.dimension_semantics<parallel>], iteration_bounds = array<i64: 1>, scalar_prefetch = 0 : i64, scratch_operands = 0 : i64, tpu.core_type = #tpu.core_type<tc>, window_params = [{transform_indices = @transform_0, window_bounds = array<i64: 512, 32>}, {pipeline_mode = #tpu.pipeline_mode<synchronous>, transform_indices = @transform_1, window_bounds = array<i64: 1, 32>}, {pipeline_mode = #tpu.pipeline_mode<synchronous>, transform_indices = @transform_2, window_bounds = array<i64: 1, 32>}, {pipeline_mode = #tpu.pipeline_mode<synchronous>, transform_indices = @transform_3, window_bounds = array<i64: 32, 128>}, {transform_indices = @transform_4, window_bounds = array<i64: 512, 128>}, {transform_indices = @transform_5, window_bounds = array<i64: 1, 1, 128>}, {transform_indices = @transform_6, window_bounds = array<i64: 1, 1, 128>}]} {
    %c0 = arith.constant 0 : index
    %c0_0 = arith.constant 0 : index
    %0 = vector.load %arg1[%c0, %c0_0] : memref<512x32xbf16, #tpu.memory_space<vmem>>, vector<512x32xbf16>
    %1 = arith.extf %0 : vector<512x32xbf16> to vector<512x32xf32>
    %c0_1 = arith.constant 0 : index
    %c0_2 = arith.constant 0 : index
    %2 = vector.load %arg2[%c0_1, %c0_2] : memref<1x32xf32, #tpu.memory_space<vmem>>, vector<1x32xf32>
    %3 = vector.broadcast %2 : vector<1x32xf32> to vector<512x32xf32>
    %4 = arith.mulf %1, %3 : vector<512x32xf32>
    %c0_3 = arith.constant 0 : index
    %c0_4 = arith.constant 0 : index
    %5 = vector.load %arg3[%c0_3, %c0_4] : memref<1x32xf32, #tpu.memory_space<vmem>>, vector<1x32xf32>
    %6 = vector.broadcast %5 : vector<1x32xf32> to vector<512x32xf32>
    %7 = arith.addf %4, %6 : vector<512x32xf32>
    %cst = arith.constant 0.000000e+00 : f32
    %8 = vector.broadcast %cst : f32 to vector<512x32xf32>
    %9 = arith.maximumf %7, %8 : vector<512x32xf32>
    %10 = arith.truncf %9 : vector<512x32xf32> to vector<512x32xbf16>
    %c0_5 = arith.constant 0 : index
    %c0_6 = arith.constant 0 : index
    %11 = vector.load %arg4[%c0_5, %c0_6] : memref<32x128xbf16, #tpu.memory_space<vmem>>, vector<32x128xbf16>
    %cst_7 = arith.constant dense<0.000000e+00> : vector<512x128xf32>
    %12 = tpu.matmul %10, %11, %cst_7 {dimension_numbers = #tpu.dot_dimension_numbers<[1], [0], [0], [1], [0, 0, 1, 1], [], []>} : vector<512x32xbf16>, vector<32x128xbf16>, vector<512x128xf32> -> vector<512x128xf32>
    %13 = arith.truncf %12 : vector<512x128xf32> to vector<512x128xbf16>
    %c0_8 = arith.constant 0 : index
    %c0_9 = arith.constant 0 : index
    %14 = vector.load %arg5[%c0_8, %c0_9] : memref<512x128xbf16, #tpu.memory_space<vmem>>, vector<512x128xbf16>
    tpu.vector_store %arg5[%c0_8, %c0_9], %13 {strides = array<i32>} : memref<512x128xbf16, #tpu.memory_space<vmem>>, vector<512x128xbf16>,
    %15 = arith.extf %13 : vector<512x128xbf16> to vector<512x128xf32>
    %cst_10 = arith.constant dense<0.000000e+00> : vector<128xf32>
    %16 = vector.multi_reduction <add>, %15, %cst_10 [0] : vector<512x128xf32> to vector<128xf32>
    %17 = vector.shape_cast %16 : vector<128xf32> to vector<1x128xf32>
    %c0_11 = arith.constant 0 : index
    %c0_12 = arith.constant 0 : index
    %c0_13 = arith.constant 0 : index
    %18 = vector.load %arg6[%c0_11, %c0_12, %c0_13] : memref<1x1x128xf32, #tpu.memory_space<vmem>>, vector<1x1x128xf32>
    %19 = vector.shape_cast %18 : vector<1x1x128xf32> to vector<1x128xf32>
    %20 = vector.shape_cast %17 : vector<1x128xf32> to vector<1x1x128xf32>
    tpu.vector_store %arg6[%c0_11, %c0_12, %c0_13], %20 {strides = array<i32>} : memref<1x1x128xf32, #tpu.memory_space<vmem>>, vector<1x1x128xf32>,
    %21 = arith.mulf %15, %15 : vector<512x128xf32>
    %cst_14 = arith.constant dense<0.000000e+00> : vector<128xf32>
    %22 = vector.multi_reduction <add>, %21, %cst_14 [0] : vector<512x128xf32> to vector<128xf32>
    %23 = vector.shape_cast %22 : vector<128xf32> to vector<1x128xf32>
    %c0_15 = arith.constant 0 : index
    %c0_16 = arith.constant 0 : index
    %c0_17 = arith.constant 0 : index
    %24 = vector.load %arg7[%c0_15, %c0_16, %c0_17] : memref<1x1x128xf32, #tpu.memory_space<vmem>>, vector<1x1x128xf32>
    %25 = vector.shape_cast %24 : vector<1x1x128xf32> to vector<1x128xf32>
    %26 = vector.shape_cast %23 : vector<1x128xf32> to vector<1x1x128xf32>
    tpu.vector_store %arg7[%c0_15, %c0_16, %c0_17], %26 {strides = array<i32>} : memref<1x1x128xf32, #tpu.memory_space<vmem>>, vector<1x1x128xf32>,
    return
  }
  func.func @transform_0(%arg0: i32) -> (i32, i32) {
    %c0_i32 = arith.constant 0 : i32
    %c0_i32_0 = arith.constant 0 : i32
    return %arg0, %c0_i32 : i32, i32
  }
  func.func @transform_1(%arg0: i32) -> (i32, i32) {
    %c0_i32 = arith.constant 0 : i32
    %c0_i32_0 = arith.constant 0 : i32
    %c0_i32_1 = arith.constant 0 : i32
    return %c0_i32, %c0_i32_0 : i32, i32
  }
  func.func @transform_2(%arg0: i32) -> (i32, i32) {
    %c0_i32 = arith.constant 0 : i32
    %c0_i32_0 = arith.constant 0 : i32
    %c0_i32_1 = arith.constant 0 : i32
    return %c0_i32, %c0_i32_0 : i32, i32
  }
  func.func @transform_3(%arg0: i32) -> (i32, i32) {
    %c0_i32 = arith.constant 0 : i32
    %c0_i32_0 = arith.constant 0 : i32
    %c0_i32_1 = arith.constant 0 : i32
    return %c0_i32, %c0_i32_0 : i32, i32
  }
  func.func @transform_4(%arg0: i32) -> (i32, i32) {
    %c0_i32 = arith.constant 0 : i32
    %c0_i32_0 = arith.constant 0 : i32
    return %arg0, %c0_i32 : i32, i32
  }
  func.func @transform_5(%arg0: i32) -> (i32, i32, i32) {
    %c0_i32 = arith.constant 0 : i32
    %c0_i32_0 = arith.constant 0 : i32
    %c0_i32_1 = arith.constant 0 : i32
    return %arg0, %c0_i32, %c0_i32_0 : i32, i32, i32
  }
  func.func @transform_6(%arg0: i32) -> (i32, i32, i32) {
    %c0_i32 = arith.constant 0 : i32
    %c0_i32_0 = arith.constant 0 : i32
    %c0_i32_1 = arith.constant 0 : i32
    return %arg0, %c0_i32, %c0_i32_0 : i32, i32, i32
  }
}

</mosaic_0001>

<bundles_post_ra>
// kernel: bottleneck_forward.7
= control target key start
LH: loop header
LB: loop body
LE: loop exit
PB: predicated region body
PF: predicated region fallthrough
CT: control target
= control target key end

     0   :  { %s868_s15 = smov 0   ;;  %s870_s16 = smov 0   ;;  %s1069_s0 = inlined_call_operand.vmem [shape: bf16[512,128], index: 0, kind: input, shape index: {}]   ;;  %s1070_s1 = inlined_call_operand.vmem [shape: f32[1,128], index: 1, kind: input, shape index: {}]   ;;  %s1071_s2 = inlined_call_operand.vmem [shape: f32[1,128], index: 2, kind: input, shape index: {}]   ;;  %s1072_s3 = inlined_call_operand.vmem [shape: f32[2,128,256], index: 3, kind: input, shape index: {}]   ;;  %s1073_s4 = inlined_call_operand.vmem [shape: f32[2,128,256], index: 4, kind: output, shape index: {}]  }
   0x1   :  { %s872_s17 = smov 0  }
   0x2 LB: > { %s26_s18 = sadd.s32 1, %s837_s16  ;;  %p703_p0 = scmp.ge.s32.totalorder %s841_s17, 1  ;;  %s841_s17 = sphi %s872_s17, %s14_s17   ;;  %s837_s16 = sphi %s870_s16, %s1075_s16   ;;  %s833_s15 = sphi %s868_s15, %s1074_s15  }
   0x3   : > { %p28_p1 = scmp.ge.s32.totalorder %s26_s18, 2  ;;  %p198_p2 = scmp.lt.s32.totalorder %s841_s17, 3 }
   0x5   : > { %s1077_s18 = smov (%p28_p1, %s26_s18), 0  ;;  %p199_p3 = pnand %p703_p0, %p198_p2 }
   0x6   : > { %s704_s19 = sshll.u32 (!%p199_p3), %s833_s15, 5  ;;  %p247_p5 = scmp.lt.s32.totalorder (!%p199_p3), %s833_s15, 1 }
   0x7   : > { %202 = sbr.rel (%p199_p3) target bundleno = 213 (0xd5), region = 36  ;;  %p240_p4 = scmp.lt.s32.totalorder (!%p199_p3), %s704_s19, 63 }
   0xc   : > { %s1079_s19 = smov (!%p240_p4, %s704_s19), 63  ;;  %v897_v0 = vld [vmem:[%s1070_s1] ss:$0 sm:$0xff]  ;;  %s1081_s15 = smov (!%p247_p5, %s833_s15), 1 }
   0xd   : > { %s705_s20 = sshll.u32 %s1079_s19, 2  ;;  %v906_v9 = vld [vmem:[%s1071_s2] ss:$0 sm:$0xff]  ;;  %s714_s28 = sshll.u32 %s1081_s15, 8 }
   0xe   : > { %s892_s23 = scalar_lea.vmem %s1069_s0, %s705_s20  ;;  %s989_s5 = scalar_lea.vmem %s1072_s3, %s714_s28 }
   0xf   : > { %v787_v1 = vld [vmem:[%s892_s23 + $0x40] sm:$0xff]   ;;  %v788_v3 = vld [vmem:[%s892_s23 + $0x48] sm:$0xff]   ;;  %v789_v24 = vld [vmem:[%s892_s23 + $0x50] sm:$0xff]   ;;  %s996_s8 = scalar_lea.vmem %s1073_s4, %s714_s28 }
  0x10   : > { %v717_v2 = vld [vmem:[%s892_s23] sm:$0xff]   ;;  %v750_v4 = vunpack.c.l.bf16 %v787_v1  ;;  %v751_v6 = vunpack.c.h.bf16 %v787_v1  ;;  %v780_v8 = vld [vmem:[%s892_s23 + $0x8] sm:$0xff]   ;;  %v754_v10 = vunpack.c.l.bf16 %v788_v3  ;;  %v755_v19 = vunpack.c.h.bf16 %v788_v3  ;;  %v781_v25 = vld [vmem:[%s892_s23 + $0x10] sm:$0xff]  }
  0x11   : > { %v718_v5 = vunpack.c.l.bf16 %v717_v2  ;;  %v719_v7 = vunpack.c.h.bf16 %v717_v2  ;;  %v722_v11 = vunpack.c.l.bf16 %v780_v8  ;;  %v723_v20 = vunpack.c.h.bf16 %v780_v8  ;;  %v790_v38 = vld [vmem:[%s892_s23 + $0x58] sm:$0xff]   ;;  %v791_v52 = vld [vmem:[%s892_s23 + $0x60] sm:$0xff]   ;;  %v792_v3 = vld [vmem:[%s892_s23 + $0x68] sm:$0xff]  }
  0x12   : > { %v353_v12 = vmul.f32 %v750_v4, %v897_v0  ;;  %v354_v14 = vmul.f32 %v751_v6, %v897_v0  ;;  %v355_v18 = vmul.f32 %v754_v10, %v897_v0  ;;  %v356_v26 = vmul.f32 %v755_v19, %v897_v0  ;;  %v782_v39 = vld [vmem:[%s892_s23 + $0x18] sm:$0xff]   ;;  %v783_v53 = vld [vmem:[%s892_s23 + $0x20] sm:$0xff]   ;;  %v784_v4 = vld [vmem:[%s892_s23 + $0x28] sm:$0xff]  }
  0x13   : > { %v337_v13 = vmul.f32 %v718_v5, %v897_v0  ;;  %v338_v15 = vmul.f32 %v719_v7, %v897_v0  ;;  %v339_v23 = vmul.f32 %v722_v11, %v897_v0  ;;  %v340_v27 = vmul.f32 %v723_v20, %v897_v0  ;;  %v785_v19 = vld [vmem:[%s892_s23 + $0x30] sm:$0xff]  }
  0x14   : > { %v392_v16 = vadd.f32 %v906_v9, %v353_v12  ;;  %v393_v21 = vadd.f32 %v906_v9, %v354_v14  ;;  %v394_v28 = vadd.f32 %v906_v9, %v355_v18  ;;  %v758_v30 = vunpack.c.l.bf16 %v789_v24  ;;  %v793_v18 = vld [vmem:[%s892_s23 + $0x70] sm:$0xff]  }
  0x15   : > { %v376_v17 = vadd.f32 %v906_v9, %v337_v13  ;;  %v377_v22 = vadd.f32 %v906_v9, %v338_v15  ;;  %v378_v29 = vadd.f32 %v906_v9, %v339_v23  ;;  %v726_v31 = vunpack.c.l.bf16 %v781_v25 }
  0x16   : > { %440 = vxpose.xlu1.b32.start [1/16] %v392_v16, 128  ;;  %v395_v32 = vadd.f32 %v906_v9, %v356_v26  ;;  %v759_v33 = vunpack.c.h.bf16 %v789_v24  ;;  %v379_v34 = vadd.f32 %v906_v9, %v340_v27  ;;  %v357_v35 = vmul.f32 %v758_v30, %v897_v0 }
  0x17   : > { %408 = vxpose.xlu0.b32.start [1/16] %v376_v17, 128  ;;  %v341_v36 = vmul.f32 %v726_v31, %v897_v0  ;;  %v727_v37 = vunpack.c.h.bf16 %v781_v25  ;;  %v762_v41 = vunpack.c.l.bf16 %v790_v38  ;;  %v730_v45 = vunpack.c.l.bf16 %v782_v39 }
  0x18   : > { %v358_v40 = vmul.f32 %v759_v33, %v897_v0  ;;  %v396_v42 = vadd.f32 %v906_v9, %v357_v35  ;;  %v763_v47 = vunpack.c.h.bf16 %v790_v38  ;;  %v731_v51 = vunpack.c.h.bf16 %v782_v39  ;;  %v786_v33 = vld [vmem:[%s892_s23 + $0x38] sm:$0xff]  }
  0x19   : > { %v380_v43 = vadd.f32 %v906_v9, %v341_v36  ;;  %v342_v44 = vmul.f32 %v727_v37, %v897_v0  ;;  %v359_v46 = vmul.f32 %v762_v41, %v897_v0  ;;  %v343_v50 = vmul.f32 %v730_v45, %v897_v0 }
  0x1a   : > { %441 = vxpose.xlu1.b32.cont [2/16] %v393_v21, 128  ;;  %v397_v48 = vadd.f32 %v906_v9, %v358_v40  ;;  %v360_v54 = vmul.f32 %v763_v47, %v897_v0  ;;  %v766_v55 = vunpack.c.l.bf16 %v791_v52  ;;  %v344_v58 = vmul.f32 %v731_v51, %v897_v0 }
  0x1b   : > { %409 = vxpose.xlu0.b32.cont [2/16] %v377_v22, 128  ;;  %v381_v49 = vadd.f32 %v906_v9, %v342_v44  ;;  %v398_v56 = vadd.f32 %v906_v9, %v359_v46  ;;  %v382_v57 = vadd.f32 %v906_v9, %v343_v50  ;;  %v734_v59 = vunpack.c.l.bf16 %v783_v53 }
  0x1c   : > { %v399_v60 = vadd.f32 %v906_v9, %v360_v54  ;;  %v361_v61 = vmul.f32 %v766_v55, %v897_v0  ;;  %v383_v62 = vadd.f32 %v906_v9, %v344_v58  ;;  %v767_v1 = vunpack.c.h.bf16 %v791_v52  ;;  %v472_v52 = vld [vmem:[%s989_s5] sm:$0xff] }
  0x1d   : > { %v345_v63 = vmul.f32 %v734_v59, %v897_v0  ;;  %v735_v2 = vunpack.c.h.bf16 %v783_v53  ;;  %v770_v6 = vunpack.c.l.bf16 %v792_v3  ;;  %v738_v11 = vunpack.c.l.bf16 %v784_v4 }
  0x1e   : > { %442 = vxpose.xlu1.b32.cont [3/16] %v394_v28, 128  ;;  %v400_v5 = vadd.f32 %v906_v9, %v361_v61  ;;  %v362_v8 = vmul.f32 %v767_v1, %v897_v0  ;;  %v771_v13 = vunpack.c.h.bf16 %v792_v3  ;;  %v739_v17 = vunpack.c.h.bf16 %v784_v4  ;;  %v477_v1 = vld [vmem:[%s989_s5 + $0x28] sm:$0xff] }
  0x1f   : > { %410 = vxpose.xlu0.b32.cont [3/16] %v378_v29, 128  ;;  %v384_v7 = vadd.f32 %v906_v9, %v345_v63  ;;  %v346_v10 = vmul.f32 %v735_v2, %v897_v0  ;;  %v363_v12 = vmul.f32 %v770_v6, %v897_v0  ;;  %v347_v16 = vmul.f32 %v738_v11, %v897_v0  ;;  %v476_v2 = vld [vmem:[%s989_s5 + $0x20] sm:$0xff]  ;;  %v478_v11 = vld [vmem:[%s989_s5 + $0x30] sm:$0xff] }
  0x20   : > { %v401_v14 = vadd.f32 %v906_v9, %v362_v8  ;;  %v364_v20 = vmul.f32 %v771_v13, %v897_v0  ;;  %v774_v21 = vunpack.c.l.bf16 %v793_v18  ;;  %v348_v24 = vmul.f32 %v739_v17, %v897_v0 }
  0x21   : > { %v385_v15 = vadd.f32 %v906_v9, %v346_v10  ;;  %v402_v22 = vadd.f32 %v906_v9, %v363_v12  ;;  %v386_v23 = vadd.f32 %v906_v9, %v347_v16  ;;  %v742_v25 = vunpack.c.l.bf16 %v785_v19  ;;  %v479_v10 = vld [vmem:[%s989_s5 + $0x38] sm:$0xff] }
  0x22   : > { %443 = vxpose.xlu1.b32.cont [4/16] %v395_v32, 128  ;;  %v403_v26 = vadd.f32 %v906_v9, %v364_v20  ;;  %v365_v27 = vmul.f32 %v774_v21, %v897_v0  ;;  %v387_v28 = vadd.f32 %v906_v9, %v348_v24  ;;  %v775_v30 = vunpack.c.h.bf16 %v793_v18  ;;  %v794_v32 = vld [vmem:[%s892_s23 + $0x78] sm:$0xff]   ;;  %v481_v18 = vld [vmem:[%s989_s5 + $0x48] sm:$0xff] }
  0x23   : > { %411 = vxpose.xlu0.b32.cont [4/16] %v379_v34, 128  ;;  %v349_v29 = vmul.f32 %v742_v25, %v897_v0  ;;  %v743_v31 = vunpack.c.h.bf16 %v785_v19  ;;  %v778_v35 = vunpack.c.l.bf16 %v794_v32  ;;  %v746_v39 = vunpack.c.l.bf16 %v786_v33  ;;  %v480_v19 = vld [vmem:[%s989_s5 + $0x40] sm:$0xff] }
  0x24   : > { %v404_v34 = vadd.f32 %v906_v9, %v365_v27  ;;  %v366_v37 = vmul.f32 %v775_v30, %v897_v0  ;;  %v779_v41 = vunpack.c.h.bf16 %v794_v32  ;;  %v747_v45 = vunpack.c.h.bf16 %v786_v33  ;;  %v482_v27 = vld [vmem:[%s989_s5 + $0x50] sm:$0xff] }
  0x25   : > { %v388_v36 = vadd.f32 %v906_v9, %v349_v29  ;;  %v350_v38 = vmul.f32 %v743_v31, %v897_v0  ;;  %v367_v40 = vmul.f32 %v778_v35, %v897_v0  ;;  %v351_v44 = vmul.f32 %v746_v39, %v897_v0  ;;  %v484_v35 = vld [vmem:[%s989_s5 + $0x60] sm:$0xff] }
  0x26   : > { %444 = vxpose.xlu1.b32.cont [5/16] %v396_v42, 128  ;;  %v405_v42 = vadd.f32 %v906_v9, %v366_v37  ;;  %v368_v46 = vmul.f32 %v779_v41, %v897_v0 }
  0x27   : > { %412 = vxpose.xlu0.b32.cont [5/16] %v380_v43, 128  ;;  %v389_v43 = vadd.f32 %v906_v9, %v350_v38  ;;  %v406_v47 = vadd.f32 %v906_v9, %v367_v40 }
  0x28   : > { %v407_v50 = vadd.f32 %v906_v9, %v368_v46 }
  0x2a   : > { %445 = vxpose.xlu1.b32.cont [6/16] %v397_v48, 128  ;;  %v390_v48 = vadd.f32 %v906_v9, %v351_v44 }
  0x2b   : > { %413 = vxpose.xlu0.b32.cont [6/16] %v381_v49, 128  ;;  %v352_v49 = vmul.f32 %v747_v45, %v897_v0  ;;  %v473_v0 = vld [vmem:[%s989_s5 + $0x8] sm:$0xff] }
  0x2d   : > { %v391_v51 = vadd.f32 %v906_v9, %v352_v49 }
  0x2e   : > { %446 = vxpose.xlu1.b32.cont [7/16] %v398_v56, 128  ;;  %v475_v56 = vld [vmem:[%s989_s5 + $0x18] sm:$0xff] }
  0x2f   : > { %414 = vxpose.xlu0.b32.cont [7/16] %v382_v57, 128  ;;  %v474_v57 = vld [vmem:[%s989_s5 + $0x10] sm:$0xff] }
  0x32   : > { %447 = vxpose.xlu1.b32.cont [8/16] %v399_v60, 128 }
  0x33   : > { %415 = vxpose.xlu0.b32.cont [8/16] %v383_v62, 128 }
  0x36   : > { %448 = vxpose.xlu1.b32.cont [9/16] %v400_v5, 128 }
  0x37   : > { %416 = vxpose.xlu0.b32.cont [9/16] %v384_v7, 128 }
  0x3a   : > { %449 = vxpose.xlu1.b32.cont [10/16] %v401_v14, 128 }
  0x3b   : > { %417 = vxpose.xlu0.b32.cont [10/16] %v385_v15, 128 }
  0x3e   : > { %450 = vxpose.xlu1.b32.cont [11/16] %v402_v22, 128 }
  0x3f   : > { %418 = vxpose.xlu0.b32.cont [11/16] %v386_v23, 128 }
  0x42   : > { %451 = vxpose.xlu1.b32.cont [12/16] %v403_v26, 128  ;;  %v483_v26 = vld [vmem:[%s989_s5 + $0x58] sm:$0xff] }
  0x43   : > { %419 = vxpose.xlu0.b32.cont [12/16] %v387_v28, 128 }
  0x46   : > { %452 = vxpose.xlu1.b32.cont [13/16] %v404_v34, 128  ;;  %v485_v34 = vld [vmem:[%s989_s5 + $0x68] sm:$0xff] }
  0x47   : > { %420 = vxpose.xlu0.b32.cont [13/16] %v388_v36, 128 }
  0x4a   : > { %453 = vxpose.xlu1.b32.cont [14/16] %v405_v42, 128  ;;  %v487_v42 = vld [vmem:[%s989_s5 + $0x78] sm:$0xff] }
  0x4b   : > { %421 = vxpose.xlu0.b32.cont [14/16] %v389_v43, 128  ;;  %v486_v43 = vld [vmem:[%s989_s5 + $0x70] sm:$0xff] }
  0x4e   : > { %454 = vxpose.xlu1.b32.cont [15/16] %v406_v47, 128 }
  0x4f   : > { %422 = vxpose.xlu0.b32.cont [15/16] %v390_v48, 128 }
  0x52   : > { %455 = vxpose.xlu1.b32.end [16/16] %v407_v50, 128  ;;  %v489_v50 = vld [vmem:[%s989_s5 + $0x88] sm:$0xff] }
  0x53   : > { %423 = vxpose.xlu0.b32.end [16/16] %v391_v51, 128  ;;  %v488_v51 = vld [vmem:[%s989_s5 + $0x80] sm:$0xff] }
  0x92   : > { %v456_v53 = vpop.trf.xlu1 }
  0x93   : > { %v424_v9 = vpop.trf.xlu0  ;;  %v505_v54 = vadd.f32 %v473_v0, %v456_v53 }
  0x94   : > { %v504_v55 = vadd.f32 %v472_v52, %v424_v9 }
  0x95   : > { %v537_v58 = vmax.f32 %v505_v54, 0.0 }
  0x96   : > { %v536_v59 = vmax.f32 %v504_v55, 0.0  ;;  %v457_v60 = vpop.trf.xlu1 }
  0x97   : > { %v425_v61 = vpop.trf.xlu0  ;;  %569 = vst [vmem:[%s996_s8 + $0x8] sm:$0xff] %v537_v58  ;;  %v507_v62 = vadd.f32 %v475_v56, %v457_v60  ;;  %v491_v56 = vld [vmem:[%s989_s5 + $0x98] sm:$0xff] }
  0x98   : > { %568 = vst [vmem:[%s996_s8] sm:$0xff] %v536_v59  ;;  %v506_v63 = vadd.f32 %v474_v57, %v425_v61  ;;  %v490_v57 = vld [vmem:[%s989_s5 + $0x90] sm:$0xff] }
  0x99   : > { %v539_v3 = vmax.f32 %v507_v62, 0.0 }
  0x9a   : > { %v538_v4 = vmax.f32 %v506_v63, 0.0  ;;  %v458_v5 = vpop.trf.xlu1 }
  0x9b   : > { %v426_v6 = vpop.trf.xlu0  ;;  %571 = vst [vmem:[%s996_s8 + $0x18] sm:$0xff] %v539_v3  ;;  %v509_v7 = vadd.f32 %v477_v1, %v458_v5  ;;  %v493_v1 = vld [vmem:[%s989_s5 + $0xa8] sm:$0xff] }
  0x9c   : > { %570 = vst [vmem:[%s996_s8 + $0x10] sm:$0xff] %v538_v4  ;;  %v508_v8 = vadd.f32 %v476_v2, %v426_v6  ;;  %v492_v2 = vld [vmem:[%s989_s5 + $0xa0] sm:$0xff] }
  0x9d   : > { %v541_v12 = vmax.f32 %v509_v7, 0.0 }
  0x9e   : > { %v540_v13 = vmax.f32 %v508_v8, 0.0  ;;  %v459_v14 = vpop.trf.xlu1 }
  0x9f   : > { %v427_v15 = vpop.trf.xlu0  ;;  %573 = vst [vmem:[%s996_s8 + $0x28] sm:$0xff] %v541_v12  ;;  %v511_v16 = vadd.f32 %v479_v10, %v459_v14  ;;  %v495_v10 = vld [vmem:[%s989_s5 + $0xb8] sm:$0xff] }
  0xa0   : > { %572 = vst [vmem:[%s996_s8 + $0x20] sm:$0xff] %v540_v13  ;;  %v510_v17 = vadd.f32 %v478_v11, %v427_v15  ;;  %v494_v11 = vld [vmem:[%s989_s5 + $0xb0] sm:$0xff] }
  0xa1   : > { %v543_v20 = vmax.f32 %v511_v16, 0.0 }
  0xa2   : > { %v542_v21 = vmax.f32 %v510_v17, 0.0  ;;  %v460_v22 = vpop.trf.xlu1 }
  0xa3   : > { %v428_v23 = vpop.trf.xlu0  ;;  %575 = vst [vmem:[%s996_s8 + $0x38] sm:$0xff] %v543_v20  ;;  %v513_v24 = vadd.f32 %v481_v18, %v460_v22  ;;  %v497_v18 = vld [vmem:[%s989_s5 + $0xc8] sm:$0xff] }
  0xa4   : > { %574 = vst [vmem:[%s996_s8 + $0x30] sm:$0xff] %v542_v21  ;;  %v512_v25 = vadd.f32 %v480_v19, %v428_v23  ;;  %v496_v19 = vld [vmem:[%s989_s5 + $0xc0] sm:$0xff] }
  0xa5   : > { %v545_v28 = vmax.f32 %v513_v24, 0.0 }
  0xa6   : > { %v544_v29 = vmax.f32 %v512_v25, 0.0  ;;  %v461_v30 = vpop.trf.xlu1 }
  0xa7   : > { %v429_v31 = vpop.trf.xlu0  ;;  %577 = vst [vmem:[%s996_s8 + $0x48] sm:$0xff] %v545_v28  ;;  %v515_v32 = vadd.f32 %v483_v26, %v461_v30  ;;  %v499_v26 = vld [vmem:[%s989_s5 + $0xd8] sm:$0xff] }
  0xa8   : > { %576 = vst [vmem:[%s996_s8 + $0x40] sm:$0xff] %v544_v29  ;;  %v514_v33 = vadd.f32 %v482_v27, %v429_v31  ;;  %v498_v27 = vld [vmem:[%s989_s5 + $0xd0] sm:$0xff] }
  0xa9   : > { %v547_v36 = vmax.f32 %v515_v32, 0.0 }
  0xaa   : > { %v546_v37 = vmax.f32 %v514_v33, 0.0  ;;  %v462_v38 = vpop.trf.xlu1 }
  0xab   : > { %v430_v39 = vpop.trf.xlu0  ;;  %579 = vst [vmem:[%s996_s8 + $0x58] sm:$0xff] %v547_v36  ;;  %v517_v40 = vadd.f32 %v485_v34, %v462_v38  ;;  %v501_v34 = vld [vmem:[%s989_s5 + $0xe8] sm:$0xff] }
  0xac   : > { %578 = vst [vmem:[%s996_s8 + $0x50] sm:$0xff] %v546_v37  ;;  %v516_v41 = vadd.f32 %v484_v35, %v430_v39  ;;  %v500_v35 = vld [vmem:[%s989_s5 + $0xe0] sm:$0xff] }
  0xad   : > { %v549_v44 = vmax.f32 %v517_v40, 0.0 }
  0xae   : > { %v548_v45 = vmax.f32 %v516_v41, 0.0  ;;  %v463_v46 = vpop.trf.xlu1 }
  0xaf   : > { %v431_v47 = vpop.trf.xlu0  ;;  %581 = vst [vmem:[%s996_s8 + $0x68] sm:$0xff] %v549_v44  ;;  %v519_v48 = vadd.f32 %v487_v42, %v463_v46  ;;  %v503_v42 = vld [vmem:[%s989_s5 + $0xf8] sm:$0xff] }
  0xb0   : > { %580 = vst [vmem:[%s996_s8 + $0x60] sm:$0xff] %v548_v45  ;;  %v518_v49 = vadd.f32 %v486_v43, %v431_v47  ;;  %v502_v43 = vld [vmem:[%s989_s5 + $0xf0] sm:$0xff] }
  0xb1   : > { %v551_v0 = vmax.f32 %v519_v48, 0.0 }
  0xb2   : > { %v550_v52 = vmax.f32 %v518_v49, 0.0  ;;  %v464_v53 = vpop.trf.xlu1 }
  0xb3   : > { %v432_v9 = vpop.trf.xlu0  ;;  %583 = vst [vmem:[%s996_s8 + $0x78] sm:$0xff] %v551_v0  ;;  %v521_v54 = vadd.f32 %v489_v50, %v464_v53 }
  0xb4   : > { %582 = vst [vmem:[%s996_s8 + $0x70] sm:$0xff] %v550_v52  ;;  %v520_v55 = vadd.f32 %v488_v51, %v432_v9 }
  0xb5   : > { %v553_v58 = vmax.f32 %v521_v54, 0.0 }
  0xb6   : > { %v552_v59 = vmax.f32 %v520_v55, 0.0  ;;  %v465_v60 = vpop.trf.xlu1 }
  0xb7   : > { %v433_v61 = vpop.trf.xlu0  ;;  %585 = vst [vmem:[%s996_s8 + $0x88] sm:$0xff] %v553_v58  ;;  %v523_v62 = vadd.f32 %v491_v56, %v465_v60 }
  0xb8   : > { %584 = vst [vmem:[%s996_s8 + $0x80] sm:$0xff] %v552_v59  ;;  %v522_v63 = vadd.f32 %v490_v57, %v433_v61 }
  0xb9   : > { %v555_v3 = vmax.f32 %v523_v62, 0.0 }
  0xba   : > { %v554_v4 = vmax.f32 %v522_v63, 0.0  ;;  %v466_v5 = vpop.trf.xlu1 }
  0xbb   : > { %v434_v6 = vpop.trf.xlu0  ;;  %587 = vst [vmem:[%s996_s8 + $0x98] sm:$0xff] %v555_v3  ;;  %v525_v7 = vadd.f32 %v493_v1, %v466_v5 }
  0xbc   : > { %586 = vst [vmem:[%s996_s8 + $0x90] sm:$0xff] %v554_v4  ;;  %v524_v8 = vadd.f32 %v492_v2, %v434_v6 }
  0xbd   : > { %v557_v12 = vmax.f32 %v525_v7, 0.0 }
  0xbe   : > { %v556_v13 = vmax.f32 %v524_v8, 0.0  ;;  %v467_v14 = vpop.trf.xlu1 }
  0xbf   : > { %v435_v15 = vpop.trf.xlu0  ;;  %589 = vst [vmem:[%s996_s8 + $0xa8] sm:$0xff] %v557_v12  ;;  %v527_v16 = vadd.f32 %v495_v10, %v467_v14 }
  0xc0   : > { %588 = vst [vmem:[%s996_s8 + $0xa0] sm:$0xff] %v556_v13  ;;  %v526_v17 = vadd.f32 %v494_v11, %v435_v15 }
  0xc1   : > { %v559_v20 = vmax.f32 %v527_v16, 0.0 }
  0xc2   : > { %v558_v21 = vmax.f32 %v526_v17, 0.0  ;;  %v468_v22 = vpop.trf.xlu1 }
  0xc3   : > { %v436_v23 = vpop.trf.xlu0  ;;  %591 = vst [vmem:[%s996_s8 + $0xb8] sm:$0xff] %v559_v20  ;;  %v529_v24 = vadd.f32 %v497_v18, %v468_v22 }
  0xc4   : > { %590 = vst [vmem:[%s996_s8 + $0xb0] sm:$0xff] %v558_v21  ;;  %v528_v25 = vadd.f32 %v496_v19, %v436_v23 }
  0xc5   : > { %v561_v28 = vmax.f32 %v529_v24, 0.0 }
  0xc6   : > { %v560_v29 = vmax.f32 %v528_v25, 0.0  ;;  %v469_v30 = vpop.trf.xlu1 }
  0xc7   : > { %v437_v31 = vpop.trf.xlu0  ;;  %593 = vst [vmem:[%s996_s8 + $0xc8] sm:$0xff] %v561_v28  ;;  %v531_v32 = vadd.f32 %v499_v26, %v469_v30 }
  0xc8   : > { %592 = vst [vmem:[%s996_s8 + $0xc0] sm:$0xff] %v560_v29  ;;  %v530_v33 = vadd.f32 %v498_v27, %v437_v31 }
  0xc9   : > { %v563_v36 = vmax.f32 %v531_v32, 0.0 }
  0xca   : > { %v562_v37 = vmax.f32 %v530_v33, 0.0  ;;  %v470_v38 = vpop.trf.xlu1 }
  0xcb   : > { %v438_v39 = vpop.trf.xlu0  ;;  %595 = vst [vmem:[%s996_s8 + $0xd8] sm:$0xff] %v563_v36  ;;  %v533_v40 = vadd.f32 %v501_v34, %v470_v38 }
  0xcc   : > { %594 = vst [vmem:[%s996_s8 + $0xd0] sm:$0xff] %v562_v37  ;;  %v532_v41 = vadd.f32 %v500_v35, %v438_v39 }
  0xcd   : > { %v565_v44 = vmax.f32 %v533_v40, 0.0 }
  0xce   : > { %v564_v45 = vmax.f32 %v532_v41, 0.0  ;;  %v471_v46 = vpop.trf.xlu1 }
  0xcf   : > { %v439_v47 = vpop.trf.xlu0  ;;  %597 = vst [vmem:[%s996_s8 + $0xe8] sm:$0xff] %v565_v44  ;;  %v535_v48 = vadd.f32 %v503_v42, %v471_v46 }
  0xd0   : > { %596 = vst [vmem:[%s996_s8 + $0xe0] sm:$0xff] %v564_v45  ;;  %v534_v49 = vadd.f32 %v502_v43, %v439_v47 }
  0xd1   : > { %v567_v50 = vmax.f32 %v535_v48, 0.0 }
  0xd2   : > { %v566_v51 = vmax.f32 %v534_v49, 0.0 }
  0xd3   : > { %599 = vst [vmem:[%s996_s8 + $0xf8] sm:$0xff] %v567_v50 }
  0xd4   : > { %598 = vst [vmem:[%s996_s8 + $0xf0] sm:$0xff] %v566_v51 }
  0xd5 PF: > { %s14_s17 = sadd.s32 1, %s841_s17   ;;  %s1074_s15 = smov %s837_s16 }
  0xd6   : > { %p11_p6 = scmp.ge.s32.totalorder %s14_s17, 4   ;;  %s1075_s16 = smov %s1077_s18 }
  0xd8   :  { %13 = sbr.rel (!%p11_p6) target bundleno = 2 (0x2), region = 69 }

// kernel: bottleneck_forward.4
= control target key start
LH: loop header
LB: loop body
LE: loop exit
PB: predicated region body
PF: predicated region fallthrough
CT: control target
= control target key end

     0   :  { %s1347_s15 = smov 0   ;;  %s1349_s16 = smov 0   ;;  %s1664_s0 = inlined_call_operand.vmem [shape: f32[2,128,256], index: 0, kind: input, shape index: {}]   ;;  %s1665_s1 = inlined_call_operand.vmem [shape: bf16[128,32], index: 1, kind: input, shape index: {}]   ;;  %s1666_s2 = inlined_call_operand.vmem [shape: bf16[512,32], index: 2, kind: output, shape index: {0}]   ;;  %s1667_s3 = inlined_call_operand.vmem [shape: f32[2,1,32], index: 3, kind: output, shape index: {1}]   ;;  %s1668_s4 = inlined_call_operand.vmem [shape: f32[2,1,32], index: 4, kind: output, shape index: {2}]  }
   0x1   :  { %s1351_s17 = smov 0  }
   0x2 LB: > { %s27_s18 = sadd.s32 1, %s1316_s16  ;;  %p1098_p0 = scmp.ge.s32.totalorder %s1320_s17, 1  ;;  %s1320_s17 = sphi %s1351_s17, %s15_s17   ;;  %s1316_s16 = sphi %s1349_s16, %s1670_s16   ;;  %s1312_s15 = sphi %s1347_s15, %s1669_s15  }
   0x3   : > { %p29_p1 = scmp.ge.s32.totalorder %s27_s18, 2  ;;  %p192_p2 = scmp.lt.s32.totalorder %s1320_s17, 3 }
   0x5   : > { %s1672_s18 = smov (%p29_p1, %s27_s18), 0  ;;  %p193_p3 = pnand %p1098_p0, %p192_p2 }
   0x6   : > { %p232_p4 = scmp.lt.s32.totalorder (!%p193_p3), %s1312_s15, 1  ;;  %s1101_s14 = sshll.u32 (!%p193_p3), %s1312_s15, 5 }
   0x7   : > { %196 = sbr.rel (%p193_p3) target bundleno = 463 (0x1cf), region = 28  ;;  %p243_p5 = scmp.lt.s32.totalorder (!%p193_p3), %s1101_s14, 63 }
   0xc   : > { %v1290_v0 = vld [vmem:[%s1665_s1 + $0x38] sm:$0xff]   ;;  %v1291_v1 = vld [vmem:[%s1665_s1 + $0x30] sm:$0xff]   ;;  %s1375_s23 = scalar_select %p232_p4, %s1312_s15, 1  ;;  %v1292_v2 = vld [vmem:[%s1665_s1 + $0x28] sm:$0xff]   ;;  %vm725_vm0 = vcmask 257024   ;;  %vm790_vm1 = vcmask 261120  }
   0xd   : > { %1202 = vmatprep.subr.bf16.mxu0 %v1290_v0  ;;  %1250 = vmatprep.subr.bf16.mxu1 %v1290_v0  ;;  %v1293_v6 = vld [vmem:[%s1665_s1 + $0x20] sm:$0xff]   ;;  %v1294_v9 = vld [vmem:[%s1665_s1 + $0x18] sm:$0xff]   ;;  %v1295_v12 = vld [vmem:[%s1665_s1 + $0x10] sm:$0xff]   ;;  %s1674_s14 = smov (!%p243_p5, %s1101_s14), 63  ;;  %vm860_vm2 = vcmask 253952  }
   0xe   : > { %1203 = vmatpush3.bf16.msra.mxu0 %v1290_v0  ;;  %1258 = vmatpush3.bf16.msra.mxu1 %v1290_v0  ;;  %s1145_s24 = sshll.u32 %s1375_s23, 8  ;;  %v1296_v15 = vld [vmem:[%s1665_s1 + $0x8] sm:$0xff]   ;;  %v1297_v18 = vld [vmem:[%s1665_s1] sm:$0xff]   ;;  %s1102_s19 = sshll.u32 %s1674_s14, 2 }
   0xf   : > { %1204 = vmatprep.subr.bf16.mxu0 %v1291_v1  ;;  %1251 = vmatprep.subr.bf16.mxu1 %v1291_v1  ;;  %s1384_s29 = scalar_lea.vmem %s1664_s0, %s1145_s24  ;;  %s1437_s22 = scalar_lea.vmem %s1666_s2, %s1102_s19 }
  0x10   : > { %v260_v3 = vld [vmem:[%s1384_s29] sm:$0xff]  ;;  %v262_v4 = vld [vmem:[%s1384_s29 + $0x10] sm:$0xff]  ;;  %v261_v5 = vld [vmem:[%s1384_s29 + $0x8] sm:$0xff]  ;;  %s252_s25 = scalar_lea.vmem %s1667_s3, %s1375_s23  ;;  %s257_s28 = scalar_lea.vmem %s1668_s4, %s1375_s23 }
  0x11   : > { %292 = vxpose.xlu0.b32.start [1/16] %v260_v3, 128  ;;  %324 = vxpose.xlu1.b32.start [1/16] %v261_v5, 128  ;;  %v263_v7 = vld [vmem:[%s1384_s29 + $0x18] sm:$0xff]  ;;  %v264_v8 = vld [vmem:[%s1384_s29 + $0x20] sm:$0xff]  ;;  %v265_v10 = vld [vmem:[%s1384_s29 + $0x28] sm:$0xff] }
  0x12   : > { %1205 = vmatpush3.bf16.msra.mxu0 %v1291_v1  ;;  %1259 = vmatpush3.bf16.msra.mxu1 %v1291_v1  ;;  %v266_v11 = vld [vmem:[%s1384_s29 + $0x30] sm:$0xff]  ;;  %v267_v13 = vld [vmem:[%s1384_s29 + $0x38] sm:$0xff]  ;;  %v268_v14 = vld [vmem:[%s1384_s29 + $0x40] sm:$0xff] }
  0x13   : > { %1206 = vmatprep.subr.bf16.mxu0 %v1292_v2  ;;  %1252 = vmatprep.subr.bf16.mxu1 %v1292_v2  ;;  %v269_v16 = vld [vmem:[%s1384_s29 + $0x48] sm:$0xff]  ;;  %v270_v17 = vld [vmem:[%s1384_s29 + $0x50] sm:$0xff]  ;;  %v271_v19 = vld [vmem:[%s1384_s29 + $0x58] sm:$0xff] }
  0x14   : > { %v272_v20 = vld [vmem:[%s1384_s29 + $0x60] sm:$0xff]  ;;  %v273_v21 = vld [vmem:[%s1384_s29 + $0x68] sm:$0xff]  ;;  %v274_v22 = vld [vmem:[%s1384_s29 + $0x70] sm:$0xff] }
  0x15   : > { %293 = vxpose.xlu0.b32.cont [2/16] %v262_v4, 128  ;;  %325 = vxpose.xlu1.b32.cont [2/16] %v263_v7, 128  ;;  %v275_v23 = vld [vmem:[%s1384_s29 + $0x78] sm:$0xff]  ;;  %v276_v24 = vld [vmem:[%s1384_s29 + $0x80] sm:$0xff]  ;;  %v277_v25 = vld [vmem:[%s1384_s29 + $0x88] sm:$0xff] }
  0x16   : > { %1207 = vmatpush3.bf16.msra.mxu0 %v1292_v2  ;;  %1260 = vmatpush3.bf16.msra.mxu1 %v1292_v2  ;;  %v278_v26 = vld [vmem:[%s1384_s29 + $0x90] sm:$0xff]  ;;  %v279_v27 = vld [vmem:[%s1384_s29 + $0x98] sm:$0xff]  ;;  %v280_v28 = vld [vmem:[%s1384_s29 + $0xa0] sm:$0xff] }
  0x17   : > { %1208 = vmatprep.subr.bf16.mxu0 %v1293_v6  ;;  %1253 = vmatprep.subr.bf16.mxu1 %v1293_v6  ;;  %v281_v29 = vld [vmem:[%s1384_s29 + $0xa8] sm:$0xff]  ;;  %v282_v30 = vld [vmem:[%s1384_s29 + $0xb0] sm:$0xff]  ;;  %v283_v31 = vld [vmem:[%s1384_s29 + $0xb8] sm:$0xff] }
  0x18   : > { %v284_v32 = vld [vmem:[%s1384_s29 + $0xc0] sm:$0xff]  ;;  %v285_v33 = vld [vmem:[%s1384_s29 + $0xc8] sm:$0xff]  ;;  %v286_v34 = vld [vmem:[%s1384_s29 + $0xd0] sm:$0xff] }
  0x19   : > { %294 = vxpose.xlu0.b32.cont [3/16] %v264_v8, 128  ;;  %326 = vxpose.xlu1.b32.cont [3/16] %v265_v10, 128  ;;  %v287_v35 = vld [vmem:[%s1384_s29 + $0xd8] sm:$0xff]  ;;  %v288_v36 = vld [vmem:[%s1384_s29 + $0xe0] sm:$0xff]  ;;  %v289_v37 = vld [vmem:[%s1384_s29 + $0xe8] sm:$0xff] }
  0x1a   : > { %1209 = vmatpush3.bf16.msra.mxu0 %v1293_v6  ;;  %1261 = vmatpush3.bf16.msra.mxu1 %v1293_v6  ;;  %v290_v38 = vld [vmem:[%s1384_s29 + $0xf0] sm:$0xff]  ;;  %v291_v39 = vld [vmem:[%s1384_s29 + $0xf8] sm:$0xff] }
  0x1b   : > { %1210 = vmatprep.subr.bf16.mxu0 %v1294_v9  ;;  %1254 = vmatprep.subr.bf16.mxu1 %v1294_v9 }
  0x1d   : > { %295 = vxpose.xlu0.b32.cont [4/16] %v266_v11, 128  ;;  %327 = vxpose.xlu1.b32.cont [4/16] %v267_v13, 128 }
  0x1e   : > { %1211 = vmatpush3.bf16.msra.mxu0 %v1294_v9  ;;  %1262 = vmatpush3.bf16.msra.mxu1 %v1294_v9 }
  0x1f   : > { %1212 = vmatprep.subr.bf16.mxu0 %v1295_v12  ;;  %1255 = vmatprep.subr.bf16.mxu1 %v1295_v12 }
  0x21   : > { %296 = vxpose.xlu0.b32.cont [5/16] %v268_v14, 128  ;;  %328 = vxpose.xlu1.b32.cont [5/16] %v269_v16, 128 }
  0x22   : > { %1213 = vmatpush3.bf16.msra.mxu0 %v1295_v12  ;;  %1263 = vmatpush3.bf16.msra.mxu1 %v1295_v12 }
  0x23   : > { %1214 = vmatprep.subr.bf16.mxu0 %v1296_v15  ;;  %1256 = vmatprep.subr.bf16.mxu1 %v1296_v15 }
  0x25   : > { %297 = vxpose.xlu0.b32.cont [6/16] %v270_v17, 128  ;;  %329 = vxpose.xlu1.b32.cont [6/16] %v271_v19, 128 }
  0x26   : > { %1215 = vmatpush3.bf16.msra.mxu0 %v1296_v15  ;;  %1264 = vmatpush3.bf16.msra.mxu1 %v1296_v15 }
  0x27   : > { %1216 = vmatprep.subr.bf16.mxu0 %v1297_v18  ;;  %1257 = vmatprep.subr.bf16.mxu1 %v1297_v18 }
  0x29   : > { %298 = vxpose.xlu0.b32.cont [7/16] %v272_v20, 128  ;;  %330 = vxpose.xlu1.b32.cont [7/16] %v273_v21, 128 }
  0x2a   : > { %1217 = vmatpush3.bf16.msra.mxu0 %v1297_v18  ;;  %1265 = vmatpush3.bf16.msra.mxu1 %v1297_v18 }
  0x2d   : > { %299 = vxpose.xlu0.b32.cont [8/16] %v274_v22, 128  ;;  %331 = vxpose.xlu1.b32.cont [8/16] %v275_v23, 128 }
  0x31   : > { %300 = vxpose.xlu0.b32.cont [9/16] %v276_v24, 128  ;;  %332 = vxpose.xlu1.b32.cont [9/16] %v277_v25, 128 }
  0x35   : > { %301 = vxpose.xlu0.b32.cont [10/16] %v278_v26, 128  ;;  %333 = vxpose.xlu1.b32.cont [10/16] %v279_v27, 128 }
  0x39   : > { %302 = vxpose.xlu0.b32.cont [11/16] %v280_v28, 128  ;;  %334 = vxpose.xlu1.b32.cont [11/16] %v281_v29, 128 }
  0x3d   : > { %303 = vxpose.xlu0.b32.cont [12/16] %v282_v30, 128  ;;  %335 = vxpose.xlu1.b32.cont [12/16] %v283_v31, 128 }
  0x41   : > { %304 = vxpose.xlu0.b32.cont [13/16] %v284_v32, 128  ;;  %336 = vxpose.xlu1.b32.cont [13/16] %v285_v33, 128 }
  0x45   : > { %305 = vxpose.xlu0.b32.cont [14/16] %v286_v34, 128  ;;  %337 = vxpose.xlu1.b32.cont [14/16] %v287_v35, 128 }
  0x49   : > { %306 = vxpose.xlu0.b32.cont [15/16] %v288_v36, 128  ;;  %338 = vxpose.xlu1.b32.cont [15/16] %v289_v37, 128 }
  0x4d   : > { %307 = vxpose.xlu0.b32.end [16/16] %v290_v38, 128  ;;  %339 = vxpose.xlu1.b32.end [16/16] %v291_v39, 128 }
  0x8d   : > { %v308_v40 = vpop.trf.xlu0  ;;  %v340_v41 = vpop.trf.xlu1 }
  0x91   : > { %v309_v42 = vpop.trf.xlu0  ;;  %v341_v44 = vpop.trf.xlu1 }
  0x92   : > { %v356_v43 = vpack.c.bf16 %v309_v42, %v308_v40  ;;  %v364_v45 = vpack.c.bf16 %v341_v44, %v340_v41 }
  0x94   : > { %1218 = vmatprep.mubr.bf16.mxu0 %v356_v43  ;;  %1234 = vmatprep.mubr.bf16.mxu1 %v364_v45 }
  0x95   : > { %v310_v46 = vpop.trf.xlu0  ;;  %v342_v47 = vpop.trf.xlu1 }
  0x99   : > { %v311_v48 = vpop.trf.xlu0  ;;  %v343_v50 = vpop.trf.xlu1 }
  0x9a   : > { %v357_v49 = vpack.c.bf16 %v311_v48, %v310_v46  ;;  %v365_v51 = vpack.c.bf16 %v343_v50, %v342_v47 }
  0x9c   : > { %1219 = vmatmul.mubr.bf16.vlgmr.msra.gmra.mxu0 %v357_v49  ;;  %1235 = vmatmul.mubr.bf16.vlgmr.msra.gmra.mxu1 %v365_v51 }
  0x9d   : > { %v312_v52 = vpop.trf.xlu0  ;;  %v344_v53 = vpop.trf.xlu1 }
  0xa1   : > { %v313_v54 = vpop.trf.xlu0  ;;  %v345_v56 = vpop.trf.xlu1 }
  0xa2   : > { %v358_v55 = vpack.c.bf16 %v313_v54, %v312_v52  ;;  %v366_v57 = vpack.c.bf16 %v345_v56, %v344_v53 }
  0xa4   : > { %1222 = vmatprep.mubr.bf16.mxu0 %v358_v55  ;;  %1238 = vmatprep.mubr.bf16.mxu1 %v366_v57 }
  0xa5   : > { %v314_v58 = vpop.trf.xlu0  ;;  %v346_v59 = vpop.trf.xlu1 }
  0xa9   : > { %v315_v60 = vpop.trf.xlu0  ;;  %v347_v62 = vpop.trf.xlu1 }
  0xaa   : > { %v359_v61 = vpack.c.bf16 %v315_v60, %v314_v58  ;;  %v367_v63 = vpack.c.bf16 %v347_v62, %v346_v59 }
  0xac   : > { %1223 = vmatmul.mubr.bf16.gmra.mxu0 %v359_v61  ;;  %1239 = vmatmul.mubr.bf16.gmra.mxu1 %v367_v63 }
  0xad   : > { %v316_v0 = vpop.trf.xlu0  ;;  %v348_v1 = vpop.trf.xlu1 }
  0xb1   : > { %v317_v2 = vpop.trf.xlu0  ;;  %v349_v4 = vpop.trf.xlu1 }
  0xb2   : > { %v360_v3 = vpack.c.bf16 %v317_v2, %v316_v0  ;;  %v368_v5 = vpack.c.bf16 %v349_v4, %v348_v1 }
  0xb4   : > { %1226 = vmatprep.mubr.bf16.mxu0 %v360_v3  ;;  %1242 = vmatprep.mubr.bf16.mxu1 %v368_v5 }
  0xb5   : > { %v318_v6 = vpop.trf.xlu0  ;;  %v350_v7 = vpop.trf.xlu1 }
  0xb9   : > { %v319_v8 = vpop.trf.xlu0  ;;  %v351_v10 = vpop.trf.xlu1 }
  0xba   : > { %v361_v9 = vpack.c.bf16 %v319_v8, %v318_v6  ;;  %v369_v11 = vpack.c.bf16 %v351_v10, %v350_v7 }
  0xbc   : > { %1227 = vmatmul.mubr.bf16.gmra.mxu0 %v361_v9  ;;  %1243 = vmatmul.mubr.bf16.gmra.mxu1 %v369_v11 }
  0xbd   : > { %v320_v12 = vpop.trf.xlu0  ;;  %v352_v13 = vpop.trf.xlu1 }
  0xc1   : > { %v321_v14 = vpop.trf.xlu0  ;;  %v353_v16 = vpop.trf.xlu1 }
  0xc2   : > { %v362_v15 = vpack.c.bf16 %v321_v14, %v320_v12  ;;  %v370_v17 = vpack.c.bf16 %v353_v16, %v352_v13 }
  0xc4   : > { %1230 = vmatprep.mubr.bf16.mxu0 %v362_v15  ;;  %1246 = vmatprep.mubr.bf16.mxu1 %v370_v17 }
  0xc5   : > { %v322_v18 = vpop.trf.xlu0  ;;  %v354_v19 = vpop.trf.xlu1 }
  0xc9   : > { %v323_v20 = vpop.trf.xlu0  ;;  %v355_v22 = vpop.trf.xlu1 }
  0xca   : > { %v363_v21 = vpack.c.bf16 %v323_v20, %v322_v18  ;;  %v371_v23 = vpack.c.bf16 %v355_v22, %v354_v19 }
  0xcc   : > { %1231 = vmatmul.mubr.bf16.gmra.mxu0 %v363_v21  ;;  %1247 = vmatmul.mubr.bf16.gmra.mxu1 %v371_v23 }
 0x15c   : > { %v1220_v24 = vpop.f32.mrf.mxu0  ;;  %v1439_v27 = vpop.f32.mrf.mxu1 }
 0x15d   : > { %v1148_v25 = vpack.c.bf16 %v1220_v24, %v1220_v24  ;;  %v1164_v29 = vpack.c.bf16 %v1439_v27, %v1439_v27 }
 0x15e   : > { %v470_v26 = vpop.f32.mrf.mxu0  ;;  %v1445_v31 = vpop.f32.mrf.mxu1 }
 0x15f   : > { %728 = vst.msk [vmem:[%s1437_s22 + $0x8] sm:$0xf] %vm725_vm0, %v1148_v25  ;;  %v1146_v28 = vpack.c.bf16 %v470_v26, %v470_v26  ;;  %744 = vst.msk [vmem:[%s1437_s22 + $0x48] sm:$0xf] %vm725_vm0, %v1164_v29  ;;  %v1162_v33 = vpack.c.bf16 %v1445_v31, %v1445_v31 }
 0x160   : > { %v1221_v30 = vpop.f32.mrf.mxu0  ;;  %v1453_v35 = vpop.f32.mrf.mxu1 }
 0x161   : > { %726 = vst.msk [vmem:[%s1437_s22] sm:$0xf] %vm725_vm0, %v1146_v28  ;;  %v1149_v32 = vpack.c.bf16 %v1221_v30, %v1221_v30  ;;  %742 = vst.msk [vmem:[%s1437_s22 + $0x40] sm:$0xf] %vm725_vm0, %v1162_v33  ;;  %v1165_v37 = vpack.c.bf16 %v1453_v35, %v1453_v35  ;;  %v598_v43 = vpack.c.bf16 %v1221_v30, %v1220_v24 }
 0x162   : > { %v473_v34 = vpop.f32.mrf.mxu0  ;;  %v1461_v38 = vpop.f32.mrf.mxu1 }
 0x163   : > { %729 = vst.msk [vmem:[%s1437_s22 + $0xc] sm:$0xf] %vm725_vm0, %v1149_v32  ;;  %v1147_v36 = vpack.c.bf16 %v473_v34, %v473_v34  ;;  %v597_v39 = vpack.c.bf16 %v473_v34, %v470_v26  ;;  %745 = vst.msk [vmem:[%s1437_s22 + $0x4c] sm:$0xf] %vm725_vm0, %v1165_v37  ;;  %v1163_v40 = vpack.c.bf16 %v1461_v38, %v1461_v38  ;;  %v760_v52 = vunpack.c.l.bf16 %v598_v43 }
 0x164   : > { %v761_v2 = vunpack.c.h.bf16 %v598_v43 }
 0x165   : > { %727 = vst.msk [vmem:[%s1437_s22 + $0x4] sm:$0xf] %vm725_vm0, %v1147_v36  ;;  %743 = vst.msk [vmem:[%s1437_s22 + $0x44] sm:$0xf] %vm725_vm0, %v1163_v40  ;;  %v758_v41 = vunpack.c.l.bf16 %v597_v39  ;;  %v759_v42 = vunpack.c.h.bf16 %v597_v39  ;;  %v864_v3 = vmul.f32 %v760_v52, %v760_v52  ;;  %v794_v7 = vsel %vm790_vm1, %v760_v52, 0.0 }
 0x166   : > { %v865_v11 = vmul.f32 %v761_v2, %v761_v2  ;;  %v796_v15 = vsel %vm790_vm1, %v761_v2, 0.0 }
 0x167   : > { %v862_v46 = vmul.f32 %v758_v41, %v758_v41  ;;  %v863_v47 = vmul.f32 %v759_v42, %v759_v42  ;;  %v791_v53 = vsel %vm790_vm1, %v758_v41, 0.0  ;;  %v792_v54 = vsel %vm790_vm1, %v759_v42, 0.0 }
 0x168   : > { %v793_v63 = vadd.f32 %v792_v54, %v791_v53  ;;  %v897_v12 = vsel %vm790_vm1, %v864_v3, 0.0  ;;  %v899_v20 = vsel %vm790_vm1, %v865_v11, 0.0 }
 0x169   : > { %v894_v59 = vsel %vm790_vm1, %v862_v46, 0.0  ;;  %v895_v60 = vsel %vm790_vm1, %v863_v47, 0.0 }
 0x16a   : > { %v896_v6 = vadd.f32 %v895_v60, %v894_v59  ;;  %v795_v9 = vadd.f32 %v794_v7, %v793_v63 }
 0x16c   : > { %v1224_v44 = vpop.f32.mrf.mxu0  ;;  %v1471_v49 = vpop.f32.mrf.mxu1  ;;  %v898_v14 = vadd.f32 %v897_v12, %v896_v6  ;;  %v797_v19 = vadd.f32 %v796_v15, %v795_v9 }
 0x16d   : > { %v1152_v45 = vpack.c.bf16 %v1224_v44, %v1224_v44  ;;  %v1168_v51 = vpack.c.bf16 %v1471_v49, %v1471_v49 }
 0x16e   : > { %v486_v48 = vpop.f32.mrf.mxu0  ;;  %v1479_v56 = vpop.f32.mrf.mxu1  ;;  %v900_v24 = vadd.f32 %v899_v20, %v898_v14 }
 0x16f   : > { %732 = vst.msk [vmem:[%s1437_s22 + $0x18] sm:$0xf] %vm725_vm0, %v1152_v45  ;;  %v1150_v50 = vpack.c.bf16 %v486_v48, %v486_v48  ;;  %748 = vst.msk [vmem:[%s1437_s22 + $0x58] sm:$0xf] %vm725_vm0, %v1168_v51  ;;  %v1166_v58 = vpack.c.bf16 %v1479_v56, %v1479_v56 }
 0x170   : > { %v1225_v55 = vpop.f32.mrf.mxu0  ;;  %v1489_v62 = vpop.f32.mrf.mxu1 }
 0x171   : > { %730 = vst.msk [vmem:[%s1437_s22 + $0x10] sm:$0xf] %vm725_vm0, %v1150_v50  ;;  %v1153_v57 = vpack.c.bf16 %v1225_v55, %v1225_v55  ;;  %746 = vst.msk [vmem:[%s1437_s22 + $0x50] sm:$0xf] %vm725_vm0, %v1166_v58  ;;  %v1169_v4 = vpack.c.bf16 %v1489_v62, %v1489_v62  ;;  %v600_v16 = vpack.c.bf16 %v1225_v55, %v1224_v44 }
 0x172   : > { %v489_v61 = vpop.f32.mrf.mxu0  ;;  %v1497_v5 = vpop.f32.mrf.mxu1 }
 0x173   : > { %733 = vst.msk [vmem:[%s1437_s22 + $0x1c] sm:$0xf] %vm725_vm0, %v1153_v57  ;;  %v599_v0 = vpack.c.bf16 %v489_v61, %v486_v48  ;;  %v1151_v1 = vpack.c.bf16 %v489_v61, %v489_v61  ;;  %749 = vst.msk [vmem:[%s1437_s22 + $0x5c] sm:$0xf] %vm725_vm0, %v1169_v4  ;;  %v1167_v10 = vpack.c.bf16 %v1497_v5, %v1497_v5  ;;  %v764_v26 = vunpack.c.l.bf16 %v600_v16 }
 0x174   : > { %v765_v43 = vunpack.c.h.bf16 %v600_v16 }
 0x175   : > { %731 = vst.msk [vmem:[%s1437_s22 + $0x14] sm:$0xf] %vm725_vm0, %v1151_v1  ;;  %v762_v8 = vunpack.c.l.bf16 %v599_v0  ;;  %747 = vst.msk [vmem:[%s1437_s22 + $0x54] sm:$0xf] %vm725_vm0, %v1167_v10  ;;  %v763_v17 = vunpack.c.h.bf16 %v599_v0  ;;  %v868_v44 = vmul.f32 %v764_v26, %v764_v26  ;;  %v802_v52 = vsel %vm790_vm1, %v764_v26, 0.0 }
 0x176   : > { %v869_v57 = vmul.f32 %v765_v43, %v765_v43  ;;  %v804_v60 = vsel %vm790_vm1, %v765_v43, 0.0 }
 0x177   : > { %v866_v13 = vmul.f32 %v762_v8, %v762_v8  ;;  %v798_v18 = vsel %vm790_vm1, %v762_v8, 0.0  ;;  %v867_v28 = vmul.f32 %v763_v17, %v763_v17  ;;  %v800_v36 = vsel %vm790_vm1, %v763_v17, 0.0 }
 0x178   : > { %v799_v23 = vadd.f32 %v798_v18, %v797_v19  ;;  %v905_v58 = vsel %vm790_vm1, %v868_v44, 0.0  ;;  %v907_v6 = vsel %vm790_vm1, %v869_v57, 0.0 }
 0x179   : > { %v901_v21 = vsel %vm790_vm1, %v866_v13, 0.0  ;;  %v903_v45 = vsel %vm790_vm1, %v867_v28, 0.0 }
 0x17a   : > { %v902_v32 = vadd.f32 %v901_v21, %v900_v24  ;;  %v801_v40 = vadd.f32 %v800_v36, %v799_v23 }
 0x17c   : > { %v1228_v22 = vpop.f32.mrf.mxu0  ;;  %v1513_v30 = vpop.f32.mrf.mxu1  ;;  %v904_v48 = vadd.f32 %v903_v45, %v902_v32  ;;  %v803_v55 = vadd.f32 %v802_v52, %v801_v40 }
 0x17d   : > { %v1156_v25 = vpack.c.bf16 %v1228_v22, %v1228_v22  ;;  %v1172_v34 = vpack.c.bf16 %v1513_v30, %v1513_v30 }
 0x17e   : > { %v502_v29 = vpop.f32.mrf.mxu0  ;;  %v1520_v39 = vpop.f32.mrf.mxu1  ;;  %v906_v61 = vadd.f32 %v905_v58, %v904_v48  ;;  %v805_v4 = vadd.f32 %v804_v60, %v803_v55 }
 0x17f   : > { %736 = vst.msk [vmem:[%s1437_s22 + $0x28] sm:$0xf] %vm725_vm0, %v1156_v25  ;;  %v1154_v33 = vpack.c.bf16 %v502_v29, %v502_v29  ;;  %752 = vst.msk [vmem:[%s1437_s22 + $0x68] sm:$0xf] %vm725_vm0, %v1172_v34  ;;  %v1170_v42 = vpack.c.bf16 %v1520_v39, %v1520_v39 }
 0x180   : > { %v1229_v37 = vpop.f32.mrf.mxu0  ;;  %v1529_v47 = vpop.f32.mrf.mxu1  ;;  %v908_v9 = vadd.f32 %v907_v6, %v906_v61  ;;  %v606_v61 = vpack.c.bf16 %v1453_v35, %v1439_v27 }
 0x181   : > { %734 = vst.msk [vmem:[%s1437_s22 + $0x20] sm:$0xf] %vm725_vm0, %v1154_v33  ;;  %v1157_v41 = vpack.c.bf16 %v1229_v37, %v1229_v37  ;;  %750 = vst.msk [vmem:[%s1437_s22 + $0x60] sm:$0xf] %vm725_vm0, %v1170_v42  ;;  %v1173_v53 = vpack.c.bf16 %v1529_v47, %v1529_v47  ;;  %v602_v0 = vpack.c.bf16 %v1229_v37, %v1228_v22 }
 0x182   : > { %v505_v46 = vpop.f32.mrf.mxu0  ;;  %v1538_v54 = vpop.f32.mrf.mxu1 }
 0x183   : > { %737 = vst.msk [vmem:[%s1437_s22 + $0x2c] sm:$0xf] %vm725_vm0, %v1157_v41  ;;  %v601_v50 = vpack.c.bf16 %v505_v46, %v502_v29  ;;  %v1155_v51 = vpack.c.bf16 %v505_v46, %v505_v46  ;;  %753 = vst.msk [vmem:[%s1437_s22 + $0x6c] sm:$0xf] %vm725_vm0, %v1173_v53  ;;  %v1171_v63 = vpack.c.bf16 %v1538_v54, %v1538_v54  ;;  %v768_v10 = vunpack.c.l.bf16 %v602_v0 }
 0x184   : > { %v769_v18 = vunpack.c.h.bf16 %v602_v0  ;;  %v605_v46 = vpack.c.bf16 %v1461_v38, %v1445_v31 }
 0x185   : > { %735 = vst.msk [vmem:[%s1437_s22 + $0x24] sm:$0xf] %vm725_vm0, %v1155_v51  ;;  %v766_v59 = vunpack.c.l.bf16 %v601_v50  ;;  %v767_v1 = vunpack.c.h.bf16 %v601_v50  ;;  %751 = vst.msk [vmem:[%s1437_s22 + $0x64] sm:$0xf] %vm725_vm0, %v1171_v63  ;;  %v872_v22 = vmul.f32 %v768_v10, %v768_v10  ;;  %v810_v32 = vsel %vm790_vm1, %v768_v10, 0.0 }
 0x186   : > { %v873_v37 = vmul.f32 %v769_v18, %v769_v18  ;;  %v812_v50 = vsel %vm790_vm1, %v769_v18, 0.0 }
 0x187   : > { %v806_v2 = vsel %vm790_vm1, %v766_v59, 0.0  ;;  %v870_v3 = vmul.f32 %v766_v59, %v766_v59  ;;  %v871_v11 = vmul.f32 %v767_v1, %v767_v1  ;;  %v808_v15 = vsel %vm790_vm1, %v767_v1, 0.0 }
 0x188   : > { %v807_v8 = vadd.f32 %v806_v2, %v805_v4  ;;  %v913_v43 = vsel %vm790_vm1, %v872_v22, 0.0  ;;  %v915_v55 = vsel %vm790_vm1, %v873_v37, 0.0  ;;  %v774_v1 = vunpack.c.l.bf16 %v605_v46 }
 0x189   : > { %v909_v7 = vsel %vm790_vm1, %v870_v3, 0.0  ;;  %v911_v23 = vsel %vm790_vm1, %v871_v11, 0.0 }
 0x18a   : > { %v910_v13 = vadd.f32 %v909_v7, %v908_v9  ;;  %v809_v19 = vadd.f32 %v808_v15, %v807_v8  ;;  %v775_v8 = vunpack.c.h.bf16 %v605_v46 }
 0x18c   : > { %v1232_v12 = vpop.f32.mrf.mxu0  ;;  %v1554_v17 = vpop.f32.mrf.mxu1  ;;  %v912_v26 = vadd.f32 %v911_v23, %v910_v13  ;;  %v811_v40 = vadd.f32 %v810_v32, %v809_v19  ;;  %v878_v13 = vmul.f32 %v774_v1, %v774_v1  ;;  %v879_v22 = vmul.f32 %v775_v8, %v775_v8 }
 0x18d   : > { %v1160_v14 = vpack.c.bf16 %v1232_v12, %v1232_v12  ;;  %v1176_v21 = vpack.c.bf16 %v1554_v17, %v1554_v17 }
 0x18e   : > { %v518_v16 = vpop.f32.mrf.mxu0  ;;  %v1561_v25 = vpop.f32.mrf.mxu1  ;;  %v914_v48 = vadd.f32 %v913_v43, %v912_v26  ;;  %v813_v57 = vadd.f32 %v812_v50, %v811_v40  ;;  %v925_v32 = vsel %vm790_vm1, %v878_v13, 0.0 }
 0x18f   : > { %740 = vst.msk [vmem:[%s1437_s22 + $0x38] sm:$0xf] %vm725_vm0, %v1160_v14  ;;  %v1158_v20 = vpack.c.bf16 %v518_v16, %v518_v16  ;;  %756 = vst.msk [vmem:[%s1437_s22 + $0x78] sm:$0xf] %vm725_vm0, %v1176_v21  ;;  %v1174_v29 = vpack.c.bf16 %v1561_v25, %v1561_v25  ;;  %v607_v14 = vpack.c.bf16 %v1497_v5, %v1479_v56  ;;  %v822_v21 = vsel %vm790_vm1, %v774_v1, 0.0 }
 0x190   : > { %v1233_v24 = vpop.f32.mrf.mxu0  ;;  %v1570_v36 = vpop.f32.mrf.mxu1  ;;  %v916_v0 = vadd.f32 %v915_v55, %v914_v48  ;;  %v608_v56 = vpack.c.bf16 %v1489_v62, %v1471_v49  ;;  %v609_v49 = vpack.c.bf16 %v1538_v54, %v1520_v39 }
 0x191   : > { %738 = vst.msk [vmem:[%s1437_s22 + $0x30] sm:$0xf] %vm725_vm0, %v1158_v20  ;;  %v1161_v28 = vpack.c.bf16 %v1233_v24, %v1233_v24  ;;  %v604_v33 = vpack.c.bf16 %v1233_v24, %v1232_v12  ;;  %754 = vst.msk [vmem:[%s1437_s22 + $0x70] sm:$0xf] %vm725_vm0, %v1174_v29  ;;  %v1177_v44 = vpack.c.bf16 %v1570_v36, %v1570_v36  ;;  %v776_v12 = vunpack.c.l.bf16 %v606_v61 }
 0x192   : > { %v521_v34 = vpop.f32.mrf.mxu0  ;;  %v1579_v45 = vpop.f32.mrf.mxu1  ;;  %v777_v20 = vunpack.c.h.bf16 %v606_v61  ;;  %v824_v29 = vsel %vm790_vm1, %v775_v8, 0.0  ;;  %v778_v5 = vunpack.c.l.bf16 %v607_v14  ;;  %v780_v50 = vunpack.c.l.bf16 %v608_v56 }
 0x193   : > { %741 = vst.msk [vmem:[%s1437_s22 + $0x3c] sm:$0xf] %vm725_vm0, %v1161_v28  ;;  %v603_v41 = vpack.c.bf16 %v521_v34, %v518_v16  ;;  %v1159_v42 = vpack.c.bf16 %v521_v34, %v521_v34  ;;  %v772_v51 = vunpack.c.l.bf16 %v604_v33  ;;  %757 = vst.msk [vmem:[%s1437_s22 + $0x7c] sm:$0xf] %vm725_vm0, %v1177_v44  ;;  %v1175_v58 = vpack.c.bf16 %v1579_v45, %v1579_v45 }
 0x194   : > { %v773_v59 = vunpack.c.h.bf16 %v604_v33  ;;  %v880_v24 = vmul.f32 %v776_v12, %v776_v12  ;;  %v826_v37 = vsel %vm790_vm1, %v776_v12, 0.0  ;;  %v881_v40 = vmul.f32 %v777_v20, %v777_v20 }
 0x195   : > { %739 = vst.msk [vmem:[%s1437_s22 + $0x34] sm:$0xf] %vm725_vm0, %v1159_v42  ;;  %v770_v52 = vunpack.c.l.bf16 %v603_v41  ;;  %v771_v53 = vunpack.c.h.bf16 %v603_v41  ;;  %755 = vst.msk [vmem:[%s1437_s22 + $0x74] sm:$0xf] %vm725_vm0, %v1175_v58  ;;  %v876_v2 = vmul.f32 %v772_v51, %v772_v51  ;;  %v818_v9 = vsel %vm790_vm1, %v772_v51, 0.0 }
 0x196   : > { %v877_v10 = vmul.f32 %v773_v59, %v773_v59  ;;  %v820_v15 = vsel %vm790_vm1, %v773_v59, 0.0  ;;  %v927_v41 = vsel %vm790_vm1, %v879_v22, 0.0  ;;  %v779_v42 = vunpack.c.h.bf16 %v607_v14 }
 0x197   : > { %v814_v31 = vsel %vm790_vm1, %v770_v52, 0.0  ;;  %v874_v38 = vmul.f32 %v770_v52, %v770_v52  ;;  %v875_v60 = vmul.f32 %v771_v53, %v771_v53  ;;  %v816_v3 = vsel %vm790_vm1, %v771_v53, 0.0 }
 0x198   : > { %v815_v63 = vadd.f32 %v814_v31, %v813_v57  ;;  %v921_v16 = vsel %vm790_vm1, %v876_v2, 0.0  ;;  %v923_v23 = vsel %vm790_vm1, %v877_v10, 0.0  ;;  %v828_v43 = vsel %vm790_vm1, %v777_v20, 0.0 }
 0x199   : > { %v917_v4 = vsel %vm790_vm1, %v874_v38, 0.0  ;;  %v919_v11 = vsel %vm790_vm1, %v875_v60, 0.0  ;;  %v929_v48 = vsel %vm790_vm1, %v880_v24, 0.0  ;;  %v882_v51 = vmul.f32 %v778_v5, %v778_v5 }
 0x19a   : > { %v817_v6 = vadd.f32 %v816_v3, %v815_v63  ;;  %v918_v7 = vadd.f32 %v917_v4, %v916_v0  ;;  %v931_v53 = vsel %vm790_vm1, %v881_v40, 0.0  ;;  %v781_v55 = vunpack.c.h.bf16 %v608_v56 }
 0x19b   : > { %v830_v57 = vsel %vm790_vm1, %v778_v5, 0.0  ;;  %v883_v58 = vmul.f32 %v779_v42, %v779_v42  ;;  %v610_v59 = vpack.c.bf16 %v1529_v47, %v1513_v30  ;;  %v884_v60 = vmul.f32 %v780_v50, %v780_v50 }
 0x19c   : > { %v819_v27 = vadd.f32 %v818_v9, %v817_v6  ;;  %v920_v35 = vadd.f32 %v919_v11, %v918_v7  ;;  %v832_v61 = vsel %vm790_vm1, %v779_v42, 0.0  ;;  %v933_v63 = vsel %vm790_vm1, %v882_v51, 0.0 }
 0x19d   : > { %v782_v0 = vunpack.c.l.bf16 %v609_v49  ;;  %v834_v1 = vsel %vm790_vm1, %v780_v50, 0.0  ;;  %v885_v2 = vmul.f32 %v781_v55, %v781_v55  ;;  %v935_v3 = vsel %vm790_vm1, %v883_v58, 0.0 }
 0x19e   : > { %v821_v18 = vadd.f32 %v820_v15, %v819_v27  ;;  %v922_v19 = vadd.f32 %v921_v16, %v920_v35  ;;  %v783_v4 = vunpack.c.h.bf16 %v609_v49  ;;  %v784_v6 = vunpack.c.l.bf16 %v610_v59 }
 0x19f   : > { %v836_v30 = vsel %vm790_vm1, %v781_v55, 0.0  ;;  %v937_v47 = vsel %vm790_vm1, %v884_v60, 0.0  ;;  %v886_v9 = vmul.f32 %v782_v0, %v782_v0  ;;  %v611_v10 = vpack.c.bf16 %v1579_v45, %v1561_v25 }
 0x1a0   : > { %v823_v26 = vadd.f32 %v822_v21, %v821_v18  ;;  %v924_v28 = vadd.f32 %v923_v23, %v922_v19  ;;  %v939_v27 = vsel %vm790_vm1, %v885_v2, 0.0  ;;  %v785_v35 = vunpack.c.h.bf16 %v610_v59 }
 0x1a1   : > { %v838_v13 = vsel %vm790_vm1, %v782_v0, 0.0  ;;  %v887_v14 = vmul.f32 %v783_v4, %v783_v4  ;;  %v888_v15 = vmul.f32 %v784_v6, %v784_v6  ;;  %v840_v19 = vsel %vm790_vm1, %v783_v4, 0.0 }
 0x1a2   : > { %v825_v33 = vadd.f32 %v824_v29, %v823_v26  ;;  %v926_v34 = vadd.f32 %v925_v32, %v924_v28  ;;  %v941_v20 = vsel %vm790_vm1, %v886_v9, 0.0  ;;  %v612_v21 = vpack.c.bf16 %v1570_v36, %v1554_v17 }
 0x1a3   : > { %v786_v22 = vunpack.c.l.bf16 %v611_v10  ;;  %v842_v23 = vsel %vm790_vm1, %v784_v6, 0.0  ;;  %v889_v24 = vmul.f32 %v785_v35, %v785_v35  ;;  %v943_v26 = vsel %vm790_vm1, %v887_v14, 0.0 }
 0x1a4   : > { %v827_v44 = vadd.f32 %v826_v37, %v825_v33  ;;  %v928_v46 = vadd.f32 %v927_v41, %v926_v34  ;;  %v787_v28 = vunpack.c.h.bf16 %v611_v10  ;;  %v844_v56 = vsel %vm790_vm1, %v785_v35, 0.0 }
 0x1a5   : > { %v945_v5 = vsel %vm790_vm1, %v888_v15, 0.0  ;;  %v788_v33 = vunpack.c.l.bf16 %v612_v21  ;;  %v890_v34 = vmul.f32 %v786_v22, %v786_v22  ;;  %v947_v17 = vsel %vm790_vm1, %v889_v24, 0.0 }
 0x1a6   : > { %v930_v62 = vadd.f32 %v929_v48, %v928_v46  ;;  %v829_v52 = vadd.f32 %v828_v43, %v827_v44  ;;  %v789_v36 = vunpack.c.h.bf16 %v612_v21  ;;  %v846_v41 = vsel %vm790_vm1, %v786_v22, 0.0 }
 0x1a7   : > { %v891_v42 = vmul.f32 %v787_v28, %v787_v28  ;;  %v892_v46 = vmul.f32 %v788_v33, %v788_v33  ;;  %v848_v48 = vsel %vm790_vm1, %v787_v28, 0.0  ;;  %v949_v50 = vsel %vm790_vm1, %v890_v34, 0.0 }
 0x1a8   : > { %v831_v31 = vadd.f32 %v830_v57, %v829_v52  ;;  %v932_v38 = vadd.f32 %v931_v53, %v930_v62  ;;  %v850_v62 = vsel %vm790_vm1, %v788_v33, 0.0  ;;  %v893_v52 = vmul.f32 %v789_v36, %v789_v36 }
 0x1a9   : > { %v951_v53 = vsel %vm790_vm1, %v891_v42, 0.0  ;;  %v852_v58 = vsel %vm790_vm1, %v789_v36, 0.0  ;;  %v953_v59 = vsel %vm790_vm1, %v892_v46, 0.0 }
 0x1aa   : > { %v833_v39 = vadd.f32 %v832_v61, %v831_v31  ;;  %v934_v54 = vadd.f32 %v933_v63, %v932_v38  ;;  %v955_v60 = vsel %vm790_vm1, %v893_v52, 0.0 }
 0x1ac   : > { %v835_v7 = vadd.f32 %v834_v1, %v833_v39  ;;  %v936_v8 = vadd.f32 %v935_v3, %v934_v54 }
 0x1ae   : > { %v837_v11 = vadd.f32 %v836_v30, %v835_v7  ;;  %v938_v12 = vadd.f32 %v937_v47, %v936_v8 }
 0x1b0   : > { %v839_v16 = vadd.f32 %v838_v13, %v837_v11  ;;  %v940_v18 = vadd.f32 %v939_v27, %v938_v12 }
 0x1b2   : > { %v841_v25 = vadd.f32 %v840_v19, %v839_v16  ;;  %v942_v45 = vadd.f32 %v941_v20, %v940_v18 }
 0x1b4   : > { %v843_v29 = vadd.f32 %v842_v23, %v841_v25  ;;  %v944_v32 = vadd.f32 %v943_v26, %v942_v45 }
 0x1b6   : > { %v946_v37 = vadd.f32 %v945_v5, %v944_v32  ;;  %v845_v40 = vadd.f32 %v844_v56, %v843_v29 }
 0x1b8   : > { %v847_v43 = vadd.f32 %v846_v41, %v845_v40  ;;  %v948_v44 = vadd.f32 %v947_v17, %v946_v37 }
 0x1ba   : > { %v849_v51 = vadd.f32 %v848_v48, %v847_v43  ;;  %v950_v49 = vadd.f32 %v949_v50, %v948_v44 }
 0x1bc   : > { %v851_v55 = vadd.f32 %v850_v62, %v849_v51  ;;  %v952_v57 = vadd.f32 %v951_v53, %v950_v49 }
 0x1be   : > { %v853_v31 = vadd.f32 %v852_v58, %v851_v55  ;;  %v954_v38 = vadd.f32 %v953_v59, %v952_v57 }
 0x1c0   : > { %v854_v61 = vrot.slane %v853_v31, 4  ;;  %v956_v63 = vadd.f32 %v955_v60, %v954_v38 }
 0x1c2   : > { %v855_v0 = vadd.f32 %v854_v61, %v853_v31  ;;  %v957_v39 = vrot.slane %v956_v63, 4 }
 0x1c4   : > { %v856_v54 = vrot.slane %v855_v0, 2  ;;  %v958_v1 = vadd.f32 %v957_v39, %v956_v63 }
 0x1c6   : > { %v857_v2 = vadd.f32 %v856_v54, %v855_v0  ;;  %v959_v3 = vrot.slane %v958_v1, 2 }
 0x1c8   : > { %v858_v4 = vrot.slane %v857_v2, 1  ;;  %v960_v6 = vadd.f32 %v959_v3, %v958_v1 }
 0x1ca   : > { %v859_v7 = vadd.f32 %v858_v4, %v857_v2  ;;  %v961_v8 = vrot.slane %v960_v6, 1 }
 0x1cc   : > { %861 = vst.msk [vmem:[%s252_s25] sm:$0x1] %vm860_vm2, %v859_v7  ;;  %v962_v30 = vadd.f32 %v961_v8, %v960_v6 }
 0x1ce   : > { %963 = vst.msk [vmem:[%s257_s28] sm:$0x1] %vm860_vm2, %v962_v30 }
 0x1cf PF: > { %s15_s17 = sadd.s32 1, %s1320_s17   ;;  %s1669_s15 = smov %s1316_s16 }
 0x1d0   : > { %p12_p6 = scmp.ge.s32.totalorder %s15_s17, 4   ;;  %s1670_s16 = smov %s1672_s18 }
 0x1d2   :  { %14 = sbr.rel (!%p12_p6) target bundleno = 2 (0x2), region = 82 }

// kernel: bottleneck_forward.6
= control target key start
LH: loop header
LB: loop body
LE: loop exit
PB: predicated region body
PF: predicated region fallthrough
CT: control target
= control target key end

     0   :  { %vm403_vm0 = vcmask 261120   ;;  %s2534_s3 = inlined_call_operand.vmem [shape: bf16[32,128], index: 3, kind: input, shape index: {}]   ;;  %s2535_s0 = inlined_call_operand.vmem [shape: bf16[512,32], index: 0, kind: input, shape index: {}]   ;;  %s2536_s1 = inlined_call_operand.vmem [shape: f32[1,32], index: 1, kind: input, shape index: {}]   ;;  %s2537_s2 = inlined_call_operand.vmem [shape: f32[1,32], index: 2, kind: input, shape index: {}]   ;;  %s2538_s4 = inlined_call_operand.vmem [shape: bf16[512,128], index: 4, kind: output, shape index: {0}]   ;;  %s2539_s5 = inlined_call_operand.vmem [shape: f32[1,1,128], index: 5, kind: output, shape index: {1}]   ;;  %s2540_s6 = inlined_call_operand.vmem [shape: f32[1,1,128], index: 6, kind: output, shape index: {2}]  }
   0x1   :  { %v2009_v0 = vld [vmem:[%s2534_s3 + $0x8] sm:$0xff]   ;;  %v2010_v1 = vld [vmem:[%s2534_s3] sm:$0xff]   ;;  %v1842_v7 = vld [vmem:[%s2535_s0 + $0x10] sm:$0xff]  }
   0x2   :  { %1937 = vmatprep.subr.bf16.mxu0 %v2009_v0  ;;  %v1554_v2 = vld [vmem:[%s2535_s0] sm:$0xff]   ;;  %2005 = vmatprep.subr.bf16.mxu1 %v2009_v0  ;;  %v1841_v6 = vld [vmem:[%s2535_s0 + $0x8] sm:$0xff]   ;;  %v1843_v8 = vld [vmem:[%s2535_s0 + $0x18] sm:$0xff]   ;;  %v1563_v12 = vunpack.c.l.bf16 %v1842_v7  ;;  %v1564_v13 = vunpack.c.h.bf16 %v1842_v7 }
   0x3   :  { %v2058_v3 = vld [vmem:[%s2536_s1] ss:$0 sm:$0xff]  ;;  %1938 = vmatpush3.bf16.msra.mxu0 %v2009_v0  ;;  %v1555_v4 = vunpack.c.l.bf16 %v1554_v2  ;;  %v1556_v5 = vunpack.c.h.bf16 %v1554_v2  ;;  %2007 = vmatpush3.bf16.msra.mxu1 %v2009_v0  ;;  %v1559_v10 = vunpack.c.l.bf16 %v1841_v6  ;;  %v1560_v11 = vunpack.c.h.bf16 %v1841_v6  ;;  %v1845_v35 = vld [vmem:[%s2535_s0 + $0x28] sm:$0xff]   ;;  %v1846_v40 = vld [vmem:[%s2535_s0 + $0x30] sm:$0xff]  }
   0x4   :  { %1939 = vmatprep.subr.bf16.mxu0 %v2010_v1  ;;  %v2072_v9 = vld [vmem:[%s2537_s2] ss:$0 sm:$0xff]  ;;  %2006 = vmatprep.subr.bf16.mxu1 %v2010_v1  ;;  %v1567_v16 = vunpack.c.l.bf16 %v1843_v8  ;;  %v1568_v17 = vunpack.c.h.bf16 %v1843_v8  ;;  %v160_v20 = vmul.f32 %v1563_v12, %v2058_v3  ;;  %v161_v21 = vmul.f32 %v1564_v13, %v2058_v3  ;;  %v1847_v51 = vld [vmem:[%s2535_s0 + $0x38] sm:$0xff]   ;;  %v1849_v8 = vld [vmem:[%s2535_s0 + $0x48] sm:$0xff]  }
   0x5   :  { %v156_v14 = vmul.f32 %v1555_v4, %v2058_v3  ;;  %v157_v15 = vmul.f32 %v1556_v5, %v2058_v3  ;;  %v158_v18 = vmul.f32 %v1559_v10, %v2058_v3  ;;  %v159_v19 = vmul.f32 %v1560_v11, %v2058_v3  ;;  %v1844_v30 = vld [vmem:[%s2535_s0 + $0x20] sm:$0xff]   ;;  %v1850_v11 = vld [vmem:[%s2535_s0 + $0x50] sm:$0xff]  }
   0x6   :  { %v162_v24 = vmul.f32 %v1567_v16, %v2058_v3  ;;  %v163_v25 = vmul.f32 %v1568_v17, %v2058_v3  ;;  %v231_v28 = vadd.f32 %v2072_v9, %v160_v20  ;;  %v232_v29 = vadd.f32 %v2072_v9, %v161_v21  ;;  %v1848_v63 = vld [vmem:[%s2535_s0 + $0x40] sm:$0xff]   ;;  %v1851_v20 = vld [vmem:[%s2535_s0 + $0x58] sm:$0xff]  }
   0x7   :  { %1940 = vmatpush3.bf16.msra.mxu0 %v2010_v1  ;;  %v227_v22 = vadd.f32 %v2072_v9, %v156_v14  ;;  %v228_v23 = vadd.f32 %v2072_v9, %v157_v15  ;;  %v229_v26 = vadd.f32 %v2072_v9, %v158_v18  ;;  %v230_v27 = vadd.f32 %v2072_v9, %v159_v19 }
   0x8   :  { %2008 = vmatpush3.bf16.msra.mxu1 %v2010_v1  ;;  %v233_v33 = vadd.f32 %v2072_v9, %v162_v24  ;;  %v234_v34 = vadd.f32 %v2072_v9, %v163_v25  ;;  %v295_v38 = vmax.f32 %v231_v28, 0.0  ;;  %v296_v39 = vmax.f32 %v232_v29, 0.0 }
   0x9   :  { %v291_v31 = vmax.f32 %v227_v22, 0.0  ;;  %v292_v32 = vmax.f32 %v228_v23, 0.0  ;;  %v293_v36 = vmax.f32 %v229_v26, 0.0  ;;  %v294_v37 = vmax.f32 %v230_v27, 0.0 }
   0xa   :  { %v1571_v42 = vunpack.c.l.bf16 %v1844_v30  ;;  %v357_v44 = vpack.c.bf16 %v296_v39, %v295_v38  ;;  %v1572_v45 = vunpack.c.h.bf16 %v1844_v30  ;;  %v1575_v46 = vunpack.c.l.bf16 %v1845_v35 }
   0xb   :  { %v355_v41 = vpack.c.bf16 %v292_v32, %v291_v31  ;;  %v356_v43 = vpack.c.bf16 %v294_v37, %v293_v36  ;;  %v297_v47 = vmax.f32 %v233_v33, 0.0  ;;  %v1576_v49 = vunpack.c.h.bf16 %v1845_v35  ;;  %v1852_v31 = vld [vmem:[%s2535_s0 + $0x60] sm:$0xff]  }
   0xc   :  { %v164_v48 = vmul.f32 %v1571_v42, %v2058_v3  ;;  %v1579_v50 = vunpack.c.l.bf16 %v1846_v40  ;;  %v298_v52 = vmax.f32 %v234_v34, 0.0  ;;  %v165_v53 = vmul.f32 %v1572_v45, %v2058_v3 }
   0xd   :  { %1941 = vmatprep.mubr.msk.bf16.mxu0 %vm403_vm0, %v355_v41  ;;  %v166_v54 = vmul.f32 %v1575_v46, %v2058_v3  ;;  %v1580_v55 = vunpack.c.h.bf16 %v1846_v40  ;;  %v167_v57 = vmul.f32 %v1576_v49, %v2058_v3  ;;  %v1583_v61 = vunpack.c.l.bf16 %v1847_v51 }
   0xe   :  { %1942 = vmatmul.mubr.msk.bf16.vlgmr.msra.gmra.mxu0 %vm403_vm0, %v356_v43  ;;  %v235_v56 = vadd.f32 %v2072_v9, %v164_v48  ;;  %v168_v58 = vmul.f32 %v1579_v50, %v2058_v3  ;;  %v236_v59 = vadd.f32 %v2072_v9, %v165_v53  ;;  %v1584_v62 = vunpack.c.h.bf16 %v1847_v51 }
   0xf   :  { %1945 = vmatprep.mubr.msk.bf16.mxu0 %vm403_vm0, %v357_v44  ;;  %v169_v60 = vmul.f32 %v1580_v55, %v2058_v3  ;;  %v237_v1 = vadd.f32 %v2072_v9, %v166_v54  ;;  %v238_v2 = vadd.f32 %v2072_v9, %v167_v57  ;;  %v358_v5 = vpack.c.bf16 %v298_v52, %v297_v47  ;;  %v1853_v44 = vld [vmem:[%s2535_s0 + $0x68] sm:$0xff]  }
  0x10   :  { %v299_v0 = vmax.f32 %v235_v56, 0.0  ;;  %v239_v4 = vadd.f32 %v2072_v9, %v168_v58  ;;  %v300_v6 = vmax.f32 %v236_v59, 0.0  ;;  %v1587_v10 = vunpack.c.l.bf16 %v1848_v63  ;;  %v1854_v56 = vld [vmem:[%s2535_s0 + $0x70] sm:$0xff]  }
  0x11   :  { %v240_v7 = vadd.f32 %v2072_v9, %v169_v60  ;;  %v170_v13 = vmul.f32 %v1583_v61, %v2058_v3  ;;  %v171_v14 = vmul.f32 %v1584_v62, %v2058_v3  ;;  %v1588_v15 = vunpack.c.h.bf16 %v1848_v63 }
  0x12   :  { %v359_v12 = vpack.c.bf16 %v300_v6, %v299_v0  ;;  %v301_v16 = vmax.f32 %v237_v1, 0.0  ;;  %v302_v17 = vmax.f32 %v238_v2, 0.0  ;;  %v303_v18 = vmax.f32 %v239_v4, 0.0  ;;  %v2168_v1 = vld [vmem:[%s2535_s0 + $0x78] sm:$0xff]   ;;  %v1856_v2 = vld [vmem:[%s2535_s0 + $0x80] sm:$0xff]  }
  0x13   :  { %v1591_v19 = vunpack.c.l.bf16 %v1849_v8  ;;  %v304_v21 = vmax.f32 %v240_v7, 0.0  ;;  %v172_v22 = vmul.f32 %v1587_v10, %v2058_v3  ;;  %v1592_v23 = vunpack.c.h.bf16 %v1849_v8 }
  0x14   :  { %v1595_v24 = vunpack.c.l.bf16 %v1850_v11  ;;  %v173_v25 = vmul.f32 %v1588_v15, %v2058_v3  ;;  %v1596_v27 = vunpack.c.h.bf16 %v1850_v11  ;;  %v1599_v30 = vunpack.c.l.bf16 %v1851_v20 }
  0x15   :  { %v174_v26 = vmul.f32 %v1591_v19, %v2058_v3  ;;  %v175_v28 = vmul.f32 %v1592_v23, %v2058_v3  ;;  %v241_v32 = vadd.f32 %v2072_v9, %v170_v13  ;;  %v242_v33 = vadd.f32 %v2072_v9, %v171_v14  ;;  %v1857_v19 = vld [vmem:[%s2535_s0 + $0x88] sm:$0xff]  }
  0x16   :  { %1946 = vmatmul.mubr.msk.bf16.gmra.mxu0 %vm403_vm0, %v358_v5  ;;  %v176_v29 = vmul.f32 %v1595_v24, %v2058_v3  ;;  %v177_v34 = vmul.f32 %v1596_v27, %v2058_v3  ;;  %v1600_v35 = vunpack.c.h.bf16 %v1851_v20  ;;  %v360_v36 = vpack.c.bf16 %v302_v17, %v301_v16  ;;  %v1858_v24 = vld [vmem:[%s2535_s0 + $0x90] sm:$0xff]  }
  0x17   :  { %1949 = vmatprep.mubr.msk.bf16.mxu0 %vm403_vm0, %v359_v12  ;;  %v361_v37 = vpack.c.bf16 %v304_v21, %v303_v18  ;;  %v243_v38 = vadd.f32 %v2072_v9, %v172_v22  ;;  %v178_v39 = vmul.f32 %v1599_v30, %v2058_v3  ;;  %v244_v40 = vadd.f32 %v2072_v9, %v173_v25 }
  0x18   :  { %v245_v41 = vadd.f32 %v2072_v9, %v174_v26  ;;  %v179_v42 = vmul.f32 %v1600_v35, %v2058_v3  ;;  %v1603_v43 = vunpack.c.l.bf16 %v1852_v31  ;;  %v246_v45 = vadd.f32 %v2072_v9, %v175_v28 }
  0x19   :  { %v247_v46 = vadd.f32 %v2072_v9, %v176_v29  ;;  %v248_v47 = vadd.f32 %v2072_v9, %v177_v34  ;;  %v249_v48 = vadd.f32 %v2072_v9, %v178_v39  ;;  %v1604_v50 = vunpack.c.h.bf16 %v1852_v31 }
  0x1a   :  { %v250_v49 = vadd.f32 %v2072_v9, %v179_v42  ;;  %v180_v51 = vmul.f32 %v1603_v43, %v2058_v3  ;;  %v305_v52 = vmax.f32 %v241_v32, 0.0  ;;  %v306_v53 = vmax.f32 %v242_v33, 0.0  ;;  %v1859_v33 = vld [vmem:[%s2535_s0 + $0x98] sm:$0xff]  }
  0x1b   :  { %v1607_v54 = vunpack.c.l.bf16 %v1853_v44  ;;  %v1608_v55 = vunpack.c.h.bf16 %v1853_v44  ;;  %v307_v57 = vmax.f32 %v243_v38, 0.0  ;;  %v308_v58 = vmax.f32 %v244_v40, 0.0 }
  0x1c   :  { %v309_v59 = vmax.f32 %v245_v41, 0.0  ;;  %v181_v60 = vmul.f32 %v1604_v50, %v2058_v3  ;;  %v310_v61 = vmax.f32 %v246_v45, 0.0  ;;  %v311_v62 = vmax.f32 %v247_v46, 0.0  ;;  %v1860_v46 = vld [vmem:[%s2535_s0 + $0xa0] sm:$0xff]  }
  0x1d   :  { %v312_v63 = vmax.f32 %v248_v47, 0.0  ;;  %v182_v0 = vmul.f32 %v1607_v54, %v2058_v3  ;;  %v313_v4 = vmax.f32 %v249_v48, 0.0  ;;  %v314_v5 = vmax.f32 %v250_v49, 0.0 }
  0x1e   :  { %1950 = vmatmul.mubr.msk.bf16.gmra.mxu0 %vm403_vm0, %v360_v36  ;;  %v2174_v6 = vadd.f32 %v2072_v9, %v180_v51  ;;  %v1611_v7 = vunpack.c.l.bf16 %v1854_v56  ;;  %v362_v8 = vpack.c.bf16 %v306_v53, %v305_v52  ;;  %v2177_v10 = vadd.f32 %v2072_v9, %v181_v60 }
  0x1f   :  { %1953 = vmatprep.mubr.msk.bf16.mxu0 %vm403_vm0, %v361_v37  ;;  %v183_v11 = vmul.f32 %v1608_v55, %v2058_v3  ;;  %v1612_v12 = vunpack.c.h.bf16 %v1854_v56  ;;  %v363_v13 = vpack.c.bf16 %v308_v58, %v307_v57  ;;  %v1615_v14 = vunpack.c.l.bf16 %v2168_v1  ;;  %v1861_v55 = vld [vmem:[%s2535_s0 + $0xa8] sm:$0xff]  }
  0x20   :  { %v1619_v15 = vunpack.c.l.bf16 %v1856_v2  ;;  %v364_v16 = vpack.c.bf16 %v310_v61, %v309_v59  ;;  %v365_v17 = vpack.c.bf16 %v312_v63, %v311_v62  ;;  %v2182_v18 = vadd.f32 %v2072_v9, %v182_v0 }
  0x21   :  { %v2187_v20 = vpack.c.bf16 %v314_v5, %v313_v4  ;;  %v315_v21 = vmax.f32 %v2174_v6, 0.0  ;;  %v184_v22 = vmul.f32 %v1611_v7, %v2058_v3  ;;  %v1620_v23 = vunpack.c.h.bf16 %v1856_v2  ;;  %v1862_v7 = vld [vmem:[%s2535_s0 + $0xb0] sm:$0xff]   ;;  %v1864_v6 = vld [vmem:[%s2535_s0 + $0xc0] sm:$0xff]  }
  0x22   :  { %v316_v25 = vmax.f32 %v2177_v10, 0.0  ;;  %v2197_v26 = vadd.f32 %v2072_v9, %v183_v11  ;;  %v185_v27 = vmul.f32 %v1612_v12, %v2058_v3  ;;  %v188_v28 = vmul.f32 %v1619_v15, %v2058_v3 }
  0x23   :  { %v1616_v29 = vunpack.c.h.bf16 %v2168_v1  ;;  %v2204_v30 = vmul.f32 %v1615_v14, %v2058_v3  ;;  %v189_v31 = vmul.f32 %v1620_v23, %v2058_v3  ;;  %v1623_v32 = vunpack.c.l.bf16 %v1857_v19 }
  0x24   :  { %v317_v34 = vmax.f32 %v2182_v18, 0.0  ;;  %v259_v35 = vadd.f32 %v2072_v9, %v188_v28  ;;  %v1624_v36 = vunpack.c.h.bf16 %v1857_v19  ;;  %v1627_v37 = vunpack.c.l.bf16 %v1858_v24  ;;  %v1866_v18 = vld [vmem:[%s2535_s0 + $0xd0] sm:$0xff]  }
  0x25   :  { %v2213_v38 = vadd.f32 %v2072_v9, %v184_v22  ;;  %v260_v39 = vadd.f32 %v2072_v9, %v189_v31  ;;  %v190_v40 = vmul.f32 %v1623_v32, %v2058_v3  ;;  %v1628_v41 = vunpack.c.h.bf16 %v1858_v24  ;;  %v1863_v24 = vld [vmem:[%s2535_s0 + $0xb8] sm:$0xff]  }
  0x26   :  { %1954 = vmatmul.mubr.msk.bf16.gmra.mxu0 %vm403_vm0, %v362_v8  ;;  %v323_v42 = vmax.f32 %v259_v35, 0.0  ;;  %v191_v43 = vmul.f32 %v1624_v36, %v2058_v3  ;;  %v192_v44 = vmul.f32 %v1627_v37, %v2058_v3  ;;  %v1631_v45 = vunpack.c.l.bf16 %v1859_v33 }
  0x27   :  { %1957 = vmatprep.mubr.msk.bf16.mxu0 %vm403_vm0, %v363_v13  ;;  %v2223_v47 = vadd.f32 %v2072_v9, %v185_v27  ;;  %v324_v48 = vmax.f32 %v260_v39, 0.0  ;;  %v261_v49 = vadd.f32 %v2072_v9, %v190_v40  ;;  %v193_v50 = vmul.f32 %v1628_v41, %v2058_v3 }
  0x28   :  { %v262_v51 = vadd.f32 %v2072_v9, %v191_v43  ;;  %v263_v52 = vadd.f32 %v2072_v9, %v192_v44  ;;  %v1632_v53 = vunpack.c.h.bf16 %v1859_v33  ;;  %v194_v54 = vmul.f32 %v1631_v45, %v2058_v3 }
  0x29   :  { %v371_v56 = vpack.c.bf16 %v324_v48, %v323_v42  ;;  %v325_v57 = vmax.f32 %v261_v49, 0.0  ;;  %v264_v58 = vadd.f32 %v2072_v9, %v193_v50  ;;  %v1635_v59 = vunpack.c.l.bf16 %v1860_v46 }
  0x2a   :  { %v326_v60 = vmax.f32 %v262_v51, 0.0  ;;  %v327_v61 = vmax.f32 %v263_v52, 0.0  ;;  %v195_v62 = vmul.f32 %v1632_v53, %v2058_v3  ;;  %v265_v63 = vadd.f32 %v2072_v9, %v194_v54  ;;  %v1865_v52 = vld [vmem:[%s2535_s0 + $0xc8] sm:$0xff]  }
  0x2b   :  { %1973 = vmatprep.mubr.msk.bf16.mxu1 %vm403_vm0, %v371_v56  ;;  %v328_v0 = vmax.f32 %v264_v58, 0.0  ;;  %v1636_v2 = vunpack.c.h.bf16 %v1860_v46  ;;  %v196_v4 = vmul.f32 %v1635_v59, %v2058_v3  ;;  %v1639_v5 = vunpack.c.l.bf16 %v1861_v55 }
  0x2c   :  { %v372_v8 = vpack.c.bf16 %v326_v60, %v325_v57  ;;  %v266_v10 = vadd.f32 %v2072_v9, %v195_v62  ;;  %v329_v11 = vmax.f32 %v265_v63, 0.0  ;;  %v1640_v12 = vunpack.c.h.bf16 %v1861_v55 }
  0x2d   :  { %v373_v13 = vpack.c.bf16 %v328_v0, %v327_v61  ;;  %v197_v14 = vmul.f32 %v1636_v2, %v2058_v3  ;;  %v267_v15 = vadd.f32 %v2072_v9, %v196_v4  ;;  %v1643_v22 = vunpack.c.l.bf16 %v1862_v7 }
  0x2e   :  { %1958 = vmatmul.mubr.msk.bf16.gmra.mxu0 %vm403_vm0, %v364_v16  ;;  %v198_v16 = vmul.f32 %v1639_v5, %v2058_v3  ;;  %1974 = vmatmul.mubr.msk.bf16.vlgmr.msra.gmra.mxu1 %vm403_vm0, %v372_v8  ;;  %v199_v19 = vmul.f32 %v1640_v12, %v2058_v3  ;;  %v1644_v23 = vunpack.c.h.bf16 %v1862_v7  ;;  %v367_v27 = vpack.c.bf16 %v316_v25, %v315_v21 }
  0x2f   :  { %1961 = vmatprep.mubr.msk.bf16.mxu0 %vm403_vm0, %v365_v17  ;;  %v330_v17 = vmax.f32 %v266_v10, 0.0  ;;  %v318_v28 = vmax.f32 %v2197_v26, 0.0  ;;  %1977 = vmatprep.mubr.msk.bf16.mxu1 %vm403_vm0, %v373_v13  ;;  %v268_v31 = vadd.f32 %v2072_v9, %v197_v14  ;;  %v331_v32 = vmax.f32 %v267_v15, 0.0  ;;  %v1867_v14 = vld [vmem:[%s2535_s0 + $0xd8] sm:$0xff]  }
  0x30   :  { %v319_v33 = vmax.f32 %v2213_v38, 0.0  ;;  %v187_v35 = vmul.f32 %v1616_v29, %v2058_v3  ;;  %v200_v36 = vmul.f32 %v1643_v22, %v2058_v3  ;;  %v201_v37 = vmul.f32 %v1644_v23, %v2058_v3 }
  0x31   :  { %v320_v21 = vmax.f32 %v2223_v47, 0.0  ;;  %v332_v25 = vmax.f32 %v268_v31, 0.0  ;;  %v1647_v26 = vunpack.c.l.bf16 %v1863_v24  ;;  %v1648_v39 = vunpack.c.h.bf16 %v1863_v24 }
  0x32   :  { %v374_v38 = vpack.c.bf16 %v330_v17, %v329_v11  ;;  %v269_v1 = vadd.f32 %v2072_v9, %v198_v16  ;;  %v270_v29 = vadd.f32 %v2072_v9, %v199_v19  ;;  %v271_v40 = vadd.f32 %v2072_v9, %v200_v36  ;;  %v1868_v17 = vld [vmem:[%s2535_s0 + $0xe0] sm:$0xff]  }
  0x33   :  { %v375_v41 = vpack.c.bf16 %v332_v25, %v331_v32  ;;  %v272_v42 = vadd.f32 %v2072_v9, %v201_v37  ;;  %v1651_v43 = vunpack.c.l.bf16 %v1864_v6  ;;  %v1652_v44 = vunpack.c.h.bf16 %v1864_v6 }
  0x34   :  { %v257_v45 = vadd.f32 %v2072_v9, %v2204_v30  ;;  %v258_v46 = vadd.f32 %v2072_v9, %v187_v35  ;;  %v203_v47 = vmul.f32 %v1648_v39, %v2058_v3  ;;  %v368_v48 = vpack.c.bf16 %v318_v28, %v317_v34  ;;  %v1869_v39 = vld [vmem:[%s2535_s0 + $0xe8] sm:$0xff]  }
  0x35   :  { %v369_v49 = vpack.c.bf16 %v320_v21, %v319_v33  ;;  %v333_v50 = vmax.f32 %v269_v1, 0.0  ;;  %v334_v51 = vmax.f32 %v270_v29, 0.0  ;;  %v335_v30 = vmax.f32 %v271_v40, 0.0  ;;  %v1870_v29 = vld [vmem:[%s2535_s0 + $0xf0] sm:$0xff]  }
  0x36   :  { %1962 = vmatmul.mubr.msk.bf16.gmra.mxu0 %vm403_vm0, %v2187_v20  ;;  %v202_v20 = vmul.f32 %v1647_v26, %v2058_v3  ;;  %1978 = vmatmul.mubr.msk.bf16.gmra.mxu1 %vm403_vm0, %v374_v38  ;;  %v336_v53 = vmax.f32 %v272_v42, 0.0  ;;  %v204_v54 = vmul.f32 %v1651_v43, %v2058_v3  ;;  %v205_v55 = vmul.f32 %v1652_v44, %v2058_v3 }
  0x37   :  { %1965 = vmatprep.mubr.msk.bf16.mxu0 %vm403_vm0, %v367_v27  ;;  %1981 = vmatprep.mubr.msk.bf16.mxu1 %vm403_vm0, %v375_v41  ;;  %v321_v34 = vmax.f32 %v257_v45, 0.0  ;;  %v322_v56 = vmax.f32 %v258_v46, 0.0  ;;  %v274_v58 = vadd.f32 %v2072_v9, %v203_v47  ;;  %v1655_v59 = vunpack.c.l.bf16 %v1865_v52 }
  0x38   :  { %v273_v57 = vadd.f32 %v2072_v9, %v202_v20  ;;  %v376_v60 = vpack.c.bf16 %v334_v51, %v333_v50  ;;  %v1656_v61 = vunpack.c.h.bf16 %v1865_v52  ;;  %v1659_v62 = vunpack.c.l.bf16 %v1866_v18 }
  0x39   :  { %v1660_v63 = vunpack.c.h.bf16 %v1866_v18  ;;  %v377_v0 = vpack.c.bf16 %v336_v53, %v335_v30  ;;  %v275_v2 = vadd.f32 %v2072_v9, %v204_v54  ;;  %v276_v4 = vadd.f32 %v2072_v9, %v205_v55  ;;  %v1871_v18 = vld [vmem:[%s2535_s0 + $0xf8] sm:$0xff]  }
  0x3a   :  { %v337_v5 = vmax.f32 %v273_v57, 0.0  ;;  %v338_v7 = vmax.f32 %v274_v58, 0.0  ;;  %v206_v8 = vmul.f32 %v1655_v59, %v2058_v3  ;;  %v370_v10 = vpack.c.bf16 %v322_v56, %v321_v34 }
  0x3b   :  { %v207_v11 = vmul.f32 %v1656_v61, %v2058_v3  ;;  %v208_v12 = vmul.f32 %v1659_v62, %v2058_v3  ;;  %v209_v13 = vmul.f32 %v1660_v63, %v2058_v3  ;;  %v339_v15 = vmax.f32 %v275_v2, 0.0 }
  0x3c   :  { %v340_v16 = vmax.f32 %v276_v4, 0.0  ;;  %v378_v19 = vpack.c.bf16 %v338_v7, %v337_v5  ;;  %v277_v22 = vadd.f32 %v2072_v9, %v206_v8  ;;  %v1663_v23 = vunpack.c.l.bf16 %v1867_v14 }
  0x3d   :  { %v278_v24 = vadd.f32 %v2072_v9, %v207_v11  ;;  %v279_v27 = vadd.f32 %v2072_v9, %v208_v12  ;;  %v280_v28 = vadd.f32 %v2072_v9, %v209_v13  ;;  %v1664_v31 = vunpack.c.h.bf16 %v1867_v14 }
  0x3e   :  { %1966 = vmatmul.mubr.msk.bf16.gmra.mxu0 %vm403_vm0, %v368_v48  ;;  %1982 = vmatmul.mubr.msk.bf16.gmra.mxu1 %vm403_vm0, %v376_v60  ;;  %v379_v32 = vpack.c.bf16 %v340_v16, %v339_v15  ;;  %v1667_v33 = vunpack.c.l.bf16 %v1868_v17  ;;  %v1668_v35 = vunpack.c.h.bf16 %v1868_v17  ;;  %v341_v36 = vmax.f32 %v277_v22, 0.0 }
  0x3f   :  { %1969 = vmatprep.mubr.msk.bf16.mxu0 %vm403_vm0, %v369_v49  ;;  %1985 = vmatprep.mubr.msk.bf16.mxu1 %vm403_vm0, %v377_v0  ;;  %v210_v37 = vmul.f32 %v1663_v23, %v2058_v3  ;;  %v342_v6 = vmax.f32 %v278_v24, 0.0  ;;  %v343_v21 = vmax.f32 %v279_v27, 0.0  ;;  %v344_v25 = vmax.f32 %v280_v28, 0.0 }
  0x40   :  { %v211_v26 = vmul.f32 %v1664_v31, %v2058_v3  ;;  %v212_v38 = vmul.f32 %v1667_v33, %v2058_v3  ;;  %v213_v1 = vmul.f32 %v1668_v35, %v2058_v3  ;;  %v1671_v41 = vunpack.c.l.bf16 %v1869_v39 }
  0x41   :  { %v281_v40 = vadd.f32 %v2072_v9, %v210_v37  ;;  %v380_v42 = vpack.c.bf16 %v342_v6, %v341_v36  ;;  %v381_v43 = vpack.c.bf16 %v344_v25, %v343_v21  ;;  %v1672_v45 = vunpack.c.h.bf16 %v1869_v39 }
  0x42   :  { %v282_v44 = vadd.f32 %v2072_v9, %v211_v26  ;;  %v283_v46 = vadd.f32 %v2072_v9, %v212_v38  ;;  %v284_v20 = vadd.f32 %v2072_v9, %v213_v1  ;;  %v1675_v47 = vunpack.c.l.bf16 %v1870_v29 }
  0x43   :  { %v1676_v48 = vunpack.c.h.bf16 %v1870_v29  ;;  %v214_v49 = vmul.f32 %v1671_v41, %v2058_v3  ;;  %v345_v50 = vmax.f32 %v281_v40, 0.0  ;;  %v215_v52 = vmul.f32 %v1672_v45, %v2058_v3 }
  0x44   :  { %v346_v51 = vmax.f32 %v282_v44, 0.0  ;;  %v347_v30 = vmax.f32 %v283_v46, 0.0  ;;  %v348_v53 = vmax.f32 %v284_v20, 0.0  ;;  %v216_v54 = vmul.f32 %v1675_v47, %v2058_v3 }
  0x45   :  { %v217_v55 = vmul.f32 %v1676_v48, %v2058_v3  ;;  %v285_v34 = vadd.f32 %v2072_v9, %v214_v49  ;;  %v286_v57 = vadd.f32 %v2072_v9, %v215_v52  ;;  %v1679_v58 = vunpack.c.l.bf16 %v1871_v18 }
  0x46   :  { %1970 = vmatmul.mubr.msk.bf16.gmra.mxu0 %vm403_vm0, %v370_v10  ;;  %1986 = vmatmul.mubr.msk.bf16.gmra.mxu1 %vm403_vm0, %v378_v19  ;;  %v382_v56 = vpack.c.bf16 %v346_v51, %v345_v50  ;;  %v1680_v59 = vunpack.c.h.bf16 %v1871_v18  ;;  %v383_v60 = vpack.c.bf16 %v348_v53, %v347_v30  ;;  %v287_v61 = vadd.f32 %v2072_v9, %v216_v54 }
  0x47   :  { %1989 = vmatprep.mubr.msk.bf16.mxu1 %vm403_vm0, %v379_v32  ;;  %v288_v62 = vadd.f32 %v2072_v9, %v217_v55  ;;  %v349_v63 = vmax.f32 %v285_v34, 0.0  ;;  %v350_v0 = vmax.f32 %v286_v57, 0.0  ;;  %v218_v2 = vmul.f32 %v1679_v58, %v2058_v3 }
  0x48   :  { %v219_v4 = vmul.f32 %v1680_v59, %v2058_v3  ;;  %v351_v5 = vmax.f32 %v287_v61, 0.0 }
  0x49   :  { %v352_v7 = vmax.f32 %v288_v62, 0.0  ;;  %v384_v8 = vpack.c.bf16 %v350_v0, %v349_v63  ;;  %v289_v10 = vadd.f32 %v2072_v9, %v218_v2 }
  0x4a   :  { %v290_v11 = vadd.f32 %v2072_v9, %v219_v4 }
  0x4b   :  { %v385_v12 = vpack.c.bf16 %v352_v7, %v351_v5  ;;  %v353_v13 = vmax.f32 %v289_v10, 0.0 }
  0x4c   :  { %v354_v14 = vmax.f32 %v290_v11, 0.0 }
  0x4e   :  { %1990 = vmatmul.mubr.msk.bf16.gmra.mxu1 %vm403_vm0, %v380_v42  ;;  %v386_v15 = vpack.c.bf16 %v354_v14, %v353_v13 }
  0x4f   :  { %1993 = vmatprep.mubr.msk.bf16.mxu1 %vm403_vm0, %v381_v43 }
  0x56   :  { %1994 = vmatmul.mubr.msk.bf16.gmra.mxu1 %vm403_vm0, %v382_v56 }
  0x57   :  { %1997 = vmatprep.mubr.msk.bf16.mxu1 %vm403_vm0, %v383_v60 }
  0x5e   :  { %1998 = vmatmul.mubr.msk.bf16.gmra.mxu1 %vm403_vm0, %v384_v8 }
  0x5f   :  { %2001 = vmatprep.mubr.msk.bf16.mxu1 %vm403_vm0, %v385_v12 }
  0x66   :  { %2002 = vmatmul.mubr.msk.bf16.gmra.mxu1 %vm403_vm0, %v386_v15 }
  0xce   :  { %v1943_v3 = vpop.f32.mrf.mxu0 }
  0xd0   :  { %v534_v16 = vpop.f32.mrf.mxu0 }
  0xd2   :  { %v1944_v17 = vpop.f32.mrf.mxu0 }
  0xd3   :  { %v790_v19 = vpack.c.bf16 %v1944_v17, %v1943_v3 }
  0xd4   :  { %v537_v22 = vpop.f32.mrf.mxu0 }
  0xd5   :  { %1872 = vst [vmem:[%s2538_s4 + $0x8] sm:$0xff] %v790_v19   ;;  %v789_v9 = vpack.c.bf16 %v537_v22, %v534_v16  ;;  %v1111_v24 = vunpack.c.l.bf16 %v790_v19  ;;  %v1112_v36 = vunpack.c.h.bf16 %v790_v19 }
  0xd6   :  { %v1947_v23 = vpop.f32.mrf.mxu0 }
  0xd7   :  { %1685 = vst [vmem:[%s2538_s4] sm:$0xff] %v789_v9   ;;  %v1109_v27 = vunpack.c.l.bf16 %v789_v9  ;;  %v1110_v28 = vunpack.c.h.bf16 %v789_v9  ;;  %v1245_v6 = vmul.f32 %v1111_v24, %v1111_v24  ;;  %v1246_v40 = vmul.f32 %v1112_v36, %v1112_v36 }
  0xd8   :  { %v550_v31 = vpop.f32.mrf.mxu0 }
  0xd9   :  { %v1173_v32 = vadd.f32 %v1110_v28, %v1109_v27  ;;  %v1243_v33 = vmul.f32 %v1109_v27, %v1109_v27  ;;  %v1244_v35 = vmul.f32 %v1110_v28, %v1110_v28 }
  0xda   :  { %v1948_v37 = vpop.f32.mrf.mxu0 }
  0xdb   :  { %v1174_v21 = vadd.f32 %v1173_v32, %v1111_v24  ;;  %v1307_v25 = vadd.f32 %v1244_v35, %v1243_v33  ;;  %v792_v26 = vpack.c.bf16 %v1948_v37, %v1947_v23 }
  0xdc   :  { %v553_v39 = vpop.f32.mrf.mxu0 }
  0xdd   :  { %v1308_v38 = vadd.f32 %v1307_v25, %v1245_v6  ;;  %1874 = vst [vmem:[%s2538_s4 + $0x18] sm:$0xff] %v792_v26   ;;  %v791_v1 = vpack.c.bf16 %v553_v39, %v550_v31  ;;  %v1175_v43 = vadd.f32 %v1174_v21, %v1112_v36  ;;  %v1115_v45 = vunpack.c.l.bf16 %v792_v26 }
  0xde   :  { %v1951_v29 = vpop.f32.mrf.mxu0  ;;  %v1116_v48 = vunpack.c.h.bf16 %v792_v26 }
  0xdf   :  { %1873 = vst [vmem:[%s2538_s4 + $0x10] sm:$0xff] %v791_v1   ;;  %v1113_v41 = vunpack.c.l.bf16 %v791_v1  ;;  %v1114_v42 = vunpack.c.h.bf16 %v791_v1  ;;  %v1309_v47 = vadd.f32 %v1308_v38, %v1246_v40  ;;  %v1249_v54 = vmul.f32 %v1115_v45, %v1115_v45 }
  0xe0   :  { %v566_v44 = vpop.f32.mrf.mxu0  ;;  %v1250_v57 = vmul.f32 %v1116_v48, %v1116_v48 }
  0xe1   :  { %v1176_v46 = vadd.f32 %v1175_v43, %v1113_v41  ;;  %v1247_v20 = vmul.f32 %v1113_v41, %v1113_v41  ;;  %v1248_v51 = vmul.f32 %v1114_v42, %v1114_v42 }
  0xe2   :  { %v1952_v49 = vpop.f32.mrf.mxu0 }
  0xe3   :  { %v1177_v50 = vadd.f32 %v1176_v46, %v1114_v42  ;;  %v1310_v52 = vadd.f32 %v1309_v47, %v1247_v20  ;;  %v794_v30 = vpack.c.bf16 %v1952_v49, %v1951_v29 }
  0xe4   :  { %v569_v53 = vpop.f32.mrf.mxu0 }
  0xe5   :  { %v1178_v55 = vadd.f32 %v1177_v50, %v1115_v45  ;;  %v1311_v18 = vadd.f32 %v1310_v52, %v1248_v51  ;;  %1876 = vst [vmem:[%s2538_s4 + $0x28] sm:$0xff] %v794_v30   ;;  %v793_v34 = vpack.c.bf16 %v569_v53, %v566_v44  ;;  %v1119_v0 = vunpack.c.l.bf16 %v794_v30 }
  0xe6   :  { %v1955_v56 = vpop.f32.mrf.mxu0  ;;  %v1120_v8 = vunpack.c.h.bf16 %v794_v30 }
  0xe7   :  { %v1312_v58 = vadd.f32 %v1311_v18, %v1249_v54  ;;  %v1179_v59 = vadd.f32 %v1178_v55, %v1116_v48  ;;  %1875 = vst [vmem:[%s2538_s4 + $0x20] sm:$0xff] %v793_v34   ;;  %v1117_v60 = vunpack.c.l.bf16 %v793_v34  ;;  %v1118_v61 = vunpack.c.h.bf16 %v793_v34 }
  0xe8   :  { %v582_v62 = vpop.f32.mrf.mxu0  ;;  %v1253_v15 = vmul.f32 %v1119_v0, %v1119_v0  ;;  %v1254_v22 = vmul.f32 %v1120_v8, %v1120_v8 }
  0xe9   :  { %v1313_v63 = vadd.f32 %v1312_v58, %v1250_v57  ;;  %v1180_v2 = vadd.f32 %v1179_v59, %v1117_v60  ;;  %v1251_v4 = vmul.f32 %v1117_v60, %v1117_v60  ;;  %v1252_v11 = vmul.f32 %v1118_v61, %v1118_v61 }
  0xea   :  { %v1956_v5 = vpop.f32.mrf.mxu0 }
  0xeb   :  { %v796_v7 = vpack.c.bf16 %v1956_v5, %v1955_v56  ;;  %v1181_v10 = vadd.f32 %v1180_v2, %v1118_v61  ;;  %v1314_v12 = vadd.f32 %v1313_v63, %v1251_v4 }
  0xec   :  { %v585_v13 = vpop.f32.mrf.mxu0 }
  0xed   :  { %1878 = vst [vmem:[%s2538_s4 + $0x38] sm:$0xff] %v796_v7   ;;  %v795_v14 = vpack.c.bf16 %v585_v13, %v582_v62  ;;  %v1182_v3 = vadd.f32 %v1181_v10, %v1119_v0  ;;  %v1315_v16 = vadd.f32 %v1314_v12, %v1252_v11  ;;  %v1123_v31 = vunpack.c.l.bf16 %v796_v7 }
  0xee   :  { %v1959_v17 = vpop.f32.mrf.mxu0  ;;  %v1975_v36 = vpop.f32.mrf.mxu1  ;;  %v1124_v37 = vunpack.c.h.bf16 %v796_v7 }
  0xef   :  { %1877 = vst [vmem:[%s2538_s4 + $0x30] sm:$0xff] %v795_v14   ;;  %v1121_v19 = vunpack.c.l.bf16 %v795_v14  ;;  %v1316_v9 = vadd.f32 %v1315_v16, %v1253_v15  ;;  %v1122_v23 = vunpack.c.h.bf16 %v795_v14  ;;  %v1183_v24 = vadd.f32 %v1182_v3, %v1120_v8 }
  0xf0   :  { %v598_v27 = vpop.f32.mrf.mxu0  ;;  %v662_v38 = vpop.f32.mrf.mxu1  ;;  %v1257_v29 = vmul.f32 %v1123_v31, %v1123_v31  ;;  %v1258_v44 = vmul.f32 %v1124_v37, %v1124_v37 }
  0xf1   :  { %v1255_v28 = vmul.f32 %v1121_v19, %v1121_v19  ;;  %v1184_v32 = vadd.f32 %v1183_v24, %v1121_v19  ;;  %v1317_v33 = vadd.f32 %v1316_v9, %v1254_v22  ;;  %v1256_v25 = vmul.f32 %v1122_v23, %v1122_v23 }
  0xf2   :  { %v1960_v35 = vpop.f32.mrf.mxu0  ;;  %v1976_v43 = vpop.f32.mrf.mxu1 }
  0xf3   :  { %v798_v6 = vpack.c.bf16 %v1960_v35, %v1959_v17  ;;  %v1185_v21 = vadd.f32 %v1184_v32, %v1122_v23  ;;  %v1318_v26 = vadd.f32 %v1317_v33, %v1255_v28  ;;  %v2382_v49 = vpack.c.bf16 %v1976_v43, %v1975_v36 }
  0xf4   :  { %v601_v39 = vpop.f32.mrf.mxu0  ;;  %v665_v50 = vpop.f32.mrf.mxu1 }
  0xf5   :  { %1880 = vst [vmem:[%s2538_s4 + $0x48] sm:$0xff] %v798_v6   ;;  %v797_v1 = vpack.c.bf16 %v601_v39, %v598_v27  ;;  %v1186_v40 = vadd.f32 %v1185_v21, %v1123_v31  ;;  %v1319_v41 = vadd.f32 %v1318_v26, %v1256_v25  ;;  %v2384_v52 = vpack.c.bf16 %v665_v50, %v662_v38 }
  0xf6   :  { %v1963_v42 = vpop.f32.mrf.mxu0  ;;  %v1127_v30 = vunpack.c.l.bf16 %v798_v6  ;;  %1888 = vst [vmem:[%s2538_s4 + $0x88] sm:$0xff] %v2382_v49   ;;  %v1979_v18 = vpop.f32.mrf.mxu1  ;;  %v1128_v34 = vunpack.c.h.bf16 %v798_v6 }
  0xf7   :  { %1879 = vst [vmem:[%s2538_s4 + $0x40] sm:$0xff] %v797_v1   ;;  %v1125_v45 = vunpack.c.l.bf16 %v797_v1  ;;  %v1320_v46 = vadd.f32 %v1319_v41, %v1257_v29  ;;  %v1126_v20 = vunpack.c.h.bf16 %v797_v1  ;;  %v1187_v47 = vadd.f32 %v1186_v40, %v1124_v37  ;;  %1887 = vst [vmem:[%s2538_s4 + $0x80] sm:$0xff] %v2384_v52  }
  0xf8   :  { %v614_v48 = vpop.f32.mrf.mxu0  ;;  %v678_v61 = vpop.f32.mrf.mxu1  ;;  %v1261_v63 = vmul.f32 %v1127_v30, %v1127_v30  ;;  %v1262_v7 = vmul.f32 %v1128_v34, %v1128_v34 }
  0xf9   :  { %v1259_v51 = vmul.f32 %v1125_v45, %v1125_v45  ;;  %v1188_v53 = vadd.f32 %v1187_v47, %v1125_v45  ;;  %v1321_v54 = vadd.f32 %v1320_v46, %v1258_v44  ;;  %v1260_v58 = vmul.f32 %v1126_v20, %v1126_v20 }
  0xfa   :  { %v1964_v55 = vpop.f32.mrf.mxu0  ;;  %v1980_v5 = vpop.f32.mrf.mxu1 }
  0xfb   :  { %v800_v56 = vpack.c.bf16 %v1964_v55, %v1963_v42  ;;  %v1189_v57 = vadd.f32 %v1188_v53, %v1126_v20  ;;  %v1322_v59 = vadd.f32 %v1321_v54, %v1259_v51  ;;  %v2400_v14 = vpack.c.bf16 %v1980_v5, %v1979_v18 }
  0xfc   :  { %v617_v60 = vpop.f32.mrf.mxu0  ;;  %v681_v15 = vpop.f32.mrf.mxu1 }
  0xfd   :  { %1882 = vst [vmem:[%s2538_s4 + $0x58] sm:$0xff] %v800_v56   ;;  %v799_v62 = vpack.c.bf16 %v617_v60, %v614_v48  ;;  %v1190_v0 = vadd.f32 %v1189_v57, %v1127_v30  ;;  %v1323_v2 = vadd.f32 %v1322_v59, %v1260_v58  ;;  %v2402_v16 = vpack.c.bf16 %v681_v15, %v678_v61 }
  0xfe   :  { %v1967_v4 = vpop.f32.mrf.mxu0  ;;  %v1131_v17 = vunpack.c.l.bf16 %v800_v56  ;;  %1890 = vst [vmem:[%s2538_s4 + $0x98] sm:$0xff] %v2400_v14   ;;  %v1983_v23 = vpop.f32.mrf.mxu1  ;;  %v1132_v24 = vunpack.c.h.bf16 %v800_v56 }
  0xff   :  { %1881 = vst [vmem:[%s2538_s4 + $0x50] sm:$0xff] %v799_v62   ;;  %v1129_v8 = vunpack.c.l.bf16 %v799_v62  ;;  %v1324_v10 = vadd.f32 %v1323_v2, %v1261_v63  ;;  %v1130_v11 = vunpack.c.h.bf16 %v799_v62  ;;  %v1191_v12 = vadd.f32 %v1190_v0, %v1128_v34  ;;  %1889 = vst [vmem:[%s2538_s4 + $0x90] sm:$0xff] %v2402_v16  }
 0x100   :  { %v630_v13 = vpop.f32.mrf.mxu0  ;;  %v694_v35 = vpop.f32.mrf.mxu1  ;;  %v1265_v37 = vmul.f32 %v1131_v17, %v1131_v17  ;;  %v1266_v39 = vmul.f32 %v1132_v24, %v1132_v24 }
 0x101   :  { %v1263_v3 = vmul.f32 %v1129_v8, %v1129_v8  ;;  %v1192_v19 = vadd.f32 %v1191_v12, %v1129_v8  ;;  %v1325_v22 = vadd.f32 %v1324_v10, %v1262_v7  ;;  %v1264_v31 = vmul.f32 %v1130_v11, %v1130_v11 }
 0x102   :  { %v1968_v9 = vpop.f32.mrf.mxu0  ;;  %v1984_v26 = vpop.f32.mrf.mxu1 }
 0x103   :  { %v802_v27 = vpack.c.bf16 %v1968_v9, %v1967_v4  ;;  %v1193_v28 = vadd.f32 %v1192_v19, %v1130_v11  ;;  %v1326_v32 = vadd.f32 %v1325_v22, %v1263_v3  ;;  %v2418_v42 = vpack.c.bf16 %v1984_v26, %v1983_v23 }
 0x104   :  { %v633_v33 = vpop.f32.mrf.mxu0  ;;  %v697_v43 = vpop.f32.mrf.mxu1 }
 0x105   :  { %1884 = vst [vmem:[%s2538_s4 + $0x68] sm:$0xff] %v802_v27   ;;  %v801_v36 = vpack.c.bf16 %v633_v33, %v630_v13  ;;  %v1194_v6 = vadd.f32 %v1193_v28, %v1131_v17  ;;  %v1327_v21 = vadd.f32 %v1326_v32, %v1264_v31  ;;  %v2420_v45 = vpack.c.bf16 %v697_v43, %v694_v35 }
 0x106   :  { %v1971_v25 = vpop.f32.mrf.mxu0  ;;  %v1135_v46 = vunpack.c.l.bf16 %v802_v27  ;;  %1892 = vst [vmem:[%s2538_s4 + $0xa8] sm:$0xff] %v2418_v42   ;;  %v1987_v50 = vpop.f32.mrf.mxu1  ;;  %v1136_v51 = vunpack.c.h.bf16 %v802_v27  ;;  %v1141_v27 = vunpack.c.l.bf16 %v2384_v52  ;;  %v1142_v35 = vunpack.c.h.bf16 %v2384_v52 }
 0x107   :  { %1883 = vst [vmem:[%s2538_s4 + $0x60] sm:$0xff] %v801_v36   ;;  %v1133_v38 = vunpack.c.l.bf16 %v801_v36  ;;  %v1328_v1 = vadd.f32 %v1327_v21, %v1265_v37  ;;  %v1134_v29 = vunpack.c.h.bf16 %v801_v36  ;;  %v1195_v40 = vadd.f32 %v1194_v6, %v1132_v24  ;;  %1891 = vst [vmem:[%s2538_s4 + $0xa0] sm:$0xff] %v2420_v45  }
 0x108   :  { %v646_v41 = vpop.f32.mrf.mxu0  ;;  %v710_v34 = vpop.f32.mrf.mxu1  ;;  %v1269_v57 = vmul.f32 %v1135_v46, %v1135_v46  ;;  %v1270_v61 = vmul.f32 %v1136_v51, %v1136_v51  ;;  %v1143_v21 = vunpack.c.l.bf16 %v2382_v49  ;;  %v1275_v26 = vmul.f32 %v1141_v27, %v1141_v27 }
 0x109   :  { %v1267_v44 = vmul.f32 %v1133_v38, %v1133_v38  ;;  %v1196_v20 = vadd.f32 %v1195_v40, %v1133_v38  ;;  %v1329_v47 = vadd.f32 %v1328_v1, %v1266_v39  ;;  %v1268_v54 = vmul.f32 %v1134_v29, %v1134_v29 }
 0x10a   :  { %v1972_v48 = vpop.f32.mrf.mxu0  ;;  %v1988_v60 = vpop.f32.mrf.mxu1  ;;  %v1144_v52 = vunpack.c.h.bf16 %v2382_v49  ;;  %v1277_v43 = vmul.f32 %v1143_v21, %v1143_v21 }
 0x10b   :  { %v804_v30 = vpack.c.bf16 %v1972_v48, %v1971_v25  ;;  %v1197_v53 = vadd.f32 %v1196_v20, %v1134_v29  ;;  %v1330_v55 = vadd.f32 %v1329_v47, %v1267_v44  ;;  %v2436_v4 = vpack.c.bf16 %v1988_v60, %v1987_v50 }
 0x10c   :  { %v649_v18 = vpop.f32.mrf.mxu0  ;;  %v713_v5 = vpop.f32.mrf.mxu1  ;;  %v1276_v29 = vmul.f32 %v1142_v35, %v1142_v35  ;;  %v1145_v20 = vunpack.c.l.bf16 %v2402_v16  ;;  %v1278_v50 = vmul.f32 %v1144_v52, %v1144_v52 }
 0x10d   :  { %1886 = vst [vmem:[%s2538_s4 + $0x78] sm:$0xff] %v804_v30   ;;  %v803_v56 = vpack.c.bf16 %v649_v18, %v646_v41  ;;  %v1198_v58 = vadd.f32 %v1197_v53, %v1135_v46  ;;  %v1331_v59 = vadd.f32 %v1330_v55, %v1268_v54  ;;  %v2438_v8 = vpack.c.bf16 %v713_v5, %v710_v34 }
 0x10e   :  { %v1139_v10 = vunpack.c.l.bf16 %v804_v30  ;;  %1894 = vst [vmem:[%s2538_s4 + $0xb8] sm:$0xff] %v2436_v4   ;;  %v1991_v13 = vpop.f32.mrf.mxu1  ;;  %v1140_v15 = vunpack.c.h.bf16 %v804_v30  ;;  %v1146_v30 = vunpack.c.h.bf16 %v2402_v16  ;;  %v1147_v55 = vunpack.c.l.bf16 %v2400_v14 }
 0x10f   :  { %1885 = vst [vmem:[%s2538_s4 + $0x70] sm:$0xff] %v803_v56   ;;  %v1137_v62 = vunpack.c.l.bf16 %v803_v56  ;;  %v1332_v63 = vadd.f32 %v1331_v59, %v1269_v57  ;;  %v1138_v0 = vunpack.c.h.bf16 %v803_v56  ;;  %v1199_v2 = vadd.f32 %v1198_v58, %v1136_v51  ;;  %1893 = vst [vmem:[%s2538_s4 + $0xb0] sm:$0xff] %v2438_v8  }
 0x110   :  { %v726_v22 = vpop.f32.mrf.mxu1  ;;  %v1273_v9 = vmul.f32 %v1139_v10, %v1139_v10  ;;  %v1274_v32 = vmul.f32 %v1140_v15, %v1140_v15  ;;  %v1279_v34 = vmul.f32 %v1145_v20, %v1145_v20  ;;  %v1148_v16 = vunpack.c.h.bf16 %v2400_v14 }
 0x111   :  { %v1271_v7 = vmul.f32 %v1137_v62, %v1137_v62  ;;  %v1200_v11 = vadd.f32 %v1199_v2, %v1137_v62  ;;  %v1333_v12 = vadd.f32 %v1332_v63, %v1270_v61  ;;  %v1272_v17 = vmul.f32 %v1138_v0, %v1138_v0 }
 0x112   :  { %v1992_v28 = vpop.f32.mrf.mxu1  ;;  %v1280_v59 = vmul.f32 %v1146_v30, %v1146_v30  ;;  %v1281_v62 = vmul.f32 %v1147_v55, %v1147_v55  ;;  %v1149_v2 = vunpack.c.l.bf16 %v2420_v45 }
 0x113   :  { %v1201_v3 = vadd.f32 %v1200_v11, %v1138_v0  ;;  %v1334_v19 = vadd.f32 %v1333_v12, %v1271_v7  ;;  %v2449_v31 = vpack.c.bf16 %v1992_v28, %v1991_v13  ;;  %v1150_v12 = vunpack.c.h.bf16 %v2420_v45 }
 0x114   :  { %v729_v37 = vpop.f32.mrf.mxu1  ;;  %v1152_v45 = vunpack.c.h.bf16 %v2418_v42 }
 0x115   :  { %v1202_v23 = vadd.f32 %v1201_v3, %v1139_v10  ;;  %v1335_v24 = vadd.f32 %v1334_v19, %v1272_v17  ;;  %1896 = vst [vmem:[%s2538_s4 + $0xc8] sm:$0xff] %v2449_v31   ;;  %v2456_v6 = vpack.c.bf16 %v729_v37, %v726_v22  ;;  %v1282_v10 = vmul.f32 %v1148_v16, %v1148_v16 }
 0x116   :  { %v1995_v38 = vpop.f32.mrf.mxu1  ;;  %v1151_v3 = vunpack.c.l.bf16 %v2418_v42  ;;  %v1283_v19 = vmul.f32 %v1149_v2, %v1149_v2 }
 0x117   :  { %v1336_v33 = vadd.f32 %v1335_v24, %v1273_v9  ;;  %v1203_v36 = vadd.f32 %v1202_v23, %v1140_v15  ;;  %1895 = vst [vmem:[%s2538_s4 + $0xc0] sm:$0xff] %v2456_v6   ;;  %v1284_v24 = vmul.f32 %v1150_v12, %v1150_v12 }
 0x118   :  { %v742_v41 = vpop.f32.mrf.mxu1 }
 0x119   :  { %v1204_v25 = vadd.f32 %v1203_v36, %v1141_v27  ;;  %v1337_v39 = vadd.f32 %v1336_v33, %v1274_v32  ;;  %v1285_v32 = vmul.f32 %v1151_v3, %v1151_v3  ;;  %v1153_v36 = vunpack.c.l.bf16 %v2438_v8 }
 0x11a   :  { %v1996_v47 = vpop.f32.mrf.mxu1 }
 0x11b   :  { %v1205_v1 = vadd.f32 %v1204_v25, %v1142_v35  ;;  %v1338_v40 = vadd.f32 %v1337_v39, %v1275_v26  ;;  %v2465_v48 = vpack.c.bf16 %v1996_v47, %v1995_v38  ;;  %v1286_v25 = vmul.f32 %v1152_v45, %v1152_v45 }
 0x11c   :  { %v745_v54 = vpop.f32.mrf.mxu1  ;;  %v1154_v39 = vunpack.c.h.bf16 %v2438_v8  ;;  %v1156_v8 = vunpack.c.h.bf16 %v2436_v4 }
 0x11d   :  { %v1206_v44 = vadd.f32 %v1205_v1, %v1143_v21  ;;  %v1339_v46 = vadd.f32 %v1338_v40, %v1276_v29  ;;  %1898 = vst [vmem:[%s2538_s4 + $0xd8] sm:$0xff] %v2465_v48   ;;  %v2472_v49 = vpack.c.bf16 %v745_v54, %v742_v41  ;;  %v1155_v1 = vunpack.c.l.bf16 %v2436_v4 }
 0x11e   :  { %v1999_v57 = vpop.f32.mrf.mxu1  ;;  %v1287_v40 = vmul.f32 %v1153_v36, %v1153_v36  ;;  %v1158_v54 = vunpack.c.h.bf16 %v2456_v6  ;;  %v1160_v4 = vunpack.c.h.bf16 %v2449_v31 }
 0x11f   :  { %v1340_v51 = vadd.f32 %v1339_v46, %v1277_v43  ;;  %v1207_v53 = vadd.f32 %v1206_v44, %v1144_v52  ;;  %1897 = vst [vmem:[%s2538_s4 + $0xd0] sm:$0xff] %v2472_v49   ;;  %v1288_v44 = vmul.f32 %v1154_v39, %v1154_v39 }
 0x120   :  { %v758_v61 = vpop.f32.mrf.mxu1 }
 0x121   :  { %v1208_v18 = vadd.f32 %v1207_v53, %v1145_v20  ;;  %v1341_v56 = vadd.f32 %v1340_v51, %v1278_v50  ;;  %v1289_v20 = vmul.f32 %v1155_v1, %v1155_v1  ;;  %v1157_v51 = vunpack.c.l.bf16 %v2456_v6 }
 0x122   :  { %v2000_v5 = vpop.f32.mrf.mxu1  ;;  %v1162_v6 = vunpack.c.h.bf16 %v2472_v49 }
 0x123   :  { %v1209_v58 = vadd.f32 %v1208_v18, %v1146_v30  ;;  %v1342_v60 = vadd.f32 %v1341_v56, %v1279_v34  ;;  %v2481_v7 = vpack.c.bf16 %v2000_v5, %v1999_v57  ;;  %v1290_v30 = vmul.f32 %v1156_v8, %v1156_v8 }
 0x124   :  { %v761_v15 = vpop.f32.mrf.mxu1  ;;  %v1159_v18 = vunpack.c.l.bf16 %v2449_v31  ;;  %v1291_v56 = vmul.f32 %v1157_v51, %v1157_v51  ;;  %v1164_v31 = vunpack.c.h.bf16 %v2465_v48 }
 0x125   :  { %v1210_v63 = vadd.f32 %v1209_v58, %v1147_v55  ;;  %v1343_v0 = vadd.f32 %v1342_v60, %v1280_v59  ;;  %1900 = vst [vmem:[%s2538_s4 + $0xe8] sm:$0xff] %v2481_v7   ;;  %v2488_v14 = vpack.c.bf16 %v761_v15, %v758_v61  ;;  %v1292_v58 = vmul.f32 %v1158_v54, %v1158_v54 }
 0x126   :  { %v2003_v9 = vpop.f32.mrf.mxu1  ;;  %v1293_v60 = vmul.f32 %v1159_v18, %v1159_v18 }
 0x127   :  { %v1344_v11 = vadd.f32 %v1343_v0, %v1281_v62  ;;  %v1211_v13 = vadd.f32 %v1210_v63, %v1148_v16  ;;  %1899 = vst [vmem:[%s2538_s4 + $0xe0] sm:$0xff] %v2488_v14   ;;  %v1161_v63 = vunpack.c.l.bf16 %v2472_v49  ;;  %v1294_v0 = vmul.f32 %v1160_v4, %v1160_v4 }
 0x128   :  { %v774_v28 = vpop.f32.mrf.mxu1  ;;  %v1166_v49 = vunpack.c.h.bf16 %v2488_v14 }
 0x129   :  { %v1212_v17 = vadd.f32 %v1211_v13, %v1149_v2  ;;  %v1345_v22 = vadd.f32 %v1344_v11, %v1282_v10  ;;  %v1163_v10 = vunpack.c.l.bf16 %v2465_v48  ;;  %v1168_v48 = vunpack.c.h.bf16 %v2481_v7 }
 0x12a   :  { %v2004_v37 = vpop.f32.mrf.mxu1 }
 0x12b   :  { %v1213_v23 = vadd.f32 %v1212_v17, %v1150_v12  ;;  %v1346_v27 = vadd.f32 %v1345_v22, %v1283_v19  ;;  %v2497_v21 = vpack.c.bf16 %v2004_v37, %v2003_v9  ;;  %v1295_v12 = vmul.f32 %v1161_v63, %v1161_v63 }
 0x12c   :  { %v777_v52 = vpop.f32.mrf.mxu1  ;;  %v1297_v19 = vmul.f32 %v1163_v10, %v1163_v10  ;;  %v1300_v37 = vmul.f32 %v1166_v49, %v1166_v49 }
 0x12d   :  { %v1214_v33 = vadd.f32 %v1213_v23, %v1151_v3  ;;  %v1347_v35 = vadd.f32 %v1346_v27, %v1284_v24  ;;  %1902 = vst [vmem:[%s2538_s4 + $0xf8] sm:$0xff] %v2497_v21   ;;  %v2504_v42 = vpack.c.bf16 %v777_v52, %v774_v28  ;;  %v1296_v3 = vmul.f32 %v1162_v6, %v1162_v6 }
 0x12e   :  { %v1298_v23 = vmul.f32 %v1164_v31, %v1164_v31  ;;  %v1167_v28 = vunpack.c.l.bf16 %v2481_v7  ;;  %v1172_v7 = vunpack.c.h.bf16 %v2497_v21 }
 0x12f   :  { %v1348_v26 = vadd.f32 %v1347_v35, %v1285_v32  ;;  %v1215_v38 = vadd.f32 %v1214_v33, %v1152_v45  ;;  %1901 = vst [vmem:[%s2538_s4 + $0xf0] sm:$0xff] %v2504_v42   ;;  %v1165_v45 = vunpack.c.l.bf16 %v2488_v14  ;;  %v1169_v52 = vunpack.c.l.bf16 %v2504_v42 }
 0x130   :  { %v1170_v14 = vunpack.c.h.bf16 %v2504_v42 }
 0x131   :  { %v1216_v29 = vadd.f32 %v1215_v38, %v1153_v36  ;;  %v1349_v41 = vadd.f32 %v1348_v26, %v1286_v25  ;;  %v1299_v33 = vmul.f32 %v1165_v45, %v1165_v45  ;;  %v1301_v26 = vmul.f32 %v1167_v28, %v1167_v28 }
 0x133   :  { %v1217_v43 = vadd.f32 %v1216_v29, %v1154_v39  ;;  %v1350_v46 = vadd.f32 %v1349_v41, %v1287_v40  ;;  %v1171_v41 = vunpack.c.l.bf16 %v2497_v21 }
 0x135   :  { %v1218_v47 = vadd.f32 %v1217_v43, %v1155_v1  ;;  %v1351_v50 = vadd.f32 %v1350_v46, %v1288_v44  ;;  %v1302_v1 = vmul.f32 %v1168_v48, %v1168_v48  ;;  %v1303_v43 = vmul.f32 %v1169_v52, %v1169_v52 }
 0x137   :  { %v1352_v53 = vadd.f32 %v1351_v50, %v1289_v20  ;;  %v1219_v55 = vadd.f32 %v1218_v47, %v1156_v8  ;;  %v1304_v20 = vmul.f32 %v1170_v14, %v1170_v14  ;;  %v1305_v50 = vmul.f32 %v1171_v41, %v1171_v41 }
 0x139   :  { %v1220_v34 = vadd.f32 %v1219_v55, %v1157_v51  ;;  %v1353_v57 = vadd.f32 %v1352_v53, %v1290_v30  ;;  %v1306_v53 = vmul.f32 %v1172_v7, %v1172_v7 }
 0x13b   :  { %v1221_v16 = vadd.f32 %v1220_v34, %v1158_v54  ;;  %v1354_v59 = vadd.f32 %v1353_v57, %v1291_v56 }
 0x13d   :  { %v1222_v61 = vadd.f32 %v1221_v16, %v1159_v18  ;;  %v1355_v62 = vadd.f32 %v1354_v59, %v1292_v58 }
 0x13f   :  { %v1356_v2 = vadd.f32 %v1355_v62, %v1293_v60  ;;  %v1223_v5 = vadd.f32 %v1222_v61, %v1160_v4 }
 0x141   :  { %v1224_v11 = vadd.f32 %v1223_v5, %v1161_v63  ;;  %v1357_v13 = vadd.f32 %v1356_v2, %v1294_v0 }
 0x143   :  { %v1225_v15 = vadd.f32 %v1224_v11, %v1162_v6  ;;  %v1358_v17 = vadd.f32 %v1357_v13, %v1295_v12 }
 0x145   :  { %v1226_v22 = vadd.f32 %v1225_v15, %v1163_v10  ;;  %v1359_v9 = vadd.f32 %v1358_v17, %v1296_v3 }
 0x147   :  { %v1360_v24 = vadd.f32 %v1359_v9, %v1297_v19  ;;  %v1227_v27 = vadd.f32 %v1226_v22, %v1164_v31 }
 0x149   :  { %v1228_v32 = vadd.f32 %v1227_v27, %v1165_v45  ;;  %v1361_v35 = vadd.f32 %v1360_v24, %v1298_v23 }
 0x14b   :  { %v1229_v36 = vadd.f32 %v1228_v32, %v1166_v49  ;;  %v1362_v25 = vadd.f32 %v1361_v35, %v1299_v33 }
 0x14d   :  { %v1230_v39 = vadd.f32 %v1229_v36, %v1167_v28  ;;  %v1363_v38 = vadd.f32 %v1362_v25, %v1300_v37 }
 0x14f   :  { %v1364_v29 = vadd.f32 %v1363_v38, %v1301_v26  ;;  %v1231_v40 = vadd.f32 %v1230_v39, %v1168_v48 }
 0x151   :  { %v1232_v8 = vadd.f32 %v1231_v40, %v1169_v52  ;;  %v1365_v44 = vadd.f32 %v1364_v29, %v1302_v1 }
 0x153   :  { %v1233_v46 = vadd.f32 %v1232_v8, %v1170_v14  ;;  %v1366_v47 = vadd.f32 %v1365_v44, %v1303_v43 }
 0x155   :  { %v1234_v51 = vadd.f32 %v1233_v46, %v1171_v41  ;;  %v1367_v30 = vadd.f32 %v1366_v47, %v1304_v20 }
 0x157   :  { %v1235_v54 = vadd.f32 %v1234_v51, %v1172_v7  ;;  %v1368_v55 = vadd.f32 %v1367_v30, %v1305_v50 }
 0x159   :  { %v1236_v18 = vrot.slane %v1235_v54, 4  ;;  %v1369_v34 = vadd.f32 %v1368_v55, %v1306_v53 }
 0x15b   :  { %v1237_v42 = vadd.f32 %v1236_v18, %v1235_v54  ;;  %v1370_v56 = vrot.slane %v1369_v34, 4 }
 0x15d   :  { %v1238_v57 = vrot.slane %v1237_v42, 2  ;;  %v1371_v4 = vadd.f32 %v1370_v56, %v1369_v34 }
 0x15f   :  { %v1239_v16 = vadd.f32 %v1238_v57, %v1237_v42  ;;  %v1372_v58 = vrot.slane %v1371_v4, 2 }
 0x161   :  { %v1240_v59 = vrot.slane %v1239_v16, 1  ;;  %v1373_v60 = vadd.f32 %v1372_v58, %v1371_v4 }
 0x163   :  { %v1241_v21 = vadd.f32 %v1240_v59, %v1239_v16  ;;  %v1374_v61 = vrot.slane %v1373_v60, 1 }
 0x165   :  { %1242 = vst [vmem:[%s2539_s5] sm:$0x1] %v1241_v21  ;;  %v1375_v62 = vadd.f32 %v1374_v61, %v1373_v60 }
 0x167   :  { %1376 = vst [vmem:[%s2540_s6] sm:$0x1] %v1375_v62 }

// kernel: bottleneck_forward.5
= control target key start
LH: loop header
LB: loop body
LE: loop exit
PB: predicated region body
PF: predicated region fallthrough
CT: control target
= control target key end

     0   :  { %s4247_s21 = smov 0   ;;  %s6348_s0 = inlined_call_operand.vmem [shape: bf16[512,32], index: 0, kind: input, shape index: {}]   ;;  %s6349_s1 = inlined_call_operand.vmem [shape: f32[1,32], index: 1, kind: input, shape index: {}]   ;;  %s6350_s2 = inlined_call_operand.vmem [shape: f32[1,32], index: 2, kind: input, shape index: {}]   ;;  %s6351_s3 = inlined_call_operand.vmem [shape: bf16[288,32], index: 3, kind: input, shape index: {}]   ;;  %s6352_s4 = inlined_call_operand.vmem [shape: bf16[512,32], index: 4, kind: output, shape index: {0}]   ;;  %s6353_s5 = inlined_call_operand.vmem [shape: f32[2,1,32], index: 5, kind: output, shape index: {1}]   ;;  %s6354_s6 = inlined_call_operand.vmem [shape: f32[2,1,32], index: 6, kind: output, shape index: {2}]  }
   0x1 LB: > { %s4253_s22 = sadd.s32 4294967295, %s4207_s21   ;;  %p3424_p0 = scmp.ge.s32.totalorder %s4207_s21, 1  ;;  %s4207_s21 = sphi %s4247_s21, %s17_s21  }
   0x2   : > { %p218_p1 = scmp.lt.s32.totalorder %s4207_s21, 3 }
   0x4   : > { %p219_p2 = pnand %p3424_p0, %p218_p1 }
   0x6   : > { %222 = sbr.rel (%p219_p2) target bundleno = 519 (0x207), region = 36 }
   0xb   : > { %s3425_s23 = sshll.u32 %s4253_s22, 5  ;;  %v447_v0 = vlaneseq  ;;  %v4275_v5 = vld [vmem:[%s6349_s1] ss:$0 sm:$0xff]  ;;  %v4183_v39 = vld [vmem:[%s6351_s3 + $0x58] sm:$0xff]   ;;  %v4184_v40 = vld [vmem:[%s6351_s3 + $0x50] sm:$0xff]   ;;  %s4209_s14 = smov 32  }
   0xc   : > { %p255_p3 = scmp.lt.s32.totalorder %s3425_s23, 63  ;;  %v4309_v22 = vld [vmem:[%s6350_s2] ss:$0 sm:$0xff]  ;;  %3840 = vmatprep.subr.bf16.mxu1 %v4183_v39  ;;  %3708 = vmatprep.subr.bf16.mxu0 %v4183_v39  ;;  %v4185_v58 = vld [vmem:[%s6351_s3 + $0x48] sm:$0xff]   ;;  %s4210_s25 = smov 64  }
   0xd   : > { %v4258_v1 = vshrl.u32 %v447_v0, 7  ;;  %3846 = vmatpush3.bf16.msra.mxu1 %v4183_v39  ;;  %3709 = vmatpush3.bf16.msra.mxu0 %v4183_v39  ;;  %p266_p4 = scmp.lt.s32.totalorder %s4253_s22, 1 }
   0xe   : > { %s6649_s23 = smov (!%p255_p3, %s3425_s23), 63  ;;  %3841 = vmatprep.subr.bf16.mxu1 %v4184_v40  ;;  %3710 = vmatprep.subr.bf16.mxu0 %v4184_v40 }
   0xf   : > { %v4263_v2 = vadd.s32 152, %v4258_v1  ;;  %v4266_v3 = vadd.s32 136, %v4258_v1  ;;  %v4269_v4 = vadd.s32 8, %v4258_v1  ;;  %s3426_s24 = sshll.u32 %s6649_s23, 2  ;;  %v4278_v6 = vadd.s32 24, %v4258_v1  ;;  %s6651_s22 = smov (!%p266_p4, %s4253_s22), 1 }
  0x10   : > { %s4285_s29 = scalar_lea.vmem %s6348_s0, %s3426_s24  ;;  %v4289_v8 = vadd.s32 168, %v4258_v1  ;;  %v4292_v9 = vadd.s32 184, %v4258_v1  ;;  %v4295_v10 = vadd.s32 56, %v4258_v1  ;;  %v4303_v16 = vadd.s32 40, %v4258_v1  ;;  %s6182_s8 = scalar_lea.vmem %s6352_s4, %s3426_s24 }
  0x11   : > { %v617_v7 = vand.u32 15, %v4263_v2  ;;  %v3634_v11 = vld [vmem:[%s4285_s29 + $0x40] sm:$0xff]   ;;  %v3635_v13 = vld [vmem:[%s4285_s29 + $0x48] sm:$0xff]   ;;  %v603_v14 = vand.u32 15, %v4266_v3  ;;  %v491_v15 = vand.u32 15, %v4269_v4  ;;  %vm1116_vm0 = vcmp.lt.s32.totalorder %v4258_v1, 7  ;;  %3847 = vmatpush3.bf16.msra.mxu1 %v4184_v40  ;;  %3711 = vmatpush3.bf16.msra.mxu0 %v4184_v40  ;;  %s268_s9 = scalar_lea.vmem %s6353_s5, %s6651_s22  ;;  %s271_s12 = scalar_lea.vmem %s6354_s6, %s6651_s22 }
  0x12   : > { %v3564_v12 = vld [vmem:[%s4285_s29] sm:$0xff]   ;;  %v3597_v17 = vunpack.c.l.bf16 %v3634_v11  ;;  %v3598_v18 = vunpack.c.h.bf16 %v3634_v11  ;;  %v3627_v21 = vld [vmem:[%s4285_s29 + $0x8] sm:$0xff]   ;;  %v3601_v23 = vunpack.c.l.bf16 %v3635_v13  ;;  %v3602_v24 = vunpack.c.h.bf16 %v3635_v13  ;;  %v3636_v45 = vld [vmem:[%s4285_s29 + $0x50] sm:$0xff]   ;;  %3842 = vmatprep.subr.bf16.mxu1 %v4185_v58  ;;  %3712 = vmatprep.subr.bf16.mxu0 %v4185_v58 }
  0x13   : > { %v3565_v19 = vunpack.c.l.bf16 %v3564_v12  ;;  %v3566_v20 = vunpack.c.h.bf16 %v3564_v12  ;;  %v3569_v25 = vunpack.c.l.bf16 %v3627_v21  ;;  %v3570_v26 = vunpack.c.h.bf16 %v3627_v21  ;;  %v3637_v55 = vld [vmem:[%s4285_s29 + $0x58] sm:$0xff]   ;;  %v3628_v62 = vld [vmem:[%s4285_s29 + $0x10] sm:$0xff]  }
  0x14   : > { %v360_v27 = vmul.f32 %v3597_v17, %v4275_v5  ;;  %v361_v28 = vmul.f32 %v3598_v18, %v4275_v5  ;;  %v362_v31 = vmul.f32 %v3601_v23, %v4275_v5  ;;  %v363_v32 = vmul.f32 %v3602_v24, %v4275_v5 }
  0x15   : > { %v344_v29 = vmul.f32 %v3565_v19, %v4275_v5  ;;  %v345_v30 = vmul.f32 %v3566_v20, %v4275_v5  ;;  %v346_v33 = vmul.f32 %v3569_v25, %v4275_v5  ;;  %v347_v34 = vmul.f32 %v3570_v26, %v4275_v5  ;;  %3848 = vmatpush3.bf16.msra.mxu1 %v4185_v58 }
  0x16   : > { %v399_v35 = vadd.f32 %v4309_v22, %v360_v27  ;;  %v400_v36 = vadd.f32 %v4309_v22, %v361_v28  ;;  %v401_v41 = vadd.f32 %v4309_v22, %v362_v31  ;;  %v402_v42 = vadd.f32 %v4309_v22, %v363_v32  ;;  %v4186_v28 = vld [vmem:[%s6351_s3 + $0x40] sm:$0xff]   ;;  %3713 = vmatpush3.bf16.msra.mxu0 %v4185_v58 }
  0x17   : > { %v383_v37 = vadd.f32 %v4309_v22, %v344_v29  ;;  %v384_v38 = vadd.f32 %v4309_v22, %v345_v30  ;;  %v385_v43 = vadd.f32 %v4309_v22, %v346_v33  ;;  %v386_v44 = vadd.f32 %v4309_v22, %v347_v34  ;;  %3843 = vmatprep.subr.bf16.mxu1 %v4186_v28 }
  0x18   : > { %v4335_v46 = vmax.f32 %v399_v35, 0.0  ;;  %v4337_v47 = vmax.f32 %v400_v36, 0.0  ;;  %v4343_v50 = vmax.f32 %v401_v41, 0.0  ;;  %v4345_v51 = vmax.f32 %v402_v42, 0.0  ;;  %3714 = vmatprep.subr.bf16.mxu0 %v4186_v28 }
  0x19   : > { %v4339_v48 = vmax.f32 %v383_v37, 0.0  ;;  %v4341_v49 = vmax.f32 %v384_v38, 0.0  ;;  %v4347_v52 = vmax.f32 %v385_v43, 0.0  ;;  %v4349_v53 = vmax.f32 %v386_v44, 0.0  ;;  %v4187_v43 = vld [vmem:[%s6351_s3 + $0x38] sm:$0xff]   ;;  %3849 = vmatpush3.bf16.msra.mxu1 %v4186_v28 }
  0x1a   : > { %6435 = vst [vmem:[#allocation4_spill] sm:$0xff] %v4345_v51  ;;  %v3863_v54 = vpack.i.bf16 %v4337_v47, %v4335_v46  ;;  %v505_v56 = vand.u32 15, %v4278_v6  ;;  %v631_v57 = vand.u32 15, %v4289_v8  ;;  %v1103_v59 = vrot.slane %v4337_v47, 1  ;;  %3715 = vmatpush3.bf16.msra.mxu0 %v4186_v28  ;;  %3844 = vmatprep.subr.bf16.mxu1 %v4187_v43 }
  0x1b   : > { %6433 = vst [vmem:[#allocation2_spill] sm:$0xff] %v4339_v48  ;;  %6434 = vst [vmem:[#allocation3_spill] sm:$0xff] %v4341_v49  ;;  %v6355_v60 = vrot.slane %v4335_v46, 1  ;;  %v3873_v61 = vpack.i.bf16 %v4341_v49, %v4339_v48  ;;  %v645_v63 = vand.u32 15, %v4292_v9  ;;  %v3868_v0 = vpack.i.bf16 %v4345_v51, %v4343_v50  ;;  %3716 = vmatprep.subr.bf16.mxu0 %v4187_v43 }
  0x1c   : > { %6436 = vst [vmem:[#allocation5_spill] sm:$0xff] %v4347_v52  ;;  %6437 = vst [vmem:[#allocation6_spill] sm:$0xff] %v4349_v53  ;;  %3864 = vrot.lane.b32.xlu0 %v3863_v54, %s4209_s14  ;;  %v3878_v11 = vpack.i.bf16 %v4349_v53, %v4347_v52  ;;  %v3605_v12 = vunpack.c.l.bf16 %v3636_v45  ;;  %v3606_v13 = vunpack.c.h.bf16 %v3636_v45  ;;  %v3609_v17 = vunpack.c.l.bf16 %v3637_v55 }
  0x1d   : > { %3874 = vrot.lane.b32.xlu1 %v3873_v61, %s4209_s14  ;;  %v3610_v18 = vunpack.c.h.bf16 %v3637_v55  ;;  %vm4373_vm1 = vcmp.le.s32.totalorder %v617_v7, 14  ;;  %v1104_v20 = vrot.slane %v4343_v50, 1  ;;  %v1105_v24 = vrot.slane %v4345_v51, 1  ;;  %3850 = vmatpush3.bf16.msra.mxu1 %v4187_v43 }
  0x1e   : > { %v364_v21 = vmul.f32 %v3605_v12, %v4275_v5  ;;  %v365_v23 = vmul.f32 %v3606_v13, %v4275_v5  ;;  %v3573_v25 = vunpack.c.l.bf16 %v3628_v62  ;;  %v366_v26 = vmul.f32 %v3609_v17, %v4275_v5  ;;  %3717 = vmatpush3.bf16.msra.mxu0 %v4187_v43 }
  0x1f   : > { %v367_v2 = vmul.f32 %v3610_v18, %v4275_v5  ;;  %v3574_v7 = vunpack.c.h.bf16 %v3628_v62  ;;  %vm4385_vm2 = vcmp.le.s32.totalorder %v603_v14, 14  ;;  %v4397_v31 = vsel %vm1116_vm0, %v1104_v20, %v1105_v24 }
  0x20   : > { %3869 = vrot.lane.b32.xlu0 %v3868_v0, %s4209_s14  ;;  %v403_v29 = vadd.f32 %v4309_v22, %v364_v21  ;;  %v404_v30 = vadd.f32 %v4309_v22, %v365_v23  ;;  %v348_v3 = vmul.f32 %v3573_v25, %v4275_v5  ;;  %v405_v14 = vadd.f32 %v4309_v22, %v366_v26  ;;  %v4188_v25 = vld [vmem:[%s6351_s3 + $0x30] sm:$0xff]  }
  0x21   : > { %3879 = vrot.lane.b32.xlu1 %v3878_v11, %s4209_s14  ;;  %v406_v32 = vadd.f32 %v4309_v22, %v367_v2  ;;  %v349_v33 = vmul.f32 %v3574_v7, %v4275_v5  ;;  %v4406_v34 = vsel %vm1116_vm0, %v1103_v59, %v1104_v20  ;;  %v4417_v38 = vsel %vm1116_vm0, %v6355_v60, %v1103_v59  ;;  %v3629_v20 = vld [vmem:[%s4285_s29 + $0x18] sm:$0xff]  }
  0x22   : > { %v4408_v35 = vmax.f32 %v403_v29, 0.0  ;;  %v4410_v36 = vmax.f32 %v404_v30, 0.0  ;;  %v387_v37 = vadd.f32 %v4309_v22, %v348_v3  ;;  %v4419_v39 = vmax.f32 %v405_v14, 0.0  ;;  %v4518_v3 = vld [vmem:[%s4285_s29 + $0x20] sm:$0xff]   ;;  %3845 = vmatprep.subr.bf16.mxu1 %v4188_v25  ;;  %3718 = vmatprep.subr.bf16.mxu0 %v4188_v25 }
  0x23   : > { %v4421_v40 = vmax.f32 %v406_v32, 0.0  ;;  %v388_v41 = vadd.f32 %v4309_v22, %v349_v33  ;;  %v1649_v42 = vsel %vm4385_vm2, %v4406_v34, 0.0  ;;  %vm4442_vm3 = vcmp.le.s32.totalorder %v491_v15, 14  ;;  %3851 = vmatpush3.bf16.msra.mxu1 %v4188_v25  ;;  %3719 = vmatpush3.bf16.msra.mxu0 %v4188_v25 }
  0x24   : > { %6442 = vst [vmem:[#allocation7_spill] sm:$0xff] %v4408_v35  ;;  %6443 = vst [vmem:[#allocation8_spill] sm:$0xff] %v4410_v36  ;;  %v3883_v44 = vpack.i.bf16 %v4410_v36, %v4408_v35  ;;  %v1106_v45 = vrot.slane %v4408_v35, 1  ;;  %v4433_v54 = vmax.f32 %v387_v37, 0.0  ;;  %v3898_v55 = vpack.i.bf16 %v1649_v42, %v4417_v38  ;;  %v3633_v35 = vld [vmem:[%s4285_s29 + $0x38] sm:$0xff]  }
  0x25   : > { %6444 = vst [vmem:[#allocation9_spill] sm:$0xff] %v4419_v39  ;;  %6445 = vst [vmem:[#allocation10_spill] sm:$0xff] %v4421_v40  ;;  %v3888_v58 = vpack.i.bf16 %v4421_v40, %v4419_v39  ;;  %v4438_v59 = vmax.f32 %v388_v41, 0.0  ;;  %v4447_v62 = vrot.slane %v4339_v48, 1  ;;  %v1087_v11 = vrot.slane %v4341_v49, 1 }
  0x26   : > { %6446 = vst [vmem:[#allocation11_spill] sm:$0xff] %v4433_v54  ;;  %3884 = vrot.lane.b32.xlu0 %v3883_v44, %s4209_s14  ;;  %v4452_v0 = vsel %vm1116_vm0, %v1105_v24, %v1106_v45  ;;  %v4456_v12 = vrot.slane %v4347_v52, 1  ;;  %vm4460_vm4 = vcmp.le.s32.totalorder %v505_v56, 14  ;;  %v1089_v17 = vrot.slane %v4349_v53, 1  ;;  %v4491_v24 = vld [vmem:[%s4285_s29 + $0x60] sm:$0xff]   ;;  %v3632_v52 = vld [vmem:[%s4285_s29 + $0x30] sm:$0xff]  }
  0x27   : > { %6447 = vst [vmem:[#allocation12_spill] sm:$0xff] %v4438_v59  ;;  %3889 = vrot.lane.b32.xlu1 %v3888_v58, %s4209_s14  ;;  %v1651_v15 = vsel %vm4373_vm1, %v4452_v0, 0.0  ;;  %v3893_v13 = vpack.i.bf16 %v4438_v59, %v4433_v54  ;;  %v1090_v18 = vrot.slane %v4433_v54, 1  ;;  %v4482_v21 = vsel %vm1116_vm0, %v4447_v62, %v1087_v11 }
  0x28   : > { %6450 = vst [vmem:[#allocation13_spill] sm:$0xff] %v4456_v12  ;;  %v3903_v6 = vpack.i.bf16 %v1651_v15, %v4397_v31  ;;  %v4477_v56 = vsel %vm1116_vm0, %v1087_v11, %v4456_v12  ;;  %vm4486_vm5 = vcmp.le.s32.totalorder %v631_v57, 14  ;;  %v4508_v57 = vsel %vm1116_vm0, %v4456_v12, %v1089_v17 }
  0x29   : > { %v1633_v26 = vsel %vm4442_vm3, %v4477_v56, 0.0  ;;  %v4503_v8 = vsel %vm1116_vm0, %v1089_v17, %v1090_v18  ;;  %v1107_v2 = vrot.slane %v4410_v36, 1  ;;  %v1108_v29 = vrot.slane %v4419_v39, 1  ;;  %v6511_v39 = vld [vmem:[#allocation4_spill] sm:$0xff] }
  0x2a   : > { %3904 = vrot.lane.b32.xlu0 %v3903_v6, %s4210_s25  ;;  %v3908_v7 = vpack.i.bf16 %v1633_v26, %v4482_v21  ;;  %v1635_v28 = vsel %vm4460_vm4, %v4503_v8, 0.0  ;;  %v3577_v30 = vunpack.c.l.bf16 %v3629_v20  ;;  %v3578_v33 = vunpack.c.h.bf16 %v3629_v20 }
  0x2b   : > { %3894 = vrot.lane.b32.xlu1 %v3893_v13, %s4209_s14  ;;  %v3913_v14 = vpack.i.bf16 %v1635_v28, %v4508_v57  ;;  %v4524_v32 = vsel %vm1116_vm0, %v1106_v45, %v1107_v2  ;;  %v3613_v37 = vunpack.c.l.bf16 %v4491_v24  ;;  %v4529_v41 = vsel %vm1116_vm0, %v1107_v2, %v1108_v29  ;;  %v3639_v13 = vld [vmem:[%s4285_s29 + $0x68] sm:$0xff]  }
  0x2c   : > { %v350_v42 = vmul.f32 %v3577_v30, %v4275_v5  ;;  %vm4534_vm6 = vcmp.le.s32.totalorder %v645_v63, 14  ;;  %v1109_v58 = vrot.slane %v4421_v40, 1  ;;  %v1653_v43 = vsel %vm4486_vm5, %v4529_v41, 0.0 }
  0x2d   : > { %v351_v45 = vmul.f32 %v3578_v33, %v4275_v5  ;;  %v368_v11 = vmul.f32 %v3613_v37, %v4275_v5  ;;  %v3581_v15 = vunpack.c.l.bf16 %v4518_v3  ;;  %v3918_v9 = vpack.i.bf16 %v1653_v43, %v4524_v32 }
  0x2e   : > { %3909 = vrot.lane.b32.xlu0 %v3908_v7, %s4210_s25  ;;  %v389_v63 = vadd.f32 %v4309_v22, %v350_v42  ;;  %v4551_v17 = vsel %vm1116_vm0, %v1108_v29, %v1109_v58  ;;  %v533_v20 = vand.u32 15, %v4295_v10  ;;  %v519_v7 = vand.u32 15, %v4303_v16 }
  0x2f   : > { %3899 = vrot.lane.b32.xlu1 %v3898_v55, %s4210_s25  ;;  %v390_v6 = vadd.f32 %v4309_v22, %v351_v45  ;;  %v407_v26 = vadd.f32 %v4309_v22, %v368_v11  ;;  %v352_v2 = vmul.f32 %v3581_v15, %v4275_v5  ;;  %v1091_v10 = vrot.slane %v4438_v59, 1 }
  0x30   : > { %v4559_v28 = vmax.f32 %v389_v63, 0.0  ;;  %vm4561_vm7 = vcmp.le.s32.totalorder %v533_v20, 14  ;;  %v3617_v29 = vunpack.c.l.bf16 %v3639_v13  ;;  %vm4571_vm8 = vcmp.le.s32.totalorder %v519_v7, 14 }
  0x31   : > { %v4566_v33 = vmax.f32 %v390_v6, 0.0  ;;  %v4568_v55 = vmax.f32 %v407_v26, 0.0  ;;  %v391_v37 = vadd.f32 %v4309_v22, %v352_v2  ;;  %v4581_v25 = vsel %vm1116_vm0, %v1090_v18, %v1091_v10 }
  0x32   : > { %6457 = vst [vmem:[#allocation14_spill] sm:$0xff] %v4559_v28  ;;  %3919 = vrot.lane.b32.xlu0 %v3918_v9, %s4210_s25  ;;  %v1092_v16 = vrot.slane %v4559_v28, 1  ;;  %v3618_v43 = vunpack.c.h.bf16 %v3639_v13  ;;  %v370_v45 = vmul.f32 %v3617_v29, %v4275_v5  ;;  %v3582_v60 = vunpack.c.h.bf16 %v4518_v3 }
  0x33   : > { %6460 = vst [vmem:[#allocation15_spill] sm:$0xff] %v4566_v33  ;;  %6461 = vst [vmem:[#allocation16_spill] sm:$0xff] %v4568_v55  ;;  %3914 = vrot.lane.b32.xlu1 %v3913_v14, %s4210_s25  ;;  %v3928_v11 = vpack.i.bf16 %v4566_v33, %v4559_v28  ;;  %v1110_v15 = vrot.slane %v4568_v55, 1  ;;  %v4588_v9 = vmax.f32 %v391_v37, 0.0  ;;  %v1093_v63 = vrot.slane %v4566_v33, 1  ;;  %v3631_v37 = vld [vmem:[%s4285_s29 + $0x28] sm:$0xff]  }
  0x34   : > { %v4593_v20 = vsel %vm1116_vm0, %v1091_v10, %v1092_v16  ;;  %v371_v18 = vmul.f32 %v3618_v43, %v4275_v5  ;;  %v409_v13 = vadd.f32 %v4309_v22, %v370_v45  ;;  %v3614_v14 = vunpack.c.h.bf16 %v4491_v24 }
  0x35   : > { %6464 = vst [vmem:[#allocation17_spill] sm:$0xff] %v4588_v9  ;;  %v4600_v6 = vsel %vm1116_vm0, %v1109_v58, %v1110_v15  ;;  %v6356_v26 = vrot.slane %v4588_v9, 1  ;;  %v4605_v2 = vsel %vm1116_vm0, %v1092_v16, %v1093_v63  ;;  %v1637_v7 = vsel %vm4571_vm8, %v4593_v20, 0.0 }
  0x36   : > { %v1655_v10 = vsel %vm4534_vm6, %v4600_v6, 0.0  ;;  %v3933_v24 = vpack.i.bf16 %v1637_v7, %v4581_v25  ;;  %v410_v29 = vadd.f32 %v4309_v22, %v371_v18  ;;  %v4615_v58 = vmax.f32 %v409_v13, 0.0  ;;  %v4629_v7 = vld [vmem:[%s4285_s29 + $0x70] sm:$0xff]  }
  0x37   : > { %3929 = vrot.lane.b32.xlu1 %v3928_v11, %s4209_s14  ;;  %v3923_v16 = vpack.i.bf16 %v1655_v10, %v4551_v17  ;;  %v4624_v43 = vsel %vm1116_vm0, %v1093_v63, %v6356_v26  ;;  %v369_v45 = vmul.f32 %v3614_v14, %v4275_v5  ;;  %v473_v11 = vadd.s32 200, %v4258_v1 }
  0x38   : > { %6465 = vst [vmem:[#allocation18_spill] sm:$0xff] %v4615_v58  ;;  %v1639_v18 = vsel %vm4561_vm7, %v4624_v43, 0.0  ;;  %v4634_v13 = vmax.f32 %v410_v29, 0.0  ;;  %v1112_v10 = vrot.slane %v4615_v58, 1  ;;  %v353_v3 = vmul.f32 %v3582_v60, %v4275_v5 }
  0x39   : > { %3924 = vrot.lane.b32.xlu0 %v3923_v16, %s4210_s25  ;;  %v3938_v63 = vpack.i.bf16 %v1639_v18, %v4605_v2  ;;  %v408_v14 = vadd.f32 %v4309_v22, %v369_v45  ;;  %v3585_v26 = vunpack.c.l.bf16 %v3631_v37  ;;  %v659_v28 = vand.u32 15, %v473_v11 }
  0x3a   : > { %6466 = vst [vmem:[#allocation19_spill] sm:$0xff] %v4634_v13  ;;  %v3948_v33 = vpack.i.bf16 %v4634_v13, %v4615_v58  ;;  %v3586_v59 = vunpack.c.h.bf16 %v3631_v37  ;;  %v3621_v29 = vunpack.c.l.bf16 %v4629_v7  ;;  %v392_v16 = vadd.f32 %v4309_v22, %v353_v3  ;;  %v6525_v27 = vld [vmem:[#allocation16_spill] sm:$0xff] }
  0x3b   : > { %3939 = vrot.lane.b32.xlu1 %v3938_v63, %s4210_s25  ;;  %v4646_v54 = vmax.f32 %v408_v14, 0.0  ;;  %v354_v18 = vmul.f32 %v3585_v26, %v4275_v5  ;;  %v475_v45 = vadd.s32 216, %v4258_v1  ;;  %v1113_v11 = vrot.slane %v4634_v13, 1  ;;  %v4695_v13 = vld [vmem:[%s6351_s3 + $0x28] sm:$0xff]  }
  0x3c   : > { %v355_v60 = vmul.f32 %v3586_v59, %v4275_v5  ;;  %v372_v12 = vmul.f32 %v3621_v29, %v4275_v5  ;;  %v4657_v63 = vmax.f32 %v392_v16, 0.0  ;;  %vm4659_vm9 = vcmp.le.s32.totalorder %v659_v28, 14  ;;  %6474 = vst [vmem:[#allocation25_spill] sm:$0xff] %v4695_v13  ;;  %3752 = vmatprep.subr.bf16.mxu1 %v4695_v13 }
  0x3d   : > { %6467 = vst [vmem:[#allocation20_spill] sm:$0xff] %v4646_v54  ;;  %3934 = vrot.lane.b32.xlu0 %v3933_v24, %s4210_s25  ;;  %v3943_v37 = vpack.i.bf16 %v4646_v54, %v4568_v55  ;;  %v1111_v26 = vrot.slane %v4646_v54, 1  ;;  %v393_v3 = vadd.f32 %v4309_v22, %v354_v18  ;;  %v673_v53 = vand.u32 15, %v475_v45 }
  0x3e   : > { %6468 = vst [vmem:[#allocation21_spill] sm:$0xff] %v4657_v63  ;;  %v394_v59 = vadd.f32 %v4309_v22, %v355_v60  ;;  %v411_v29 = vadd.f32 %v4309_v22, %v372_v12  ;;  %v3958_v24 = vpack.i.bf16 %v4657_v63, %v4588_v9  ;;  %v4681_v18 = vsel %vm1116_vm0, %v1112_v10, %v1113_v11 }
  0x3f   : > { %3949 = vrot.lane.b32.xlu1 %v3948_v33, %s4209_s14  ;;  %v4673_v28 = vsel %vm1116_vm0, %v1111_v26, %v1112_v10  ;;  %v4677_v16 = vsel %vm1116_vm0, %v1110_v15, %v1111_v26  ;;  %v4686_v33 = vmax.f32 %v393_v3, 0.0  ;;  %vm4699_vm10 = vcmp.le.s32.totalorder %v673_v53, 14 }
  0x40   : > { %v1657_v12 = vsel %vm4659_vm9, %v4673_v28, 0.0  ;;  %v4688_v45 = vmax.f32 %v394_v59, 0.0  ;;  %v4690_v60 = vmax.f32 %v411_v29, 0.0  ;;  %v3589_v26 = vunpack.c.l.bf16 %v3632_v52  ;;  %v3641_v59 = vld [vmem:[%s4285_s29 + $0x78] sm:$0xff]  }
  0x41   : > { %6471 = vst [vmem:[#allocation22_spill] sm:$0xff] %v4686_v33  ;;  %3944 = vrot.lane.b32.xlu0 %v3943_v37, %s4209_s14  ;;  %v3953_v15 = vpack.i.bf16 %v1657_v12, %v4677_v16  ;;  %v459_v3 = vadd.s32 88, %v4258_v1  ;;  %v1096_v55 = vrot.slane %v4686_v33, 1  ;;  %v457_v12 = vadd.s32 72, %v4258_v1 }
  0x42   : > { %6472 = vst [vmem:[#allocation23_spill] sm:$0xff] %v4688_v45  ;;  %6473 = vst [vmem:[#allocation24_spill] sm:$0xff] %v4690_v60  ;;  %v3968_v29 = vpack.i.bf16 %v4688_v45, %v4686_v33  ;;  %v6384_v40 = vrot.slane %v4690_v60, 1  ;;  %v1097_v54 = vrot.slane %v4688_v45, 1  ;;  %v356_v53 = vmul.f32 %v3589_v26, %v4275_v5 }
  0x43   : > { %3959 = vrot.lane.b32.xlu1 %v3958_v24, %s4209_s14  ;;  %v561_v37 = vand.u32 15, %v459_v3  ;;  %v1095_v58 = vrot.slane %v4657_v63, 1  ;;  %v3625_v33 = vunpack.c.l.bf16 %v3641_v59  ;;  %v3626_v13 = vunpack.c.h.bf16 %v3641_v59 }
  0x44   : > { %v4719_v36 = vsel %vm1116_vm0, %v1113_v11, %v6384_v40  ;;  %v4723_v45 = vsel %vm1116_vm0, %v1096_v55, %v1097_v54  ;;  %v395_v26 = vadd.f32 %v4309_v22, %v356_v53  ;;  %v547_v11 = vand.u32 15, %v457_v12  ;;  %v4737_v40 = vld [vmem:[%s6351_s3 + $0x88] sm:$0xff]  }
  0x45   : > { %3954 = vrot.lane.b32.xlu0 %v3953_v15, %s4210_s25  ;;  %v1659_v24 = vsel %vm4699_vm10, %v4719_v36, 0.0  ;;  %vm4730_vm11 = vcmp.le.s32.totalorder %v561_v37, 14  ;;  %6479 = vst [vmem:[#allocation26_spill] sm:$0xff] %v4737_v40  ;;  %v4742_v15 = vsel %vm1116_vm0, %v1095_v58, %v1096_v55  ;;  %v6480_v63 = vrot.slane %v4588_v9, 1  ;;  %3796 = vmatprep.subr.bf16.mxu0 %v4737_v40 }
  0x46   : > { %v3963_v59 = vpack.i.bf16 %v1659_v24, %v4681_v18  ;;  %v374_v37 = vmul.f32 %v3625_v33, %v4275_v5  ;;  %v4752_v12 = vmax.f32 %v395_v26, 0.0  ;;  %vm4754_vm12 = vcmp.le.s32.totalorder %v547_v11, 14 }
  0x47   : > { %v4748_v53 = vsel %vm1116_vm0, %v6480_v63, %v1095_v58  ;;  %3969 = vrot.lane.b32.xlu1 %v3968_v29, %s4209_s14  ;;  %v375_v24 = vmul.f32 %v3626_v13, %v4275_v5  ;;  %v3622_v55 = vunpack.c.h.bf16 %v4629_v7  ;;  %v1641_v58 = vsel %vm4754_vm12, %v4742_v15, 0.0 }
  0x48   : > { %6481 = vst [vmem:[#allocation27_spill] sm:$0xff] %v4752_v12  ;;  %v413_v63 = vadd.f32 %v4309_v22, %v374_v37  ;;  %v3590_v33 = vunpack.c.h.bf16 %v3632_v52  ;;  %v477_v29 = vadd.s32 232, %v4258_v1  ;;  %v1098_v26 = vrot.slane %v4752_v12, 1 }
  0x49   : > { %3964 = vrot.lane.b32.xlu0 %v3963_v59, %s4210_s25  ;;  %v3973_v13 = vpack.i.bf16 %v1641_v58, %v4748_v53  ;;  %v414_v7 = vadd.f32 %v4309_v22, %v375_v24  ;;  %v373_v11 = vmul.f32 %v3622_v55, %v4275_v5  ;;  %v3593_v48 = vunpack.c.l.bf16 %v3633_v35 }
  0x4a   : > { %v4772_v9 = vmax.f32 %v413_v63, 0.0  ;;  %v357_v40 = vmul.f32 %v3590_v33, %v4275_v5  ;;  %v687_v51 = vand.u32 15, %v477_v29  ;;  %v4777_v52 = vsel %vm1116_vm0, %v1097_v54, %v1098_v26 }
  0x4b   : > { %v4779_v37 = vmax.f32 %v414_v7, 0.0  ;;  %v412_v59 = vadd.f32 %v4309_v22, %v373_v11  ;;  %v3594_v49 = vunpack.c.h.bf16 %v3633_v35  ;;  %v1643_v24 = vsel %vm4730_vm11, %v4777_v52, 0.0 }
  0x4c   : > { %6484 = vst [vmem:[#allocation28_spill] sm:$0xff] %v4772_v9  ;;  %v396_v55 = vadd.f32 %v4309_v22, %v357_v40  ;;  %vm4786_vm13 = vcmp.le.s32.totalorder %v687_v51, 14  ;;  %v3978_v63 = vpack.i.bf16 %v1643_v24, %v4723_v45  ;;  %v1627_v33 = vrot.slane %v4772_v9, 1 }
  0x4d   : > { %6485 = vst [vmem:[#allocation29_spill] sm:$0xff] %v4779_v37  ;;  %3974 = vrot.lane.b32.xlu0 %v3973_v13, %s4210_s25  ;;  %v4792_v54 = vmax.f32 %v412_v59, 0.0  ;;  %v358_v35 = vmul.f32 %v3593_v48, %v4275_v5  ;;  %v359_v7 = vmul.f32 %v3594_v49, %v4275_v5  ;;  %v479_v40 = vadd.s32 248, %v4258_v1 }
  0x4e   : > { %v4796_v29 = vmax.f32 %v396_v55, 0.0  ;;  %v4801_v51 = vrot.slane %v4779_v37, 1  ;;  %3979 = vrot.lane.b32.xlu1 %v3978_v63, %s4210_s25  ;;  %v3988_v13 = vpack.i.bf16 %v4779_v37, %v4772_v9  ;;  %v6492_v63 = vrot.slane %v4690_v60, 1 }
  0x4f   : > { %6488 = vst [vmem:[#allocation30_spill] sm:$0xff] %v4792_v54  ;;  %v3983_v11 = vpack.i.bf16 %v4792_v54, %v4690_v60  ;;  %v4809_v59 = vrot.slane %v4792_v54, 1  ;;  %v397_v48 = vadd.f32 %v4309_v22, %v358_v35  ;;  %v398_v49 = vadd.f32 %v4309_v22, %v359_v7 }
  0x50   : > { %6489 = vst [vmem:[#allocation31_spill] sm:$0xff] %v4796_v29  ;;  %6490 = vst [vmem:[#allocation32_spill] sm:$0xff] %v4801_v51  ;;  %v3998_v5 = vpack.i.bf16 %v4796_v29, %v4752_v12  ;;  %v701_v24 = vand.u32 15, %v479_v40  ;;  %v4818_v55 = vsel %vm1116_vm0, %v1627_v33, %v4801_v51  ;;  %v1631_v7 = vsel %vm1116_vm0, %v4801_v51, %v4447_v62 }
  0x51   : > { %6491 = vst [vmem:[#allocation33_spill] sm:$0xff] %v4809_v59  ;;  %3984 = vrot.lane.b32.xlu0 %v3983_v11, %s4209_s14  ;;  %v4826_v54 = vsel %vm1116_vm0, %v6492_v63, %v4809_v59  ;;  %v4831_v35 = vsel %vm1116_vm0, %v4809_v59, %v1627_v33  ;;  %v4833_v22 = vmax.f32 %v397_v48, 0.0  ;;  %v4842_v11 = vmax.f32 %v398_v49, 0.0 }
  0x52   : > { %v1661_v40 = vsel %vm4786_vm13, %v4831_v35, 0.0  ;;  %vm4844_vm14 = vcmp.le.s32.totalorder %v701_v24, 14  ;;  %v6493_v63 = vmov 0  ;;  %v463_v33 = vadd.s32 120, %v4258_v1  ;;  %3989 = vrot.lane.b32.xlu1 %v3988_v13, %s4209_s14 }
  0x53   : > { %v6494_v63 = vsel %vm4844_vm14, 4294967295, %v6493_v63  ;;  %v3993_v48 = vpack.i.bf16 %v1661_v40, %v4826_v54  ;;  %v1663_v12 = vsel %vm4844_vm14, %v1631_v7, 0.0  ;;  %v1100_v60 = vrot.slane %v4833_v22, 1 }
  0x54   : > { %v461_v9 = vadd.s32 104, %v4258_v1  ;;  %v589_v37 = vand.u32 15, %v463_v33  ;;  %v4003_v49 = vpack.i.bf16 %v1663_v12, %v4818_v55  ;;  %v1101_v24 = vrot.slane %v4842_v11, 1 }
  0x55   : > { %3994 = vrot.lane.b32.xlu0 %v3993_v48, %s4210_s25  ;;  %v1099_v51 = vrot.slane %v4796_v29, 1  ;;  %v4008_v7 = vpack.i.bf16 %v4842_v11, %v4833_v22  ;;  %v6497_v40 = vrot.slane %v4335_v46, 1  ;;  %v2440_v4 = vsel %vm4486_vm5, %v4600_v6, 0.0 }
  0x56   : > { %v575_v59 = vand.u32 15, %v461_v9  ;;  %vm4859_vm15 = vcmp.le.s32.totalorder %v589_v37, 14  ;;  %3999 = vrot.lane.b32.xlu1 %v3998_v5, %s4209_s14  ;;  %v4882_v37 = vsel %vm1116_vm0, %v1100_v60, %v1101_v24  ;;  %v1217_v23 = vsel %vm4571_vm8, %v4503_v8, 0.0 }
  0x57   : > { %v4870_v33 = vsel %vm1116_vm0, %v1101_v24, %v6497_v40  ;;  %v4878_v9 = vsel %vm1116_vm0, %v1099_v51, %v1100_v60  ;;  %v4889_v48 = vsel %vm1116_vm0, %v1098_v26, %v1099_v51  ;;  %v1146_v60 = vsel %vm1116_vm0, 0.0, %v4447_v62 }
  0x58   : > { %vm4872_vm14 = vcmp.le.s32.totalorder %v575_v59, 14  ;;  %v1647_v5 = vsel %vm4859_vm15, %v4870_v33, 0.0  ;;  %v1213_v26 = vsel %vm4442_vm3, %v1146_v60, 0.0  ;;  %v2420_v51 = vsel %vm4442_vm3, %v4503_v8, 0.0 }
  0x59   : > { %v1645_v59 = vsel %vm4872_vm14, %v4878_v9, 0.0  ;;  %4004 = vrot.lane.b32.xlu0 %v4003_v49, %s4210_s25  ;;  %v4018_v24 = vpack.i.bf16 %v1647_v5, %v4882_v37  ;;  %v1215_v49 = vsel %vm4460_vm4, %v4477_v56, 0.0  ;;  %v4033_v60 = vpack.i.bf16 %v2420_v51, %v4508_v57 }
  0x5a   : > { %v4013_v40 = vpack.i.bf16 %v1645_v59, %v4889_v48  ;;  %4009 = vrot.lane.b32.xlu1 %v4008_v7, %s4209_s14  ;;  %v944_v59 = vrot.slane %v4335_v46, 7  ;;  %v6407_v7 = vmov 0.0   ;;  %v4028_v61 = vpack.i.bf16 %v1215_v49, %v4482_v21 }
  0x5b   : > { %v4023_v5 = vpack.i.bf16 %v1213_v26, %v6407_v7  ;;  %v2436_v56 = vsel %vm4385_vm2, %v4452_v0, 0.0  ;;  %v1231_v62 = vsel %vm4373_vm1, %v4406_v34, 0.0  ;;  %v2438_v49 = vsel %vm4373_vm1, %v4529_v41, 0.0 }
  0x5c   : > { %v4934_v26 = vpack.i.bf16 %v2436_v56, %v4397_v31  ;;  %v4937_v51 = vpack.i.bf16 %v1231_v62, %v4417_v38  ;;  %v4956_v62 = vpack.i.bf16 %v2438_v49, %v4524_v32  ;;  %vm958_vm1 = vcmp.lt.s32.totalorder %v4258_v1, 1 }
  0x5d   : > { %4014 = vrot.lane.b32.xlu0 %v4013_v40, %s4210_s25  ;;  %v2434_v40 = vsel %vm4859_vm15, %v4406_v34, 0.0  ;;  %v1233_v34 = vsel %vm4486_vm5, %v4452_v0, 0.0  ;;  %v4959_v0 = vpack.i.bf16 %v2440_v4, %v4551_v17  ;;  %v1219_v8 = vsel %vm4561_vm7, %v4593_v20, 0.0 }
  0x5e   : > { %4019 = vrot.lane.b32.xlu1 %v4018_v24, %s4210_s25  ;;  %v2422_v24 = vsel %vm4460_vm4, %v4593_v20, 0.0  ;;  %v4931_v21 = vpack.i.bf16 %v2434_v40, %v4417_v38  ;;  %v1235_v40 = vsel %vm4534_vm6, %v4529_v41, 0.0  ;;  %v4953_v38 = vpack.i.bf16 %v1233_v34, %v4397_v31 }
  0x5f   : > { %v4962_v19 = vpack.i.bf16 %v1235_v40, %v4524_v32  ;;  %v1237_v41 = vsel %vm4659_vm9, %v4600_v6, 0.0  ;;  %v2442_v31 = vsel %vm4534_vm6, %v4673_v28, 0.0  ;;  %v4038_v56 = vpack.i.bf16 %v2422_v24, %v4581_v25 }
  0x60   : > { %v4977_v32 = vpack.i.bf16 %v1237_v41, %v4551_v17  ;;  %v4980_v34 = vpack.i.bf16 %v2442_v31, %v4677_v16  ;;  %v6500_v6 = vrot.slane %v4842_v11, 7  ;;  %v4043_v17 = vpack.i.bf16 %v1217_v23, %v4508_v57 }
  0x61   : > { %1275 = vrot.lane.b32.xlu0 %v6407_v7, %s4209_s14  ;;  %v2444_v24 = vsel %vm4659_vm9, %v4719_v36, 0.0  ;;  %v1239_v20 = vsel %vm4699_vm10, %v4673_v28, 0.0  ;;  %v464_v49 = vadd.s32 128, %v4258_v1  ;;  %v2424_v4 = vsel %vm4571_vm8, %v4624_v43, 0.0 }
  0x62   : > { %4024 = vrot.lane.b32.xlu1 %v4023_v5, %s4210_s25  ;;  %v466_v5 = vadd.s32 144, %v4258_v1  ;;  %v5011_v57 = vpack.i.bf16 %v2444_v24, %v4681_v18  ;;  %v4048_v14 = vpack.i.bf16 %v1219_v8, %v4581_v25  ;;  %v468_v42 = vadd.s32 160, %v4258_v1 }
  0x63   : > { %v945_v23 = vrot.slane %v4337_v47, 7  ;;  %v2426_v41 = vsel %vm4561_vm7, %v4742_v15, 0.0  ;;  %v596_v31 = vand.u32 15, %v464_v49  ;;  %v4053_v25 = vpack.i.bf16 %v2424_v4, %v4605_v2 }
  0x64   : > { %v610_v44 = vand.u32 15, %v466_v5  ;;  %v6408_v5 = vrot.slane %v4343_v50, 7  ;;  %v6503_v8 = vmov 0  ;;  %vm6521_vm8 = vnez %v6494_v63  ;;  %v6569_v63 = vld [vmem:[#allocation11_spill] sm:$0xff] }
  0x65   : > { %4029 = vrot.lane.b32.xlu0 %v4028_v61, %s4210_s25  ;;  %v4992_v61 = vsel %vm958_vm1, %v6500_v6, %v944_v59  ;;  %vm5032_vm4 = vcmp.ge.s32.totalorder %v596_v31, 1  ;;  %v6413_v46 = vrot.slane %v6525_v27, 7  ;;  %v6541_v13 = vrot.slane %v4842_v11, 7 }
  0x66   : > { %4034 = vrot.lane.b32.xlu1 %v4033_v60, %s4210_s25  ;;  %vm5006_vm3 = vcmp.ge.s32.totalorder %v610_v44, 1  ;;  %v5019_v60 = vpack.i.bf16 %v1239_v20, %v4677_v16  ;;  %v1221_v16 = vsel %vm4754_vm12, %v4624_v43, 0.0  ;;  %v6504_v8 = vsel %vm5032_vm4, 4294967295, %v6503_v8  ;;  %v6508_v20 = vld [vmem:[#allocation3_spill] sm:$0xff] }
  0x67   : > { %v1072_v28 = vsel %vm5006_vm3, %v4992_v61, 0.0  ;;  %6505 = vst [vmem:[#allocation34_spill] sm:$0xff] %v6504_v8  ;;  %v5042_v30 = vsel %vm958_vm1, %v945_v23, %v6408_v5  ;;  %v4058_v44 = vpack.i.bf16 %v2426_v41, %v4748_v53  ;;  %v1223_v43 = vsel %vm4730_vm11, %v4742_v15, 0.0  ;;  %v6514_v5 = vld [vmem:[#allocation8_spill] sm:$0xff] }
  0x68   : > { %v6420_v49 = vrot.slane %v6508_v20, 7  ;;  %v4063_v4 = vpack.i.bf16 %v1221_v16, %v4605_v2  ;;  %v2428_v15 = vsel %vm4754_vm12, %v4777_v52, 0.0  ;;  %v4068_v31 = vpack.i.bf16 %v1223_v43, %v4748_v53  ;;  %v6513_v43 = vld [vmem:[#allocation9_spill] sm:$0xff] }
  0x69   : > { %4039 = vrot.lane.b32.xlu0 %v4038_v56, %s4210_s25  ;;  %v624_v56 = vand.u32 15, %v468_v42  ;;  %v6509_v42 = vld [vmem:[#allocation2_spill] sm:$0xff]  ;;  %v6419_v2 = vrot.slane %v6511_v39, 7  ;;  %v470_v16 = vadd.s32 176, %v4258_v1  ;;  %v4073_v53 = vpack.i.bf16 %v2428_v15, %v4723_v45 }
  0x6a   : > { %4044 = vrot.lane.b32.xlu1 %v4043_v17, %s4210_s25  ;;  %v5069_v41 = vrot.slane %v6509_v42, 7  ;;  %v6512_v42 = vld [vmem:[#allocation7_spill] sm:$0xff]  ;;  %v6418_v17 = vrot.slane %v6514_v5, 7  ;;  %vm1496_vm12 = vcmask 261120   ;;  %v1611_v6 = vsel %vm5032_vm4, %v4992_v61, 0.0 }
  0x6b   : > { %vm5049_vm5 = vcmp.ge.s32.totalorder %v624_v56, 1  ;;  %v2430_v56 = vsel %vm4730_vm11, %v4878_v9, 0.0  ;;  %v6409_v7 = vrot.slane %v6512_v42, 7 }
  0x6c   : > { %6510 = vst [vmem:[#allocation3_spill] sm:$0xff] %v5069_v41 }
  0x6d   : > { %4049 = vrot.lane.b32.xlu0 %v4048_v14, %s4210_s25  ;;  %v1241_v14 = vsel %vm4786_vm13, %v4719_v36, 0.0  ;;  %v2446_v36 = vsel %vm4699_vm10, %v4831_v35, 0.0  ;;  %v5099_v10 = vsel %vm958_vm1, %v6419_v2, %v6409_v7  ;;  %v6515_v35 = vld [vmem:[#allocation32_spill] sm:$0xff]  ;;  %v6552_v2 = vld [vmem:[#allocation6_spill] sm:$0xff] }
  0x6e   : > { %4054 = vrot.lane.b32.xlu1 %v4053_v25, %s4210_s25  ;;  %v5076_v25 = vpack.i.bf16 %v1241_v14, %v4681_v18  ;;  %v5087_v3 = vpack.i.bf16 %v2446_v36, %v4826_v54  ;;  %v472_v18 = vadd.s32 192, %v4258_v1  ;;  %v6410_v14 = vrot.slane %v6513_v43, 7 }
  0x6f   : > { %v2417_v15 = vsel %vm1116_vm0, %v6515_v35, 0.0  ;;  %v1225_v36 = vsel %vm4872_vm14, %v4777_v52, 0.0  ;;  %v6518_v35 = vld [vmem:[#allocation33_spill] sm:$0xff] }
  0x70   : > { %v652_v24 = vand.u32 15, %v472_v18  ;;  %v5122_v52 = vsel %vm958_vm1, %v6418_v17, %v6410_v14  ;;  %v1147_v18 = vsel %vm1116_vm0, %v6518_v35, 0.0  ;;  %v2432_v35 = vsel %vm4872_vm14, %v4870_v33, 0.0 }
  0x71   : > { %4059 = vrot.lane.b32.xlu0 %v4058_v44, %s4210_s25  ;;  %v638_v44 = vand.u32 15, %v470_v16  ;;  %v4093_v12 = vpack.i.bf16 %v2432_v35, %v4882_v37  ;;  %v6572_v40 = vsel %vm5049_vm5, %v5122_v52, 0.0 }
  0x72   : > { %4064 = vrot.lane.b32.xlu1 %v4063_v4, %s4210_s25  ;;  %v4078_v4 = vpack.i.bf16 %v2430_v56, %v4889_v48  ;;  %v2448_v56 = vsel %vm4786_vm13, %v2417_v15, 0.0  ;;  %vm5135_vm7 = vcmp.ge.s32.totalorder %v652_v24, 1  ;;  %v4083_v15 = vpack.i.bf16 %v1225_v36, %v4723_v45 }
  0x73   : > { %vm5112_vm6 = vcmp.ge.s32.totalorder %v638_v44, 1  ;;  %v1243_v24 = vsel %vm6521_vm8, %v1147_v18, 0.0  ;;  %v476_v18 = vadd.s32 224, %v4258_v1 }
  0x74   : > { %v5156_v14 = vpack.i.bf16 %v1243_v24, %v4826_v54  ;;  %v6524_v24 = vld [vmem:[#allocation20_spill] sm:$0xff] }
  0x75   : > { %4069 = vrot.lane.b32.xlu0 %v4068_v31, %s4210_s25  ;;  %v1227_v31 = vsel %vm4859_vm15, %v4878_v9, 0.0  ;;  %v5148_v9 = vpack.i.bf16 %v2448_v56, %v4818_v55  ;;  %v5165_v55 = vsel %vm958_vm1, %v5069_v41, %v6420_v49  ;;  %v474_v56 = vadd.s32 208, %v4258_v1 }
  0x76   : > { %4074 = vrot.lane.b32.xlu1 %v4073_v53, %s4210_s25  ;;  %v4088_v45 = vpack.i.bf16 %v1227_v31, %v4889_v48  ;;  %v6522_v53 = vld [vmem:[#allocation29_spill] sm:$0xff]  ;;  %v1229_v48 = vsel %vm4385_vm2, %v4870_v33, 0.0  ;;  %v6523_v31 = vld [vmem:[#allocation18_spill] sm:$0xff]  ;;  %v6412_v35 = vrot.slane %v6524_v24, 7  ;;  %vm1928_vm15 = vcmask 785408  }
  0x77   : > { %v1591_v36 = vrot.slane %v6522_v53, 7  ;;  %v4103_v47 = vpack.i.bf16 %v1229_v48, %v4882_v37  ;;  %v666_v33 = vand.u32 15, %v474_v56  ;;  %v680_v53 = vand.u32 15, %v476_v18 }
  0x78   : > { %v462_v48 = vadd.s32 112, %v4258_v1  ;;  %v6608_v7 = vrot.slane %v6523_v31, 7 }
  0x79   : > { %4079 = vrot.lane.b32.xlu0 %v4078_v4, %s4210_s25  ;;  %v5173_v54 = vsel %vm958_vm1, %v1591_v36, %v5069_v41  ;;  %v5184_v4 = vsel %vm958_vm1, %v944_v59, %v945_v23  ;;  %v6526_v59 = vld [vmem:[#allocation10_spill] sm:$0xff]  ;;  %vm5205_vm2 = vcmp.ge.s32.totalorder %v666_v33, 1  ;;  %vm5209_vm9 = vcmp.ge.s32.totalorder %v680_v53, 1 }
  0x7a   : > { %4084 = vrot.lane.b32.xlu1 %v4083_v15, %s4210_s25  ;;  %v6411_v15 = vrot.slane %v6523_v31, 7  ;;  %v6414_v23 = vrot.slane %v6526_v59, 7  ;;  %v478_v53 = vadd.s32 240, %v4258_v1  ;;  %v5303_v58 = vsel %vm958_vm1, %v1591_v36, 0.0  ;;  %v4200_v31 = vld [vmem:[%s6351_s3 + $0x60] sm:$0xff]  }
  0x7b   : > { %6540 = vst [vmem:[#allocation4_spill] sm:$0xff] %v5303_v58  ;;  %v6559_v58 = vmov 0 }
  0x7c   : > { %v5227_v18 = vsel %vm958_vm1, %v6414_v23, %v6413_v46  ;;  %v582_v46 = vand.u32 15, %v462_v48  ;;  %v694_v33 = vand.u32 15, %v478_v53 }
  0x7d   : > { %4089 = vrot.lane.b32.xlu0 %v4088_v45, %s4210_s25  ;;  %v5203_v45 = vsel %vm958_vm1, %v6412_v35, %v6411_v15  ;;  %v6531_v15 = vld [vmem:[#allocation28_spill] sm:$0xff]  ;;  %v6602_v16 = vsel %vm5112_vm6, %v5227_v18, 0.0 }
  0x7e   : > { %4094 = vrot.lane.b32.xlu1 %v4093_v12, %s4210_s25  ;;  %v1590_v35 = vrot.slane %v6531_v15, 7  ;;  %vm5259_vm10 = vcmp.ge.s32.totalorder %v582_v46, 1  ;;  %vm5263_vm11 = vcmp.ge.s32.totalorder %v694_v33, 1 }
  0x7f   : > { %v2399_v53 = vsel %vm5259_vm10, %v4992_v61, 0.0 }
  0x81   : > { %4099 = vrot.lane.b32.xlu0 %v4931_v21, %s4210_s25  ;;  %v6532_v21 = vld [vmem:[#allocation30_spill] sm:$0xff] }
  0x82   : > { %4104 = vrot.lane.b32.xlu1 %v4103_v47, %s4210_s25  ;;  %v5242_v56 = vrot.slane %v6532_v21, 7  ;;  %v5248_v47 = vsel %vm958_vm1, %v1590_v35, %v1591_v36  ;;  %v6535_v21 = vmov 0 }
  0x83   : > { %v6536_v21 = vsel %vm5259_vm10, 4294967295, %v6535_v21 }
  0x84   : > { %v5254_v15 = vsel %vm958_vm1, %v5242_v56, %v1590_v35  ;;  %6537 = vst [vmem:[#allocation2_spill] sm:$0xff] %v6536_v21 }
  0x85   : > { %4109 = vrot.lane.b32.xlu0 %v4937_v51, %s4210_s25  ;;  %v6533_v51 = vld [vmem:[#allocation19_spill] sm:$0xff] }
  0x86   : > { %4114 = vrot.lane.b32.xlu1 %v4934_v26, %s4210_s25  ;;  %v6416_v23 = vrot.slane %v6533_v51, 7  ;;  %v6534_v26 = vld [vmem:[#allocation24_spill] sm:$0xff] }
  0x87   : > { %v6415_v48 = vrot.slane %v6534_v26, 7 }
  0x89   : > { %4119 = vrot.lane.b32.xlu0 %v4956_v62, %s4210_s25  ;;  %v5276_v35 = vsel %vm958_vm1, %v6416_v23, %v6415_v48  ;;  %v6417_v48 = vrot.slane %v4796_v29, 7  ;;  %v942_v23 = vrot.slane %v4833_v22, 7 }
  0x8a   : > { %4124 = vrot.lane.b32.xlu1 %v4953_v38, %s4210_s25  ;;  %v450_v38 = vadd.s32 16, %v4258_v1 }
  0x8b   : > { %v5309_v44 = vsel %vm958_vm1, %v942_v23, %v6541_v13  ;;  %v5315_v22 = vsel %vm958_vm1, %v6417_v48, %v942_v23  ;;  %v6546_v13 = vld [vmem:[#allocation5_spill] sm:$0xff] }
  0x8c   : > { %6542 = vst [vmem:[#allocation7_spill] sm:$0xff] %v5309_v44  ;;  %6543 = vst [vmem:[#allocation9_spill] sm:$0xff] %v5315_v22  ;;  %v5332_v36 = vrot.slane %v6546_v13, 7  ;;  %v498_v48 = vand.u32 15, %v450_v38  ;;  %v484_v13 = vand.u32 15, %v4258_v1  ;;  %v6570_v44 = vsel %vm5135_vm7, %v5122_v52, 0.0 }
  0x8d   : > { %4129 = vrot.lane.b32.xlu0 %v4962_v19, %s4210_s25 }
  0x8e   : > { %v5286_v33 = vpop.permute.xlu0 %3864  ;;  %4134 = vrot.lane.b32.xlu1 %v4959_v0, %s4210_s25  ;;  %6547 = vst [vmem:[#allocation33_spill] sm:$0xff] %v5332_v36  ;;  %vm5379_vm13 = vcmp.ge.s32.totalorder %v498_v48, 1  ;;  %v1613_v48 = vsel %vm5006_vm3, %v5042_v30, 0.0  ;;  %vm5398_vm14 = vcmp.ge.s32.totalorder %v484_v13, 1  ;;  %v6564_v13 = vrot.slane %v6512_v42, 7 }
  0x8f   : > { %v5296_v19 = vunpack.i.l.bf16 %v5286_v33  ;;  %v5299_v46 = vpop.permute.xlu1 %3874  ;;  %v6560_v58 = vsel %vm5398_vm14, 4294967295, %v6559_v58  ;;  %v3867_v42 = vunpack.i.h.bf16 %v5286_v33 }
  0x90   : > { %6561 = vst [vmem:[#allocation20_spill] sm:$0xff] %v6560_v58  ;;  %v3877_v33 = vunpack.i.h.bf16 %v5299_v46 }
  0x91   : > { %4139 = vrot.lane.b32.xlu0 %v4980_v34, %s4210_s25  ;;  %v5325_v11 = vsel %vm1496_vm12, %v1072_v28, %v5296_v19  ;;  %v5329_v0 = vsel %vm1496_vm12, %v2399_v53, %v5296_v19  ;;  %v5347_v53 = vadd.s32 32, %v4258_v1  ;;  %v6550_v34 = vsel %vm5032_vm4, %v5042_v30, 0.0 }
  0x92   : > { %6544 = vst [vmem:[#allocation8_spill] sm:$0xff] %v5325_v11  ;;  %6545 = vst [vmem:[#allocation32_spill] sm:$0xff] %v5329_v0  ;;  %v5334_v23 = vpop.permute.xlu0 %3869  ;;  %4144 = vrot.lane.b32.xlu1 %v4977_v32, %s4210_s25  ;;  %v6548_v32 = vsel %vm5049_vm5, %v5042_v30, 0.0  ;;  %v6563_v30 = vrot.slane %v6514_v5, 7 }
  0x93   : > { %v5342_v28 = vunpack.i.l.bf16 %v5334_v23  ;;  %v5344_v17 = vpop.permute.xlu1 %3879 }
  0x94   : > { %v3882_v61 = vunpack.i.h.bf16 %v5344_v17 }
  0x95   : > { %4149 = vrot.lane.b32.xlu0 %v5019_v60, %s4210_s25  ;;  %v5361_v38 = vsel %vm1496_vm12, %v6548_v32, %v5342_v28  ;;  %v5369_v49 = vsel %vm1496_vm12, %v6550_v34, %v5342_v28  ;;  %v6553_v60 = vrot.slane %v6508_v20, 7  ;;  %v6557_v34 = vrot.slane %v4343_v50, 7 }
  0x96   : > { %6549 = vst [vmem:[#allocation29_spill] sm:$0xff] %v5361_v38  ;;  %6551 = vst [vmem:[#allocation18_spill] sm:$0xff] %v5369_v49  ;;  %4154 = vrot.lane.b32.xlu1 %v5011_v57, %s4210_s25  ;;  %v6556_v38 = vrot.slane %v6511_v39, 7  ;;  %v6558_v49 = vld [vmem:[#allocation13_spill] sm:$0xff]  ;;  %v6562_v39 = vrot.slane %v6552_v2, 7 }
  0x97   : > { %v5377_v0 = vsel %vm958_vm1, %v6553_v60, %v5332_v36  ;;  %v2418_v20 = vsel %vm1116_vm0, 0.0, %v6558_v49  ;;  %vm1529_vm0 = vcmask 523264  }
  0x98   : > { %v969_v11 = vsel %vm958_vm1, %v6557_v34, %v6556_v38  ;;  %v3885_v57 = vpop.permute.xlu0 %3884  ;;  %v5410_v49 = vsel %vm958_vm1, %v5332_v36, %v6562_v39  ;;  %v967_v38 = vsel %vm958_vm1, %v6564_v13, %v6563_v30  ;;  %v1615_v34 = vsel %vm5049_vm5, %v5099_v10, 0.0 }
  0x99   : > { %4159 = vrot.lane.b32.xlu0 %v5087_v3, %s4210_s25  ;;  %v3886_v60 = vunpack.i.l.bf16 %v3885_v57  ;;  %v5423_v50 = vpop.permute.xlu1 %3889  ;;  %v5429_v3 = vadd.s32 48, %v4258_v1  ;;  %v2450_v5 = vsel %vm6521_vm8, %v2418_v20, 0.0  ;;  %v6565_v30 = vsel %vm5112_vm6, %v5099_v10, 0.0  ;;  %v6574_v20 = vld [vmem:[#allocation12_spill] sm:$0xff] }
  0x9a   : > { %v5426_v39 = vunpack.i.l.bf16 %v5423_v50  ;;  %4164 = vrot.lane.b32.xlu1 %v5076_v25, %s4210_s25  ;;  %v6567_v36 = vsel %vm5006_vm3, %v5099_v10, 0.0 }
  0x9b   : > { %v5441_v13 = vsel %vm1496_vm12, %v6565_v30, %v3886_v60  ;;  %v5448_v41 = vsel %vm1496_vm12, %v6567_v36, %v3886_v60 }
  0x9c   : > { %6566 = vst [vmem:[#allocation16_spill] sm:$0xff] %v5441_v13  ;;  %6568 = vst [vmem:[#allocation10_spill] sm:$0xff] %v5448_v41  ;;  %v5459_v30 = vsel %vm1496_vm12, %v6570_v44, %v5426_v39  ;;  %v5467_v10 = vsel %vm1496_vm12, %v6572_v40, %v5426_v39  ;;  %v3905_v36 = vpop.permute.xlu0 %3904  ;;  %v6575_v41 = vmov 0.0   ;;  %v1595_v44 = vsel %vm5398_vm14, %v5173_v54, 0.0  ;;  %v6577_v54 = vld [vmem:[#allocation15_spill] sm:$0xff] }
  0x9d   : > { %6571 = vst [vmem:[#allocation28_spill] sm:$0xff] %v5459_v30  ;;  %6573 = vst [vmem:[#allocation30_spill] sm:$0xff] %v5467_v10  ;;  %4169 = vrot.lane.b32.xlu0 %v5156_v14, %s4210_s25  ;;  %v5472_v13 = vpop.permute.xlu1 %3894  ;;  %v4178_v29 = vpack.i.bf16 %v2450_v5, %v6575_v41  ;;  %v3872_v40 = vunpack.i.h.bf16 %v5334_v23  ;;  %v526_v30 = vand.u32 15, %v5429_v3  ;;  %v6576_v14 = vld [vmem:[#allocation14_spill] sm:$0xff]  ;;  %v3907_v25 = vunpack.i.h.bf16 %v3905_v36 }
  0x9e   : > { %v934_v10 = vrot.slane %v6576_v14, 7  ;;  %4174 = vrot.lane.b32.xlu1 %v5148_v9, %s4210_s25  ;;  %v3906_v41 = vunpack.i.l.bf16 %v3905_v36  ;;  %v5488_v5 = vsel %vm1496_vm12, %v5184_v4, %v3867_v42  ;;  %v5494_v23 = vsel %vm1496_vm12, %v5165_v55, %v3877_v33 }
  0x9f   : > { %v6578_v3 = vunpack.i.l.bf16 %v5299_v46  ;;  %v1816_v9 = vsel %vm1496_vm12, %v1611_v6, %v5296_v19  ;;  %v5502_v36 = vunpack.i.l.bf16 %v5344_v17  ;;  %v3887_v4 = vunpack.i.h.bf16 %v3885_v57 }
  0xa0   : > { %v3910_v8 = vpop.permute.xlu0 %3909  ;;  %v5506_v22 = vsel %vm1496_vm12, %v969_v11, %v3872_v40  ;;  %v1818_v55 = vsel %vm1496_vm12, %v1613_v48, %v5342_v28  ;;  %v6579_v28 = vrot.slane %v6574_v20, 7  ;;  %vm5558_vm3 = vcmp.ge.s32.totalorder %v526_v30, 1 }
  0xa1   : > { %v1800_v14 = vsel %vm1496_vm12, %v1595_v44, %v6578_v3  ;;  %4179 = vrot.lane.b32.xlu0 %v4178_v29, %s4210_s25  ;;  %v3900_v42 = vpop.permute.xlu1 %3899  ;;  %v3912_v58 = vunpack.i.h.bf16 %v3910_v8  ;;  %v3911_v21 = vunpack.i.l.bf16 %v3910_v8  ;;  %v1850_v3 = vsel %vm1529_vm0, %v1818_v55, %v3906_v41 }
  0xa2   : > { %v3902_v33 = vunpack.i.h.bf16 %v3900_v42  ;;  %v3901_v44 = vunpack.i.l.bf16 %v3900_v42  ;;  %v1851_v17 = vsel %vm1529_vm0, %v5506_v22, %v3907_v25  ;;  %v5523_v48 = vsel %vm958_vm1, %v6579_v28, %v934_v10  ;;  %v4192_v28 = vld [vmem:[%s6351_s3 + $0x80] sm:$0xff]  }
  0xa3   : > { %v1832_v19 = vsel %vm1529_vm0, %v1800_v14, %v3911_v21  ;;  %v1833_v29 = vsel %vm1529_vm0, %v5494_v23, %v3912_v58  ;;  %v5526_v25 = vsel %vm1496_vm12, %v967_v38, %v3887_v4  ;;  %v1820_v14 = vsel %vm1496_vm12, %v1615_v34, %v3886_v60 }
  0xa4   : > { %v3920_v57 = vpop.permute.xlu0 %3919  ;;  %v1864_v8 = vpack.c.bf16 %v1833_v29, %v1832_v19  ;;  %v1848_v11 = vsel %vm1529_vm0, %v1816_v9, %v3901_v44  ;;  %v1849_v6 = vsel %vm1529_vm0, %v5488_v5, %v3902_v33  ;;  %v1873_v42 = vpack.c.bf16 %v1851_v17, %v1850_v3  ;;  %v4191_v33 = vld [vmem:[%s6351_s3 + $0x20] sm:$0xff]  }
  0xa5   : > { %v3915_v21 = vpop.permute.xlu1 %3914  ;;  %v3922_v40 = vunpack.i.h.bf16 %v3920_v57  ;;  %v3921_v41 = vunpack.i.l.bf16 %v3920_v57  ;;  %v1872_v58 = vpack.c.bf16 %v1849_v6, %v1848_v11  ;;  %v5535_v44 = vsel %vm1496_vm12, %v5410_v49, %v3882_v61  ;;  %v6585_v6 = vld [vmem:[#allocation25_spill] sm:$0xff] }
  0xa6   : > { %v3917_v9 = vunpack.i.h.bf16 %v3915_v21  ;;  %v3916_v55 = vunpack.i.l.bf16 %v3915_v21  ;;  %3720 = vmatprep.mubr.msk.bf16.mxu0 %vm1928_vm15, %v1864_v8  ;;  %v6580_v38 = vsel %vm5379_vm13, %v5377_v0, 0.0  ;;  %v3892_v3 = vunpack.i.h.bf16 %v5423_v50 }
  0xa7   : > { %v1802_v60 = vsel %vm1496_vm12, %v6580_v38, %v5502_v36  ;;  %v1853_v34 = vsel %vm1529_vm0, %v5526_v25, %v3922_v40  ;;  %v1852_v4 = vsel %vm1529_vm0, %v1820_v14, %v3921_v41  ;;  %3736 = vmatprep.mubr.msk.bf16.mxu1 %vm1928_vm15, %v1872_v58  ;;  %v6581_v19 = vrot.slane %v6526_v59, 7  ;;  %v4193_v41 = vld [vmem:[%s6351_s3 + $0x18] sm:$0xff]  }
  0xa8   : > { %v1834_v17 = vsel %vm1529_vm0, %v1802_v60, %v3916_v55  ;;  %v1835_v49 = vsel %vm1529_vm0, %v5535_v44, %v3917_v9  ;;  %v1874_v61 = vpack.c.bf16 %v1853_v34, %v1852_v4  ;;  %3737 = vmatmul.mubr.msk.bf16.vlgmr.msra.gmra.mxu1 %vm1928_vm15, %v1873_v42  ;;  %v6582_v29 = vrot.slane %v6513_v43, 7 }
  0xa9   : > { %v1865_v50 = vpack.c.bf16 %v1835_v49, %v1834_v17  ;;  %v3930_v11 = vpop.permute.xlu1 %3929  ;;  %3753 = vmatpush3.bf16.msra.mxu1 %v6585_v6  ;;  %v6586_v21 = vrot.slane %v6577_v54, 7  ;;  %v1601_v59 = vsel %vm5558_vm3, %v5523_v48, 0.0  ;;  %v6587_v58 = vand.u32 15, %v5347_v53  ;;  %v6594_v17 = vld [vmem:[#allocation26_spill] sm:$0xff] }
  0xaa   : > { %v965_v57 = vsel %vm958_vm1, %v6582_v29, %v6581_v19  ;;  %v3932_v30 = vunpack.i.h.bf16 %v3930_v11  ;;  %v5573_v40 = vunpack.i.l.bf16 %v3930_v11  ;;  %3740 = vmatprep.mubr.msk.bf16.mxu1 %vm1928_vm15, %v1874_v61  ;;  %3754 = vmatprep.subr.bf16.mxu1 %v4191_v33  ;;  %v6590_v55 = vrot.slane %v6574_v20, 7  ;;  %v4195_v11 = vld [vmem:[%s6351_s3 + $0x10] sm:$0xff]  }
  0xab   : > { %v981_v43 = vsel %vm958_vm1, %v934_v10, %v6586_v21  ;;  %vm5581_vm5 = vcmp.ge.s32.totalorder %v6587_v58, 1  ;;  %v1617_v10 = vsel %vm5112_vm6, %v5122_v52, 0.0  ;;  %v3925_v42 = vpop.permute.xlu0 %3924  ;;  %3721 = vmatmul.mubr.msk.bf16.vlgmr.msra.gmra.mxu0 %vm1928_vm15, %v1865_v50  ;;  %v5590_v9 = vsel %vm1496_vm12, %v965_v57, %v3892_v3 }
  0xac   : > { %v6591_v38 = vrot.slane %v6569_v63, 7  ;;  %v6593_v34 = vrot.slane %v6552_v2, 7  ;;  %v3897_v4 = vunpack.i.h.bf16 %v5472_v13  ;;  %3797 = vmatpush3.bf16.msra.mxu0 %v6594_v17  ;;  %v5609_v3 = vsel %vm1496_vm12, %v981_v43, %v3932_v30  ;;  %v4194_v2 = vld [vmem:[%s6351_s3 + $0x78] sm:$0xff]  }
  0xad   : > { %v1806_v20 = vsel %vm1496_vm12, %v1601_v59, %v5573_v40  ;;  %v3927_v49 = vunpack.i.h.bf16 %v3925_v42  ;;  %v3926_v61 = vunpack.i.l.bf16 %v3925_v42  ;;  %v3940_v19 = vpop.permute.xlu1 %3939  ;;  %3755 = vmatpush3.bf16.msra.mxu1 %v4191_v33  ;;  %3798 = vmatprep.subr.bf16.mxu0 %v4192_v28  ;;  %v1822_v63 = vsel %vm1496_vm12, %v1617_v10, %v5426_v39 }
  0xae   : > { %v983_v53 = vsel %vm958_vm1, %v6591_v38, %v6590_v55  ;;  %v6592_v60 = vmov %v6591_v38  ;;  %v5619_v29 = vunpack.i.l.bf16 %v5472_v13  ;;  %v3942_v57 = vunpack.i.h.bf16 %v3940_v19  ;;  %3756 = vmatprep.subr.bf16.mxu1 %v4193_v41  ;;  %v4196_v38 = vld [vmem:[%s6351_s3 + $0x70] sm:$0xff]  }
  0xaf   : > { %v5604_v52 = vsel %vm958_vm1, %v6593_v34, %v6592_v60  ;;  %v3941_v50 = vunpack.i.l.bf16 %v3940_v19  ;;  %v456_v6 = vadd.s32 64, %v4258_v1  ;;  %v1855_v21 = vsel %vm1529_vm0, %v5590_v9, %v3927_v49  ;;  %v3935_v13 = vpop.permute.xlu0 %3934 }
  0xb0   : > { %v1599_v33 = vsel %vm5581_vm5, %v5604_v52, 0.0  ;;  %v1854_v39 = vsel %vm1529_vm0, %v1822_v63, %v3926_v61  ;;  %v1839_v30 = vsel %vm1529_vm0, %v5609_v3, %v3942_v57  ;;  %v3937_v58 = vunpack.i.h.bf16 %v3935_v13  ;;  %3799 = vmatpush3.bf16.msra.mxu0 %v4192_v28 }
  0xb1   : > { %v1875_v43 = vpack.c.bf16 %v1855_v21, %v1854_v39  ;;  %v1838_v59 = vsel %vm1529_vm0, %v1806_v20, %v3941_v50  ;;  %v5635_v10 = vsel %vm1496_vm12, %v983_v53, %v3897_v4  ;;  %v3936_v42 = vunpack.i.l.bf16 %v3935_v13  ;;  %v5637_v55 = vpop.permute.xlu1 %3949  ;;  %3757 = vmatpush3.bf16.msra.mxu1 %v4193_v41  ;;  %3800 = vmatprep.subr.bf16.mxu0 %v4194_v2  ;;  %v4197_v41 = vld [vmem:[%s6351_s3 + $0x8] sm:$0xff]  }
  0xb2   : > { %v1804_v60 = vsel %vm1496_vm12, %v1599_v33, %v5619_v29  ;;  %v1837_v34 = vsel %vm1529_vm0, %v5635_v10, %v3937_v58  ;;  %v5648_v28 = vunpack.i.l.bf16 %v5637_v55  ;;  %v458_v53 = vadd.s32 80, %v4258_v1  ;;  %3758 = vmatprep.subr.bf16.mxu1 %v4195_v11  ;;  %v4198_v13 = vld [vmem:[%s6351_s3 + $0x68] sm:$0xff]  }
  0xb3   : > { %3741 = vmatmul.mubr.msk.bf16.gmra.mxu1 %vm1928_vm15, %v1875_v43  ;;  %v1867_v4 = vpack.c.bf16 %v1839_v30, %v1838_v59  ;;  %v1836_v17 = vsel %vm1529_vm0, %v1804_v60, %v3936_v42  ;;  %v3945_v20 = vpop.permute.xlu0 %3944  ;;  %v540_v49 = vand.u32 15, %v456_v6  ;;  %v6595_v19 = vsel %vm5209_vm9, %v5203_v45, 0.0  ;;  %v6598_v6 = vld [vmem:[#allocation17_spill] sm:$0xff]  ;;  %v4199_v42 = vld [vmem:[%s6351_s3] sm:$0xff]  }
  0xb4   : > { %v1866_v61 = vpack.c.bf16 %v1837_v34, %v1836_v17  ;;  %v5661_v63 = vsel %vm1496_vm12, %v6595_v19, %v5648_v28  ;;  %3801 = vmatpush3.bf16.msra.mxu0 %v4194_v2  ;;  %v6597_v57 = vsel %vm5135_vm7, %v5203_v45, 0.0  ;;  %v3946_v33 = vunpack.i.l.bf16 %v3945_v20  ;;  %v6603_v34 = vld [vmem:[#allocation21_spill] sm:$0xff] }
  0xb5   : > { %6596 = vst [vmem:[#allocation19_spill] sm:$0xff] %v5661_v63  ;;  %v5669_v50 = vsel %vm1496_vm12, %v6597_v57, %v5648_v28  ;;  %v936_v21 = vrot.slane %v6598_v6, 7  ;;  %v5672_v39 = vpop.permute.xlu1 %3959  ;;  %3759 = vmatpush3.bf16.msra.mxu1 %v4195_v11  ;;  %3802 = vmatprep.subr.bf16.mxu0 %v4196_v38  ;;  %v6599_v2 = vrot.slane %v6524_v24, 7  ;;  %v6600_v43 = vrot.slane %v6525_v27, 7 }
  0xb6   : > { %v1619_v30 = vsel %vm5135_vm7, %v5227_v18, 0.0  ;;  %v3947_v58 = vunpack.i.h.bf16 %v3945_v20  ;;  %3724 = vmatprep.mubr.msk.bf16.mxu0 %vm1928_vm15, %v1866_v61  ;;  %v554_v11 = vand.u32 15, %v458_v53  ;;  %3760 = vmatprep.subr.bf16.mxu1 %v4197_v41  ;;  %v6601_v24 = vsel %vm5205_vm2, %v5227_v18, 0.0  ;;  %v6604_v20 = vld [vmem:[#allocation22_spill] sm:$0xff] }
  0xb7   : > { %v963_v59 = vsel %vm958_vm1, %v6600_v43, %v6599_v2  ;;  %v5695_v27 = vsel %vm1496_vm12, %v6601_v24, %v3946_v33  ;;  %v5702_v60 = vsel %vm1496_vm12, %v6602_v16, %v3946_v33  ;;  %3725 = vmatmul.mubr.msk.bf16.gmra.mxu0 %vm1928_vm15, %v1867_v4  ;;  %v937_v53 = vrot.slane %v6603_v34, 7  ;;  %v3955_v17 = vpop.permute.xlu0 %3954  ;;  %v6610_v24 = vld [vmem:[#allocation23_spill] sm:$0xff] }
  0xb8   : > { %v938_v61 = vrot.slane %v6604_v20, 7  ;;  %vm5707_vm7 = vcmp.ge.s32.totalorder %v540_v49, 1  ;;  %v6607_v57 = vrot.slane %v6533_v51, 7  ;;  %v1621_v4 = vsel %vm5205_vm2, %v5203_v45, 0.0  ;;  %3803 = vmatpush3.bf16.msra.mxu0 %v4196_v38 }
  0xb9   : > { %v6609_v6 = vrot.slane %v6577_v54, 7  ;;  %v3957_v2 = vunpack.i.h.bf16 %v3955_v17  ;;  %v3956_v43 = vunpack.i.l.bf16 %v3955_v17  ;;  %v939_v51 = vrot.slane %v6610_v24, 7  ;;  %3761 = vmatpush3.bf16.msra.mxu1 %v4197_v41  ;;  %3804 = vmatprep.subr.bf16.mxu0 %v4198_v13 }
  0xba   : > { %v961_v18 = vsel %vm958_vm1, %v6608_v7, %v6607_v57  ;;  %v3952_v16 = vunpack.i.h.bf16 %v5637_v55  ;;  %v5732_v45 = vsel %vm1496_vm12, %v963_v59, %v3947_v58  ;;  %v1824_v54 = vsel %vm1496_vm12, %v1619_v30, %v3946_v33  ;;  %3762 = vmatprep.subr.bf16.mxu1 %v4199_v42  ;;  %v3970_v59 = vpop.permute.xlu1 %3969 }
  0xbb   : > { %v5724_v49 = vsel %vm958_vm1, %v6609_v6, %v936_v21  ;;  %vm5735_vm6 = vcmp.ge.s32.totalorder %v554_v11, 1  ;;  %v979_v41 = vsel %vm958_vm1, %v936_v21, %v937_v53  ;;  %v1856_v34 = vsel %vm1529_vm0, %v1824_v54, %v3956_v43  ;;  %v3965_v58 = vpop.permute.xlu0 %3964 }
  0xbc   : > { %v1857_v17 = vsel %vm1529_vm0, %v5732_v45, %v3957_v2  ;;  %v5746_v55 = vsel %vm958_vm1, %v937_v53, %v938_v61  ;;  %v1603_v33 = vsel %vm5707_vm7, %v5724_v49, 0.0  ;;  %v3962_v30 = vunpack.i.h.bf16 %v5672_v39  ;;  %3805 = vmatpush3.bf16.msra.mxu0 %v4198_v13 }
  0xbd   : > { %v5753_v11 = vunpack.i.l.bf16 %v5672_v39  ;;  %v1876_v21 = vpack.c.bf16 %v1857_v17, %v1856_v34  ;;  %v3972_v20 = vunpack.i.h.bf16 %v3970_v59  ;;  %v5755_v57 = vunpack.i.l.bf16 %v3970_v59  ;;  %3763 = vmatpush3.bf16.msra.mxu1 %v4199_v42  ;;  %3806 = vmatprep.subr.bf16.mxu0 %v4200_v31 }
  0xbe   : > { %v3967_v7 = vunpack.i.h.bf16 %v3965_v58  ;;  %v3966_v6 = vunpack.i.l.bf16 %v3965_v58  ;;  %v5758_v53 = vsel %vm1496_vm12, %v961_v18, %v3952_v16  ;;  %v1826_v2 = vsel %vm1496_vm12, %v1621_v4, %v5648_v28 }
  0xbf   : > { %v977_v39 = vsel %vm958_vm1, %v938_v61, %v939_v51  ;;  %v1605_v13 = vsel %vm5735_vm6, %v5746_v55, 0.0  ;;  %3744 = vmatprep.mubr.msk.bf16.mxu1 %vm1928_vm15, %v1876_v21  ;;  %v3975_v43 = vpop.permute.xlu0 %3974  ;;  %v5774_v4 = vsel %vm1496_vm12, %v979_v41, %v3962_v30  ;;  %v1808_v61 = vsel %vm1496_vm12, %v1603_v33, %v5753_v11 }
  0xc0   : > { %v1859_v42 = vsel %vm1529_vm0, %v5758_v53, %v3967_v7  ;;  %v1858_v18 = vsel %vm1529_vm0, %v1826_v2, %v3966_v6  ;;  %v3977_v54 = vunpack.i.h.bf16 %v3975_v43  ;;  %v3976_v28 = vunpack.i.l.bf16 %v3975_v43  ;;  %3807 = vmatpush3.bf16.msra.mxu0 %v4200_v31  ;;  %v3980_v59 = vpop.permute.xlu1 %3979 }
  0xc1   : > { %v1877_v16 = vpack.c.bf16 %v1859_v42, %v1858_v18  ;;  %v5779_v34 = vsel %vm1496_vm12, %v977_v39, %v3972_v20  ;;  %v1810_v17 = vsel %vm1496_vm12, %v1605_v13, %v5755_v57  ;;  %v3982_v58 = vunpack.i.h.bf16 %v3980_v59 }
  0xc2   : > { %v3981_v21 = vunpack.i.l.bf16 %v3980_v59  ;;  %v1841_v7 = vsel %vm1529_vm0, %v5774_v4, %v3977_v54  ;;  %v1840_v31 = vsel %vm1529_vm0, %v1808_v61, %v3976_v28  ;;  %v460_v41 = vadd.s32 96, %v4258_v1 }
  0xc3   : > { %3745 = vmatmul.mubr.msk.bf16.gmra.mxu1 %vm1928_vm15, %v1877_v16  ;;  %v1868_v30 = vpack.c.bf16 %v1841_v7, %v1840_v31  ;;  %v3985_v33 = vpop.permute.xlu0 %3984  ;;  %v1843_v6 = vsel %vm1529_vm0, %v5779_v34, %v3982_v58  ;;  %v6613_v43 = vrot.slane %v6534_v26, 7  ;;  %v6614_v54 = vsel %vm5263_vm11, %v5276_v35, 0.0 }
  0xc4   : > { %v1842_v20 = vsel %vm1529_vm0, %v1810_v17, %v3981_v21  ;;  %v3986_v2 = vunpack.i.l.bf16 %v3985_v33  ;;  %v3990_v13 = vpop.permute.xlu1 %3989  ;;  %v3987_v42 = vunpack.i.h.bf16 %v3985_v33  ;;  %v568_v61 = vand.u32 15, %v460_v41  ;;  %v6619_v41 = vld [vmem:[#allocation27_spill] sm:$0xff] }
  0xc5   : > { %v1869_v39 = vpack.c.bf16 %v1843_v6, %v1842_v20  ;;  %3728 = vmatprep.mubr.msk.bf16.mxu0 %vm1928_vm15, %v1868_v30  ;;  %v3991_v18 = vunpack.i.l.bf16 %v3990_v13  ;;  %v959_v16 = vsel %vm958_vm1, %v6613_v43, %v5242_v56  ;;  %v1623_v17 = vsel %vm5209_vm9, %v5276_v35, 0.0 }
  0xc6   : > { %v5802_v28 = vsel %vm1496_vm12, %v6614_v54, %v3986_v2  ;;  %v6616_v59 = vsel %vm5205_vm2, %v5276_v35, 0.0  ;;  %v3992_v21 = vunpack.i.h.bf16 %v3990_v13  ;;  %v6617_v7 = vsel %vm5209_vm9, %v5254_v15, 0.0 }
  0xc7   : > { %6615 = vst [vmem:[#allocation24_spill] sm:$0xff] %v5802_v28  ;;  %v5812_v26 = vsel %vm1496_vm12, %v6616_v59, %v3986_v2  ;;  %3729 = vmatmul.mubr.msk.bf16.gmra.mxu0 %vm1928_vm15, %v1869_v39  ;;  %v3995_v58 = vpop.permute.xlu0 %3994  ;;  %v5820_v31 = vsel %vm1496_vm12, %v6617_v7, %v3991_v18  ;;  %v940_v30 = vrot.slane %v6619_v41, 7  ;;  %v5824_v12 = vsel %vm1496_vm12, %v959_v16, %v3987_v42 }
  0xc8   : > { %6618 = vst [vmem:[#allocation5_spill] sm:$0xff] %v5820_v31  ;;  %v3997_v33 = vunpack.i.h.bf16 %v3995_v58  ;;  %v4000_v35 = vpop.permute.xlu1 %3999  ;;  %v3996_v20 = vunpack.i.l.bf16 %v3995_v58  ;;  %v1625_v6 = vsel %vm5263_vm11, %v5254_v15, 0.0  ;;  %v1828_v39 = vsel %vm1496_vm12, %v1623_v17, %v3986_v2  ;;  %v6623_v2 = vld [vmem:[#allocation9_spill] sm:$0xff] }
  0xc9   : > { %vm5832_vm8 = vcmp.ge.s32.totalorder %v568_v61, 1  ;;  %v5839_v42 = vsel %vm1496_vm12, %v5248_v47, %v3992_v21  ;;  %v5845_v15 = vsel %vm958_vm1, %v939_v51, %v940_v30  ;;  %v1609_v61 = vsel %vm5259_vm10, %v6623_v2, 0.0 }
  0xca   : > { %v1861_v37 = vsel %vm1529_vm0, %v5824_v12, %v3997_v33  ;;  %v1860_v43 = vsel %vm1529_vm0, %v1828_v39, %v3996_v20  ;;  %6622 = vst [vmem:[#allocation6_spill] sm:$0xff] %v5839_v42  ;;  %v989_v17 = vsel %vm958_vm1, %v5242_v56, 0.0  ;;  %v1830_v59 = vsel %vm1496_vm12, %v1625_v6, %v3991_v18  ;;  %v6625_v20 = vld [vmem:[#allocation31_spill] sm:$0xff] }
  0xcb   : > { %v4005_v54 = vpop.permute.xlu0 %4004  ;;  %v1878_v58 = vpack.c.bf16 %v1861_v37, %v1860_v43  ;;  %v4002_v41 = vunpack.i.h.bf16 %v4000_v35  ;;  %v5854_v24 = vunpack.i.l.bf16 %v4000_v35  ;;  %v6626_v39 = vrot.slane %v6625_v20, 7  ;;  %v6627_v37 = vld [vmem:[#allocation7_spill] sm:$0xff] }
  0xcc   : > { %v4010_v7 = vpop.permute.xlu1 %4009  ;;  %v4007_v47 = vunpack.i.h.bf16 %v4005_v54  ;;  %v4006_v21 = vunpack.i.l.bf16 %v4005_v54  ;;  %v1607_v56 = vsel %vm5832_vm8, %v5845_v15, 0.0 }
  0xcd   : > { %v4012_v33 = vunpack.i.h.bf16 %v4010_v7  ;;  %v5856_v51 = vunpack.i.l.bf16 %v4010_v7  ;;  %v975_v31 = vsel %vm958_vm1, %v940_v30, %v6626_v39  ;;  %3748 = vmatprep.mubr.msk.bf16.mxu1 %vm1928_vm15, %v1878_v58  ;;  %v1054_v7 = vsel %vm5398_vm14, %v989_v17, 0.0 }
  0xce   : > { %v1863_v18 = vsel %vm1529_vm0, %v5839_v42, %v4007_v47  ;;  %v1862_v6 = vsel %vm1529_vm0, %v1830_v59, %v4006_v21  ;;  %v5878_v47 = vsel %vm1496_vm12, %v975_v31, %v4002_v41  ;;  %v1812_v59 = vsel %vm1496_vm12, %v1607_v56, %v5854_v24 }
  0xcf   : > { %v4015_v35 = vpop.permute.xlu0 %4014  ;;  %v5871_v43 = vsel %vm1496_vm12, %v6627_v37, %v4012_v33  ;;  %v1814_v30 = vsel %vm1496_vm12, %v1609_v61, %v5856_v51  ;;  %v1879_v20 = vpack.c.bf16 %v1863_v18, %v1862_v6  ;;  %v6629_v33 = vld [vmem:[#allocation3_spill] sm:$0xff]  ;;  %v6630_v6 = vld [vmem:[#allocation33_spill] sm:$0xff] }
  0xd0   : > { %v4020_v39 = vpop.permute.xlu1 %4019  ;;  %v4017_v28 = vunpack.i.h.bf16 %v4015_v35  ;;  %v4016_v63 = vunpack.i.l.bf16 %v4015_v35  ;;  %v988_v37 = vsel %vm958_vm1, 0.0, %v6629_v33  ;;  %v2384_v31 = vsel %vm958_vm1, 0.0, %v6630_v6 }
  0xd1   : > { %v4022_v58 = vunpack.i.h.bf16 %v4020_v39  ;;  %v4021_v21 = vunpack.i.l.bf16 %v4020_v39  ;;  %3749 = vmatmul.mubr.msk.bf16.gmra.mxu1 %vm1928_vm15, %v1879_v20  ;;  %v6633_v6 = vunpack.i.l.bf16 %v5299_v46  ;;  %vm3076_vm1 = vcmask 257024  }
  0xd2   : > { %v1845_v17 = vsel %vm1529_vm0, %v5878_v47, %v4017_v28  ;;  %v1844_v61 = vsel %vm1529_vm0, %v1812_v59, %v4016_v63  ;;  %v6631_v63 = vld [vmem:[#allocation4_spill] sm:$0xff] }
  0xd3   : > { %v1276_v18 = vpop.permute.xlu0 %1275  ;;  %v1846_v41 = vsel %vm1529_vm0, %v1814_v30, %v4021_v21  ;;  %v1847_v56 = vsel %vm1529_vm0, %v5871_v43, %v4022_v58  ;;  %v1870_v35 = vpack.c.bf16 %v1845_v17, %v1844_v61  ;;  %v6632_v20 = vsel %vm5263_vm11, %v6631_v63, 0.0 }
  0xd4   : > { %v1871_v39 = vpack.c.bf16 %v1847_v56, %v1846_v41  ;;  %v4025_v33 = vpop.permute.xlu1 %4024  ;;  %v1497_v42 = vsel %vm1496_vm12, %v1054_v7, %v1276_v18  ;;  %v5897_v28 = vsel %vm1496_vm12, 0.0, %v1276_v18  ;;  %v5904_v1 = vsel %vm1496_vm12, %v6632_v20, %v1276_v18 }
  0xd5   : > { %v1056_v30 = vsel %vm5379_vm13, %v988_v37, 0.0  ;;  %v4027_v59 = vunpack.i.h.bf16 %v4025_v33  ;;  %v4026_v58 = vunpack.i.l.bf16 %v4025_v33  ;;  %3732 = vmatprep.mubr.msk.bf16.mxu0 %vm1928_vm15, %v1870_v35  ;;  %v2385_v7 = vsel %vm5398_vm14, %v2384_v31, 0.0 }
  0xd6   : > { %3733 = vmatmul.mubr.msk.bf16.gmra.mxu0 %vm1928_vm15, %v1871_v39  ;;  %v1499_v37 = vsel %vm1496_vm12, %v1056_v30, %v6633_v6  ;;  %v2387_v41 = vsel %vm5379_vm13, %v5604_v52, 0.0  ;;  %v1058_v33 = vsel %vm5581_vm5, %v5377_v0, 0.0  ;;  %v2579_v46 = vsel %vm1496_vm12, %v2385_v7, %v5502_v36 }
  0xd7   : > { %v4030_v21 = vpop.permute.xlu0 %4029  ;;  %v1530_v62 = vsel %vm1529_vm0, %v1497_v42, %v4026_v58  ;;  %v1531_v17 = vsel %vm1529_vm0, %v5897_v28, %v4027_v59  ;;  %v2581_v0 = vsel %vm1496_vm12, %v2387_v41, %v5619_v29  ;;  %v1501_v6 = vsel %vm1496_vm12, %v1058_v33, %v5502_v36 }
  0xd8   : > { %v4032_v61 = vunpack.i.h.bf16 %v4030_v21  ;;  %v4031_v18 = vunpack.i.l.bf16 %v4030_v21  ;;  %v1562_v54 = vpack.c.bf16 %v1531_v17, %v1530_v62  ;;  %v4035_v31 = vpop.permute.xlu1 %4034  ;;  %v2391_v36 = vsel %vm5558_vm3, %v5724_v49, 0.0 }
  0xd9   : > { %v4037_v56 = vunpack.i.h.bf16 %v4035_v31  ;;  %v4036_v35 = vunpack.i.l.bf16 %v4035_v31 }
  0xda   : > { %v1532_v39 = vsel %vm1529_vm0, %v1499_v37, %v4031_v18  ;;  %v1533_v42 = vsel %vm1529_vm0, %v5494_v23, %v4032_v61  ;;  %3764 = vmatprep.mubr.msk.bf16.mxu1 %vm1928_vm15, %v1562_v54  ;;  %v1060_v23 = vsel %vm5558_vm3, %v5604_v52, 0.0  ;;  %v2389_v52 = vsel %vm5581_vm5, %v5523_v48, 0.0 }
  0xdb   : > { %v1563_v63 = vpack.c.bf16 %v1533_v42, %v1532_v39  ;;  %v4040_v32 = vpop.permute.xlu0 %4039  ;;  %v2612_v20 = vsel %vm1529_vm0, %v5535_v44, %v4037_v56  ;;  %v2611_v30 = vsel %vm1529_vm0, %v2579_v46, %v4036_v35  ;;  %v1503_v39 = vsel %vm1496_vm12, %v1060_v23, %v5619_v29 }
  0xdc   : > { %v4042_v59 = vunpack.i.h.bf16 %v4040_v32  ;;  %v4041_v58 = vunpack.i.l.bf16 %v4040_v32  ;;  %v2643_v21 = vpack.c.bf16 %v2612_v20, %v2611_v30  ;;  %v4045_v7 = vpop.permute.xlu1 %4044  ;;  %v1062_v32 = vsel %vm5707_vm7, %v5523_v48, 0.0 }
  0xdd   : > { %3765 = vmatmul.mubr.msk.bf16.vlgmr.msra.gmra.mxu1 %vm1928_vm15, %v1563_v63  ;;  %v4047_v62 = vunpack.i.h.bf16 %v4045_v7  ;;  %v4046_v17 = vunpack.i.l.bf16 %v4045_v7  ;;  %v2583_v29 = vsel %vm1496_vm12, %v2389_v52, %v5573_v40  ;;  %v1064_v23 = vsel %vm5735_vm6, %v5724_v49, 0.0 }
  0xde   : > { %v2614_v61 = vsel %vm1529_vm0, %v5635_v10, %v4042_v59  ;;  %v2613_v18 = vsel %vm1529_vm0, %v2581_v0, %v4041_v58  ;;  %3808 = vmatprep.mubr.msk.bf16.mxu0 %vm1928_vm15, %v2643_v21  ;;  %v2585_v48 = vsel %vm1496_vm12, %v2391_v36, %v5753_v11  ;;  %v2393_v49 = vsel %vm5707_vm7, %v5746_v55, 0.0 }
  0xdf   : > { %v2644_v37 = vpack.c.bf16 %v2614_v61, %v2613_v18  ;;  %v4050_v41 = vpop.permute.xlu0 %4049  ;;  %v1535_v54 = vsel %vm1529_vm0, %v5535_v44, %v4047_v62  ;;  %v1534_v31 = vsel %vm1529_vm0, %v1501_v6, %v4046_v17  ;;  %v1505_v18 = vsel %vm1496_vm12, %v1062_v32, %v5573_v40 }
  0xe0   : > { %v4052_v56 = vunpack.i.h.bf16 %v4050_v41  ;;  %v4051_v35 = vunpack.i.l.bf16 %v4050_v41  ;;  %v1564_v14 = vpack.c.bf16 %v1535_v54, %v1534_v31  ;;  %v4055_v42 = vpop.permute.xlu1 %4054  ;;  %v2395_v40 = vsel %vm5735_vm6, %v5845_v15, 0.0 }
  0xe1   : > { %3809 = vmatmul.mubr.msk.bf16.vlgmr.msra.gmra.mxu0 %vm1928_vm15, %v2644_v37  ;;  %v4057_v33 = vunpack.i.h.bf16 %v4055_v42  ;;  %v4056_v46 = vunpack.i.l.bf16 %v4055_v42  ;;  %v1066_v42 = vsel %vm5832_vm8, %v5746_v55, 0.0  ;;  %v1068_v32 = vsel %vm5259_vm10, %v5845_v15, 0.0 }
  0xe2   : > { %v1537_v44 = vsel %vm1529_vm0, %v5635_v10, %v4052_v56  ;;  %v1536_v63 = vsel %vm1529_vm0, %v1503_v39, %v4051_v35  ;;  %3768 = vmatprep.mubr.msk.bf16.mxu1 %vm1928_vm15, %v1564_v14  ;;  %v1507_v56 = vsel %vm1496_vm12, %v1064_v23, %v5753_v11  ;;  %v2587_v11 = vsel %vm1496_vm12, %v2393_v49, %v5755_v57 }
  0xe3   : > { %v1565_v8 = vpack.c.bf16 %v1537_v44, %v1536_v63  ;;  %v4060_v20 = vpop.permute.xlu0 %4059  ;;  %v2616_v30 = vsel %vm1529_vm0, %v5609_v3, %v4057_v33  ;;  %v2615_v59 = vsel %vm1529_vm0, %v2583_v29, %v4056_v46  ;;  %v2589_v55 = vsel %vm1496_vm12, %v2395_v40, %v5854_v24 }
  0xe4   : > { %v4062_v58 = vunpack.i.h.bf16 %v4060_v20  ;;  %v4061_v10 = vunpack.i.l.bf16 %v4060_v20  ;;  %v2645_v0 = vpack.c.bf16 %v2616_v30, %v2615_v59  ;;  %v4065_v21 = vpop.permute.xlu1 %4064  ;;  %v2397_v15 = vsel %vm5832_vm8, %v6623_v2, 0.0 }
  0xe5   : > { %3769 = vmatmul.mubr.msk.bf16.gmra.mxu1 %vm1928_vm15, %v1565_v8  ;;  %v4067_v7 = vunpack.i.h.bf16 %v4065_v21  ;;  %v4066_v62 = vunpack.i.l.bf16 %v4065_v21 }
  0xe6   : > { %v2618_v17 = vsel %vm1529_vm0, %v5774_v4, %v4062_v58  ;;  %v2617_v61 = vsel %vm1529_vm0, %v2585_v48, %v4061_v10  ;;  %3812 = vmatprep.mubr.msk.bf16.mxu0 %vm1928_vm15, %v2645_v0  ;;  %v1509_v10 = vsel %vm1496_vm12, %v1066_v42, %v5755_v57 }
  0xe7   : > { %v2646_v6 = vpack.c.bf16 %v2618_v17, %v2617_v61  ;;  %v4070_v52 = vpop.permute.xlu0 %4069  ;;  %v1539_v37 = vsel %vm1529_vm0, %v5609_v3, %v4067_v7  ;;  %v1538_v41 = vsel %vm1529_vm0, %v1505_v18, %v4066_v62  ;;  %v1511_v62 = vsel %vm1496_vm12, %v1068_v32, %v5854_v24 }
  0xe8   : > { %v4072_v54 = vunpack.i.h.bf16 %v4070_v52  ;;  %v4071_v31 = vunpack.i.l.bf16 %v4070_v52  ;;  %v1566_v19 = vpack.c.bf16 %v1539_v37, %v1538_v41  ;;  %v4075_v35 = vpop.permute.xlu1 %4074 }
  0xe9   : > { %3813 = vmatmul.mubr.msk.bf16.gmra.mxu0 %vm1928_vm15, %v2646_v6  ;;  %v4077_v39 = vunpack.i.h.bf16 %v4075_v35  ;;  %v4076_v36 = vunpack.i.l.bf16 %v4075_v35  ;;  %v6634_v35 = vld [vmem:[#allocation32_spill] sm:$0xff] }
  0xea   : > { %v1541_v3 = vsel %vm1529_vm0, %v5774_v4, %v4072_v54  ;;  %v1540_v14 = vsel %vm1529_vm0, %v1507_v56, %v4071_v31  ;;  %3772 = vmatprep.mubr.msk.bf16.mxu1 %vm1928_vm15, %v1566_v19 }
  0xeb   : > { %v1567_v38 = vpack.c.bf16 %v1541_v3, %v1540_v14  ;;  %v4080_v33 = vpop.permute.xlu0 %4079  ;;  %v2620_v46 = vsel %vm1529_vm0, %v5779_v34, %v4077_v39  ;;  %v2619_v44 = vsel %vm1529_vm0, %v2587_v11, %v4076_v36  ;;  %v6636_v3 = vsel %vm5032_vm4, %v6623_v2, 0.0 }
  0xec   : > { %v4082_v63 = vunpack.i.h.bf16 %v4080_v33  ;;  %v4081_v4 = vunpack.i.l.bf16 %v4080_v33  ;;  %v2647_v29 = vpack.c.bf16 %v2620_v46, %v2619_v44  ;;  %v4085_v8 = vpop.permute.xlu1 %4084  ;;  %v1513_v14 = vsel %vm1496_vm12, %v6636_v3, %v5856_v51 }
  0xed   : > { %3773 = vmatmul.mubr.msk.bf16.gmra.mxu1 %vm1928_vm15, %v1567_v38  ;;  %v4087_v20 = vunpack.i.h.bf16 %v4085_v8  ;;  %v4086_v30 = vunpack.i.l.bf16 %v4085_v8  ;;  %vm3210_vm4 = vcmask 253952  }
  0xee   : > { %v2622_v59 = vsel %vm1529_vm0, %v5878_v47, %v4082_v63  ;;  %v2621_v58 = vsel %vm1529_vm0, %v2589_v55, %v4081_v4  ;;  %3816 = vmatprep.mubr.msk.bf16.mxu0 %vm1928_vm15, %v2647_v29 }
  0xef   : > { %v2648_v16 = vpack.c.bf16 %v2622_v59, %v2621_v58  ;;  %v4090_v23 = vpop.permute.xlu0 %4089  ;;  %v1543_v48 = vsel %vm1529_vm0, %v5779_v34, %v4087_v20  ;;  %v1542_v0 = vsel %vm1529_vm0, %v1509_v10, %v4086_v30  ;;  %v2591_v34 = vsel %vm1496_vm12, %v2397_v15, %v5856_v51  ;;  %v6637_v51 = vld [vmem:[#allocation8_spill] sm:$0xff]  ;;  %v6638_v30 = vld [vmem:[#allocation18_spill] sm:$0xff] }
  0xf0   : > { %v4092_v21 = vunpack.i.h.bf16 %v4090_v23  ;;  %v4091_v7 = vunpack.i.l.bf16 %v4090_v23  ;;  %v1568_v17 = vpack.c.bf16 %v1543_v48, %v1542_v0  ;;  %v4095_v57 = vpop.permute.xlu1 %4094  ;;  %v6639_v0 = vld [vmem:[#allocation10_spill] sm:$0xff] }
  0xf1   : > { %3817 = vmatmul.mubr.msk.bf16.gmra.mxu0 %vm1928_vm15, %v2648_v16  ;;  %v4097_v13 = vunpack.i.h.bf16 %v4095_v57  ;;  %v4096_v61 = vunpack.i.l.bf16 %v4095_v57  ;;  %v6640_v57 = vld [vmem:[#allocation29_spill] sm:$0xff] }
  0xf2   : > { %v1545_v18 = vsel %vm1529_vm0, %v5878_v47, %v4092_v21  ;;  %v1544_v49 = vsel %vm1529_vm0, %v1511_v62, %v4091_v7  ;;  %3776 = vmatprep.mubr.msk.bf16.mxu1 %vm1928_vm15, %v1568_v17 }
  0xf3   : > { %v1569_v6 = vpack.c.bf16 %v1545_v18, %v1544_v49  ;;  %v4100_v52 = vpop.permute.xlu0 %4099  ;;  %v2624_v24 = vsel %vm1529_vm0, %v5871_v43, %v4097_v13  ;;  %v2623_v37 = vsel %vm1529_vm0, %v2591_v34, %v4096_v61 }
  0xf4   : > { %v4102_v41 = vunpack.i.h.bf16 %v4100_v52  ;;  %v4101_v54 = vunpack.i.l.bf16 %v4100_v52  ;;  %v2649_v31 = vpack.c.bf16 %v2624_v24, %v2623_v37  ;;  %v4105_v56 = vpop.permute.xlu1 %4104  ;;  %v6641_v37 = vld [vmem:[#allocation16_spill] sm:$0xff] }
  0xf5   : > { %3777 = vmatmul.mubr.msk.bf16.gmra.mxu1 %vm1928_vm15, %v1569_v6  ;;  %v4107_v47 = vunpack.i.h.bf16 %v4105_v56  ;;  %v4106_v40 = vunpack.i.l.bf16 %v4105_v56  ;;  %v6642_v56 = vld [vmem:[#allocation30_spill] sm:$0xff] }
  0xf6   : > { %v2626_v19 = vsel %vm1529_vm0, %v5488_v5, %v4102_v41  ;;  %v2625_v39 = vsel %vm1529_vm0, %v6634_v35, %v4101_v54  ;;  %3820 = vmatprep.mubr.msk.bf16.mxu0 %vm1928_vm15, %v2649_v31 }
  0xf7   : > { %v2650_v42 = vpack.c.bf16 %v2626_v19, %v2625_v39  ;;  %v4110_v11 = vpop.permute.xlu0 %4109  ;;  %v1547_v38 = vsel %vm1529_vm0, %v5871_v43, %v4107_v47  ;;  %v1546_v33 = vsel %vm1529_vm0, %v1513_v14, %v4106_v40 }
  0xf8   : > { %v4112_v46 = vunpack.i.h.bf16 %v4110_v11  ;;  %v4111_v44 = vunpack.i.l.bf16 %v4110_v11  ;;  %v1570_v63 = vpack.c.bf16 %v1547_v38, %v1546_v33  ;;  %v4115_v4 = vpop.permute.xlu1 %4114  ;;  %v6643_v33 = vld [vmem:[#allocation28_spill] sm:$0xff] }
  0xf9   : > { %3821 = vmatmul.mubr.msk.bf16.gmra.mxu0 %vm1928_vm15, %v2650_v42  ;;  %v4117_v32 = vunpack.i.h.bf16 %v4115_v4  ;;  %v4116_v55 = vunpack.i.l.bf16 %v4115_v4 }
  0xfa   : > { %v1549_v2 = vsel %vm1529_vm0, %v5488_v5, %v4112_v46  ;;  %v1548_v29 = vsel %vm1529_vm0, %v6637_v51, %v4111_v44  ;;  %3780 = vmatprep.mubr.msk.bf16.mxu1 %vm1928_vm15, %v1570_v63 }
  0xfb   : > { %v1571_v8 = vpack.c.bf16 %v1549_v2, %v1548_v29  ;;  %v4120_v43 = vpop.permute.xlu0 %4119  ;;  %v2628_v20 = vsel %vm1529_vm0, %v5506_v22, %v4117_v32  ;;  %v2627_v59 = vsel %vm1529_vm0, %v6638_v30, %v4116_v55 }
  0xfc   : > { %v4122_v58 = vunpack.i.h.bf16 %v4120_v43  ;;  %v4121_v10 = vunpack.i.l.bf16 %v4120_v43  ;;  %v2651_v15 = vpack.c.bf16 %v2628_v20, %v2627_v59  ;;  %v4125_v16 = vpop.permute.xlu1 %4124 }
  0xfd   : > { %3781 = vmatmul.mubr.msk.bf16.gmra.mxu1 %vm1928_vm15, %v1571_v8  ;;  %v4127_v5 = vunpack.i.h.bf16 %v4125_v16  ;;  %v4126_v23 = vunpack.i.l.bf16 %v4125_v16 }
  0xfe   : > { %v2630_v48 = vsel %vm1529_vm0, %v5526_v25, %v4122_v58  ;;  %v2629_v21 = vsel %vm1529_vm0, %v6639_v0, %v4121_v10  ;;  %3824 = vmatprep.mubr.msk.bf16.mxu0 %vm1928_vm15, %v2651_v15 }
  0xff   : > { %v2652_v7 = vpack.c.bf16 %v2630_v48, %v2629_v21  ;;  %v4130_v62 = vpop.permute.xlu0 %4129  ;;  %v1551_v17 = vsel %vm1529_vm0, %v5506_v22, %v4127_v5  ;;  %v1550_v13 = vsel %vm1529_vm0, %v6640_v57, %v4126_v23  ;;  %v6644_v23 = vld [vmem:[#allocation19_spill] sm:$0xff]  ;;  %v6645_v57 = vld [vmem:[#allocation24_spill] sm:$0xff] }
 0x100   : > { %v4132_v61 = vunpack.i.h.bf16 %v4130_v62  ;;  %v4131_v18 = vunpack.i.l.bf16 %v4130_v62  ;;  %v1572_v49 = vpack.c.bf16 %v1551_v17, %v1550_v13  ;;  %v4135_v34 = vpop.permute.xlu1 %4134 }
 0x101   : > { %3825 = vmatmul.mubr.msk.bf16.gmra.mxu0 %vm1928_vm15, %v2652_v7  ;;  %v4137_v6 = vunpack.i.h.bf16 %v4135_v34  ;;  %v4136_v52 = vunpack.i.l.bf16 %v4135_v34 }
 0x102   : > { %v1553_v24 = vsel %vm1529_vm0, %v5526_v25, %v4132_v61  ;;  %v1552_v41 = vsel %vm1529_vm0, %v6641_v37, %v4131_v18  ;;  %3784 = vmatprep.mubr.msk.bf16.mxu1 %vm1928_vm15, %v1572_v49  ;;  %v6646_v49 = vld [vmem:[#allocation6_spill] sm:$0xff] }
 0x103   : > { %v1573_v54 = vpack.c.bf16 %v1553_v24, %v1552_v41  ;;  %v4140_v22 = vpop.permute.xlu0 %4139  ;;  %v2632_v31 = vsel %vm1529_vm0, %v5590_v9, %v4137_v6  ;;  %v2631_v47 = vsel %vm1529_vm0, %v6642_v56, %v4136_v52  ;;  %v6647_v6 = vld [vmem:[#allocation5_spill] sm:$0xff] }
 0x104   : > { %v4142_v40 = vunpack.i.h.bf16 %v4140_v22  ;;  %v4141_v19 = vunpack.i.l.bf16 %v4140_v22  ;;  %v2653_v35 = vpack.c.bf16 %v2632_v31, %v2631_v47  ;;  %v4145_v39 = vpop.permute.xlu1 %4144 }
 0x105   : > { %3785 = vmatmul.mubr.msk.bf16.gmra.mxu1 %vm1928_vm15, %v1573_v54  ;;  %v4147_v25 = vunpack.i.h.bf16 %v4145_v39  ;;  %v4146_v36 = vunpack.i.l.bf16 %v4145_v39 }
 0x106   : > { %v2633_v3 = vsel %vm1529_vm0, %v5702_v60, %v4141_v19  ;;  %v2634_v14 = vsel %vm1529_vm0, %v5732_v45, %v4142_v40  ;;  %3828 = vmatprep.mubr.msk.bf16.mxu0 %vm1928_vm15, %v2653_v35 }
 0x107   : > { %v2654_v42 = vpack.c.bf16 %v2634_v14, %v2633_v3  ;;  %v4150_v11 = vpop.permute.xlu0 %4149  ;;  %v1555_v38 = vsel %vm1529_vm0, %v5590_v9, %v4147_v25  ;;  %v1554_v46 = vsel %vm1529_vm0, %v6643_v33, %v4146_v36 }
 0x108   : > { %v4152_v44 = vunpack.i.h.bf16 %v4150_v11  ;;  %v4151_v63 = vunpack.i.l.bf16 %v4150_v11  ;;  %v1574_v4 = vpack.c.bf16 %v1555_v38, %v1554_v46  ;;  %v4155_v32 = vpop.permute.xlu1 %4154 }
 0x109   : > { %3829 = vmatmul.mubr.msk.bf16.gmra.mxu0 %vm1928_vm15, %v2654_v42  ;;  %v4157_v60 = vunpack.i.h.bf16 %v4155_v32  ;;  %v4156_v55 = vunpack.i.l.bf16 %v4155_v32 }
 0x10a   : > { %v1556_v2 = vsel %vm1529_vm0, %v5695_v27, %v4151_v63  ;;  %v1557_v51 = vsel %vm1529_vm0, %v5732_v45, %v4152_v44  ;;  %3788 = vmatprep.mubr.msk.bf16.mxu1 %vm1928_vm15, %v1574_v4 }
 0x10b   : > { %v1575_v29 = vpack.c.bf16 %v1557_v51, %v1556_v2  ;;  %v4160_v9 = vpop.permute.xlu0 %4159  ;;  %v2636_v8 = vsel %vm1529_vm0, %v5758_v53, %v4157_v60  ;;  %v2635_v43 = vsel %vm1529_vm0, %v5669_v50, %v4156_v55 }
 0x10c   : > { %v4162_v20 = vunpack.i.h.bf16 %v4160_v9  ;;  %v4161_v30 = vunpack.i.l.bf16 %v4160_v9  ;;  %v2655_v59 = vpack.c.bf16 %v2636_v8, %v2635_v43  ;;  %v4165_v58 = vpop.permute.xlu1 %4164 }
 0x10d   : > { %3789 = vmatmul.mubr.msk.bf16.gmra.mxu1 %vm1928_vm15, %v1575_v29  ;;  %v4167_v27 = vunpack.i.h.bf16 %v4165_v58  ;;  %v4166_v10 = vunpack.i.l.bf16 %v4165_v58 }
 0x10e   : > { %v2637_v45 = vsel %vm1529_vm0, %v5812_v26, %v4161_v30  ;;  %v2638_v15 = vsel %vm1529_vm0, %v5824_v12, %v4162_v20  ;;  %3832 = vmatprep.mubr.msk.bf16.mxu0 %vm1928_vm15, %v2655_v59 }
 0x10f   : > { %v2656_v16 = vpack.c.bf16 %v2638_v15, %v2637_v45  ;;  %v4170_v5 = vpop.permute.xlu0 %4169  ;;  %v1559_v50 = vsel %vm1529_vm0, %v5758_v53, %v4167_v27  ;;  %v1558_v48 = vsel %vm1529_vm0, %v6644_v23, %v4166_v10 }
 0x110   : > { %v4172_v0 = vunpack.i.h.bf16 %v4170_v5  ;;  %v4171_v21 = vunpack.i.l.bf16 %v4170_v5  ;;  %v1576_v7 = vpack.c.bf16 %v1559_v50, %v1558_v48  ;;  %v4175_v62 = vpop.permute.xlu1 %4174 }
 0x111   : > { %3833 = vmatmul.mubr.msk.bf16.gmra.mxu0 %vm1928_vm15, %v2656_v16  ;;  %v4177_v26 = vunpack.i.h.bf16 %v4175_v62  ;;  %v4176_v17 = vunpack.i.l.bf16 %v4175_v62 }
 0x112   : > { %v1560_v13 = vsel %vm1529_vm0, %v6645_v57, %v4171_v21  ;;  %v1561_v61 = vsel %vm1529_vm0, %v5824_v12, %v4172_v0  ;;  %3792 = vmatprep.mubr.msk.bf16.mxu1 %vm1928_vm15, %v1576_v7 }
 0x113   : > { %v1577_v18 = vpack.c.bf16 %v1561_v61, %v1560_v13  ;;  %v4180_v53 = vpop.permute.xlu0 %4179  ;;  %v2640_v34 = vsel %vm1529_vm0, %v6646_v49, %v4177_v26  ;;  %v2639_v52 = vsel %vm1529_vm0, %v6647_v6, %v4176_v17 }
 0x114   : > { %v4182_v24 = vunpack.i.h.bf16 %v4180_v53  ;;  %v4181_v37 = vunpack.i.l.bf16 %v4180_v53  ;;  %v2657_v41 = vpack.c.bf16 %v2640_v34, %v2639_v52 }
 0x115   : > { %3793 = vmatmul.mubr.msk.bf16.gmra.mxu1 %vm1928_vm15, %v1577_v18 }
 0x116   : > { %v2642_v54 = vsel %vm1529_vm0, %v5897_v28, %v4182_v24  ;;  %v2641_v12 = vsel %vm1529_vm0, %v5904_v1, %v4181_v37  ;;  %3836 = vmatprep.mubr.msk.bf16.mxu0 %vm1928_vm15, %v2657_v41 }
 0x117   : > { %v2658_v22 = vpack.c.bf16 %v2642_v54, %v2641_v12 }
 0x119   : > { %3837 = vmatmul.mubr.msk.bf16.gmra.mxu0 %vm1928_vm15, %v2658_v22 }
 0x168   : > { %v6127_v31 = vpop.f32.mrf.mxu1 }
 0x16a   : > { %v6129_v56 = vpop.f32.mrf.mxu1 }
 0x16b   : > { %v3722_v47 = vpop.f32.mrf.mxu0 }
 0x16c   : > { %v6131_v40 = vpop.f32.mrf.mxu1 }
 0x16d   : > { %v2011_v19 = vpop.f32.mrf.mxu0 }
 0x16e   : > { %v6133_v35 = vpop.f32.mrf.mxu1 }
 0x16f   : > { %v3723_v39 = vpop.f32.mrf.mxu0 }
 0x171   : > { %v2014_v25 = vpop.f32.mrf.mxu0 }
 0x173   : > { %v6135_v28 = vpop.f32.mrf.mxu1 }
 0x175   : > { %v6137_v1 = vpop.f32.mrf.mxu1 }
 0x177   : > { %v3726_v36 = vpop.f32.mrf.mxu0  ;;  %v6139_v3 = vpop.f32.mrf.mxu1 }
 0x179   : > { %v2027_v14 = vpop.f32.mrf.mxu0  ;;  %v6141_v42 = vpop.f32.mrf.mxu1 }
 0x17b   : > { %v3727_v11 = vpop.f32.mrf.mxu0 }
 0x17d   : > { %v6145_v33 = vpop.f32.mrf.mxu0 }
 0x183   : > { %v6143_v38 = vpop.f32.mrf.mxu1 }
 0x185   : > { %v6147_v46 = vpop.f32.mrf.mxu1 }
 0x187   : > { %v6149_v44 = vpop.f32.mrf.mxu0  ;;  %v6151_v63 = vpop.f32.mrf.mxu1 }
 0x189   : > { %v6153_v4 = vpop.f32.mrf.mxu0  ;;  %v6155_v32 = vpop.f32.mrf.mxu1 }
 0x18b   : > { %v6157_v60 = vpop.f32.mrf.mxu0 }
 0x18d   : > { %v6161_v2 = vpop.f32.mrf.mxu0 }
 0x191   : > { %v6159_v55 = vpop.f32.mrf.mxu1 }
 0x193   : > { %v6163_v51 = vpop.f32.mrf.mxu1 }
 0x195   : > { %v6165_v29 = vpop.f32.mrf.mxu1 }
 0x196   : > { %v6167_v9 = vpop.f32.mrf.mxu0 }
 0x197   : > { %v6171_v43 = vpop.f32.mrf.mxu1 }
 0x198   : > { %v6169_v8 = vpop.f32.mrf.mxu0 }
 0x19a   : > { %v6173_v20 = vpop.f32.mrf.mxu0 }
 0x19c   : > { %v6175_v59 = vpop.f32.mrf.mxu0 }
 0x19d   : > { %v3766_v30 = vpop.f32.mrf.mxu1 }
 0x19e   : > { %v2265_v27 = vadd.f32 %v3766_v30, %v3722_v47 }
 0x19f   : > { %v2256_v58 = vpop.f32.mrf.mxu1 }
 0x1a0   : > { %v2257_v15 = vadd.f32 %v2256_v58, %v2011_v19 }
 0x1a1   : > { %v3767_v10 = vpop.f32.mrf.mxu1  ;;  %v3810_v45 = vpop.f32.mrf.mxu0 }
 0x1a2   : > { %v2918_v16 = vadd.f32 %v3810_v45, %v2265_v27  ;;  %v2268_v23 = vadd.f32 %v3767_v10, %v3723_v39 }
 0x1a3   : > { %v2259_v5 = vpop.f32.mrf.mxu1  ;;  %v2789_v50 = vpop.f32.mrf.mxu0 }
 0x1a4   : > { %v3533_v48 = vpack.c.bf16 %v2918_v16, %v2918_v16  ;;  %v2916_v0 = vadd.f32 %v2789_v50, %v2257_v15  ;;  %v2260_v62 = vadd.f32 %v2259_v5, %v2014_v25 }
 0x1a5   : > { %v3770_v21 = vpop.f32.mrf.mxu1  ;;  %v3811_v7 = vpop.f32.mrf.mxu0 }
 0x1a6   : > { %3079 = vst.msk [vmem:[%s6182_s8 + $0x8] sm:$0xf] %vm3076_vm1, %v3533_v48  ;;  %v3531_v26 = vpack.c.bf16 %v2916_v0, %v2916_v0  ;;  %v2919_v17 = vadd.f32 %v3811_v7, %v2268_v23  ;;  %v2281_v49 = vadd.f32 %v3770_v21, %v3726_v36 }
 0x1a7   : > { %v2272_v57 = vpop.f32.mrf.mxu1  ;;  %v2792_v13 = vpop.f32.mrf.mxu0 }
 0x1a8   : > { %3077 = vst.msk [vmem:[%s6182_s8] sm:$0xf] %vm3076_vm1, %v3531_v26  ;;  %v2949_v61 = vpack.c.bf16 %v2919_v17, %v2918_v16  ;;  %v3534_v18 = vpack.c.bf16 %v2919_v17, %v2919_v17  ;;  %v2917_v53 = vadd.f32 %v2792_v13, %v2260_v62  ;;  %v2273_v19 = vadd.f32 %v2272_v57, %v2027_v14 }
 0x1a9   : > { %v3771_v34 = vpop.f32.mrf.mxu1  ;;  %v3814_v6 = vpop.f32.mrf.mxu0 }
 0x1aa   : > { %3080 = vst.msk [vmem:[%s6182_s8 + $0xc] sm:$0xf] %vm3076_vm1, %v3534_v18  ;;  %v3111_v52 = vunpack.c.l.bf16 %v2949_v61  ;;  %v3112_v24 = vunpack.c.h.bf16 %v2949_v61  ;;  %v2948_v37 = vpack.c.bf16 %v2917_v53, %v2916_v0  ;;  %v3532_v41 = vpack.c.bf16 %v2917_v53, %v2917_v53 }
 0x1ab   : > { %v2922_v54 = vadd.f32 %v3814_v6, %v2281_v49  ;;  %v2275_v12 = vpop.f32.mrf.mxu1  ;;  %v2805_v22 = vpop.f32.mrf.mxu0  ;;  %v2284_v39 = vadd.f32 %v3771_v34, %v3727_v11 }
 0x1ac   : > { %v3214_v47 = vmul.f32 %v3111_v52, %v3111_v52  ;;  %3078 = vst.msk [vmem:[%s6182_s8 + $0x4] sm:$0xf] %vm3076_vm1, %v3532_v41  ;;  %v3144_v25 = vsel %vm1496_vm12, %v3111_v52, 0.0  ;;  %v3109_v36 = vunpack.c.l.bf16 %v2948_v37  ;;  %v3110_v30 = vunpack.c.h.bf16 %v2948_v37 }
 0x1ad   : > { %v3537_v58 = vpack.c.bf16 %v2922_v54, %v2922_v54  ;;  %v3774_v27 = vpop.f32.mrf.mxu1  ;;  %v3815_v10 = vpop.f32.mrf.mxu0  ;;  %v3146_v45 = vsel %vm1496_vm12, %v3112_v24, 0.0  ;;  %v3215_v15 = vmul.f32 %v3112_v24, %v3112_v24  ;;  %v2276_v16 = vadd.f32 %v2275_v12, %v6145_v33 }
 0x1ae   : > { %v2920_v5 = vadd.f32 %v2805_v22, %v2273_v19  ;;  %v3141_v50 = vsel %vm1496_vm12, %v3109_v36, 0.0  ;;  %v3142_v14 = vsel %vm1496_vm12, %v3110_v30, 0.0  ;;  %v3212_v23 = vmul.f32 %v3109_v36, %v3109_v36 }
 0x1af   : > { %v3213_v48 = vmul.f32 %v3110_v30, %v3110_v30  ;;  %3083 = vst.msk [vmem:[%s6182_s8 + $0x18] sm:$0xf] %vm3076_vm1, %v3537_v58  ;;  %v2288_v11 = vpop.f32.mrf.mxu1  ;;  %v2808_v0 = vpop.f32.mrf.mxu0  ;;  %v3247_v21 = vsel %vm1496_vm12, %v3214_v47, 0.0  ;;  %v3143_v7 = vadd.f32 %v3142_v14, %v3141_v50  ;;  %v2923_v26 = vadd.f32 %v3815_v10, %v2284_v39 }
 0x1b0   : > { %v3535_v62 = vpack.c.bf16 %v2920_v5, %v2920_v5  ;;  %v3244_v17 = vsel %vm1496_vm12, %v3212_v23, 0.0  ;;  %v2297_v57 = vadd.f32 %v3774_v27, %v6149_v44  ;;  %v2921_v13 = vadd.f32 %v2808_v0, %v2276_v16 }
 0x1b1   : > { %v3245_v33 = vsel %vm1496_vm12, %v3213_v48, 0.0  ;;  %v3775_v61 = vpop.f32.mrf.mxu1  ;;  %v3818_v18 = vpop.f32.mrf.mxu0  ;;  %v3145_v53 = vadd.f32 %v3144_v25, %v3143_v7  ;;  %v2951_v34 = vpack.c.bf16 %v2923_v26, %v2922_v54  ;;  %v3538_v6 = vpack.c.bf16 %v2923_v26, %v2923_v26 }
 0x1b2   : > { %v3246_v49 = vadd.f32 %v3245_v33, %v3244_v17  ;;  %3081 = vst.msk [vmem:[%s6182_s8 + $0x10] sm:$0xf] %vm3076_vm1, %v3535_v62  ;;  %v3249_v52 = vsel %vm1496_vm12, %v3215_v15, 0.0  ;;  %v2950_v24 = vpack.c.bf16 %v2921_v13, %v2920_v5  ;;  %v3536_v37 = vpack.c.bf16 %v2921_v13, %v2921_v13 }
 0x1b3   : > { %v2926_v41 = vadd.f32 %v3818_v18, %v2297_v57  ;;  %v2291_v12 = vpop.f32.mrf.mxu1  ;;  %v2821_v22 = vpop.f32.mrf.mxu0  ;;  %3084 = vst.msk [vmem:[%s6182_s8 + $0x1c] sm:$0xf] %vm3076_vm1, %v3538_v6  ;;  %v3115_v44 = vunpack.c.l.bf16 %v2951_v34  ;;  %v3116_v19 = vunpack.c.h.bf16 %v2951_v34  ;;  %v2289_v39 = vadd.f32 %v2288_v11, %v6153_v4 }
 0x1b4   : > { %v3248_v47 = vadd.f32 %v3247_v21, %v3246_v49  ;;  %3082 = vst.msk [vmem:[%s6182_s8 + $0x14] sm:$0xf] %vm3076_vm1, %v3536_v37  ;;  %v3113_v25 = vunpack.c.l.bf16 %v2950_v24  ;;  %v3114_v54 = vunpack.c.h.bf16 %v2950_v24  ;;  %v2300_v36 = vadd.f32 %v3775_v61, %v6157_v60 }
 0x1b5   : > { %v3541_v30 = vpack.c.bf16 %v2926_v41, %v2926_v41  ;;  %v3778_v58 = vpop.f32.mrf.mxu1  ;;  %v3819_v27 = vpop.f32.mrf.mxu0  ;;  %v3218_v10 = vmul.f32 %v3115_v44, %v3115_v44  ;;  %v3219_v15 = vmul.f32 %v3116_v19, %v3116_v19  ;;  %v3147_v16 = vadd.f32 %v3146_v45, %v3145_v53 }
 0x1b6   : > { %v2292_v5 = vadd.f32 %v2291_v12, %v6161_v2  ;;  %v3152_v50 = vsel %vm1496_vm12, %v3115_v44, 0.0  ;;  %v3148_v14 = vsel %vm1496_vm12, %v3113_v25, 0.0  ;;  %v3216_v4 = vmul.f32 %v3113_v25, %v3113_v25 }
 0x1b7   : > { %v3217_v23 = vmul.f32 %v3114_v54, %v3114_v54  ;;  %3087 = vst.msk [vmem:[%s6182_s8 + $0x28] sm:$0xf] %vm3076_vm1, %v3541_v30  ;;  %v2304_v48 = vpop.f32.mrf.mxu1  ;;  %v2824_v11 = vpop.f32.mrf.mxu0  ;;  %v3154_v60 = vsel %vm1496_vm12, %v3116_v19, 0.0  ;;  %v3149_v0 = vadd.f32 %v3148_v14, %v3147_v16  ;;  %v3150_v21 = vsel %vm1496_vm12, %v3114_v54, 0.0 }
 0x1b8   : > { %v3250_v7 = vadd.f32 %v3249_v52, %v3248_v47  ;;  %v3255_v45 = vsel %vm1496_vm12, %v3218_v10, 0.0  ;;  %v3251_v2 = vsel %vm1496_vm12, %v3216_v4, 0.0  ;;  %v2924_v62 = vadd.f32 %v2821_v22, %v2289_v39 }
 0x1b9   : > { %v2313_v26 = vadd.f32 %v3778_v58, %v6167_v9  ;;  %v3779_v17 = vpop.f32.mrf.mxu1  ;;  %v3822_v33 = vpop.f32.mrf.mxu0  ;;  %v3257_v57 = vsel %vm1496_vm12, %v3219_v15, 0.0  ;;  %v3151_v13 = vadd.f32 %v3150_v21, %v3149_v0  ;;  %v2927_v18 = vadd.f32 %v3819_v27, %v2300_v36 }
 0x1ba   : > { %v3252_v61 = vadd.f32 %v3251_v2, %v3250_v7  ;;  %v3253_v53 = vsel %vm1496_vm12, %v3217_v23, 0.0  ;;  %v3539_v49 = vpack.c.bf16 %v2924_v62, %v2924_v62  ;;  %v2925_v34 = vadd.f32 %v2824_v11, %v2292_v5 }
 0x1bb   : > { %v2930_v6 = vadd.f32 %v3822_v33, %v2313_v26  ;;  %v2307_v52 = vpop.f32.mrf.mxu1  ;;  %v2837_v24 = vpop.f32.mrf.mxu0  ;;  %v3153_v37 = vadd.f32 %v3152_v50, %v3151_v13  ;;  %v2953_v9 = vpack.c.bf16 %v2927_v18, %v2926_v41  ;;  %v3542_v22 = vpack.c.bf16 %v2927_v18, %v2927_v18 }
 0x1bc   : > { %v3254_v12 = vadd.f32 %v3253_v53, %v3252_v61  ;;  %3085 = vst.msk [vmem:[%s6182_s8 + $0x20] sm:$0xf] %vm3076_vm1, %v3539_v49  ;;  %v2305_v47 = vadd.f32 %v2304_v48, %v6169_v8  ;;  %v2952_v44 = vpack.c.bf16 %v2925_v34, %v2924_v62  ;;  %v3540_v19 = vpack.c.bf16 %v2925_v34, %v2925_v34 }
 0x1bd   : > { %v3545_v39 = vpack.c.bf16 %v2930_v6, %v2930_v6  ;;  %v3782_v25 = vpop.f32.mrf.mxu1  ;;  %v3823_v54 = vpop.f32.mrf.mxu0  ;;  %3088 = vst.msk [vmem:[%s6182_s8 + $0x2c] sm:$0xf] %vm3076_vm1, %v3542_v22  ;;  %v3119_v30 = vunpack.c.l.bf16 %v2953_v9  ;;  %v3120_v58 = vunpack.c.h.bf16 %v2953_v9  ;;  %v3155_v27 = vadd.f32 %v3154_v60, %v3153_v37 }
 0x1be   : > { %v3256_v36 = vadd.f32 %v3255_v45, %v3254_v12  ;;  %3086 = vst.msk [vmem:[%s6182_s8 + $0x24] sm:$0xf] %vm3076_vm1, %v3540_v19  ;;  %v3117_v41 = vunpack.c.l.bf16 %v2952_v44  ;;  %v3118_v10 = vunpack.c.h.bf16 %v2952_v44  ;;  %v2316_v15 = vadd.f32 %v3779_v17, %v6173_v20 }
 0x1bf   : > { %3091 = vst.msk [vmem:[%s6182_s8 + $0x38] sm:$0xf] %vm3076_vm1, %v3545_v39  ;;  %v2928_v8 = vadd.f32 %v2837_v24, %v2305_v47  ;;  %v2320_v16 = vpop.f32.mrf.mxu1  ;;  %v2840_v5 = vpop.f32.mrf.mxu0  ;;  %v3222_v50 = vmul.f32 %v3119_v30, %v3119_v30  ;;  %v3223_v14 = vmul.f32 %v3120_v58, %v3120_v58  ;;  %v2308_v4 = vadd.f32 %v2307_v52, %v6175_v59 }
 0x1c0   : > { %v2329_v23 = vadd.f32 %v3782_v25, %v6127_v31  ;;  %v3160_v48 = vsel %vm1496_vm12, %v3119_v30, 0.0  ;;  %v3156_v11 = vsel %vm1496_vm12, %v3117_v41, 0.0  ;;  %v3220_v60 = vmul.f32 %v3117_v41, %v3117_v41 }
 0x1c1   : > { %v3221_v0 = vmul.f32 %v3118_v10, %v3118_v10  ;;  %v3783_v21 = vpop.f32.mrf.mxu1  ;;  %v3826_v7 = vpop.f32.mrf.mxu0  ;;  %v3162_v20 = vsel %vm1496_vm12, %v3120_v58, 0.0  ;;  %v3157_v45 = vadd.f32 %v3156_v11, %v3155_v27  ;;  %v3158_v2 = vsel %vm1496_vm12, %v3118_v10, 0.0 }
 0x1c2   : > { %v3258_v62 = vadd.f32 %v3257_v57, %v3256_v36  ;;  %v3263_v26 = vsel %vm1496_vm12, %v3222_v50, 0.0  ;;  %v3259_v59 = vsel %vm1496_vm12, %v3220_v60, 0.0  ;;  %v3543_v31 = vpack.c.bf16 %v2928_v8, %v2928_v8 }
 0x1c3   : > { %v2931_v17 = vadd.f32 %v3823_v54, %v2316_v15  ;;  %v2323_v33 = vpop.f32.mrf.mxu1  ;;  %v2853_v13 = vpop.f32.mrf.mxu0  ;;  %v3265_v61 = vsel %vm1496_vm12, %v3223_v14, 0.0  ;;  %v3159_v18 = vadd.f32 %v3158_v2, %v3157_v45  ;;  %v2929_v49 = vadd.f32 %v2840_v5, %v2308_v4 }
 0x1c4   : > { %v3260_v53 = vadd.f32 %v3259_v59, %v3258_v62  ;;  %v3261_v34 = vsel %vm1496_vm12, %v3221_v0, 0.0  ;;  %3089 = vst.msk [vmem:[%s6182_s8 + $0x30] sm:$0xf] %vm3076_vm1, %v3543_v31  ;;  %v2934_v24 = vadd.f32 %v3826_v7, %v2329_v23  ;;  %v2321_v25 = vadd.f32 %v2320_v16, %v6129_v56 }
 0x1c5   : > { %v2955_v52 = vpack.c.bf16 %v2931_v17, %v2930_v6  ;;  %v3546_v57 = vpack.c.bf16 %v2931_v17, %v2931_v17  ;;  %v3786_v37 = vpop.f32.mrf.mxu1  ;;  %v3827_v12 = vpop.f32.mrf.mxu0  ;;  %v3161_v9 = vadd.f32 %v3160_v48, %v3159_v18  ;;  %v2954_v47 = vpack.c.bf16 %v2929_v49, %v2928_v8 }
 0x1c6   : > { %v3262_v22 = vadd.f32 %v3261_v34, %v3260_v53  ;;  %v3544_v44 = vpack.c.bf16 %v2929_v49, %v2929_v49  ;;  %v3549_v54 = vpack.c.bf16 %v2934_v24, %v2934_v24  ;;  %v2332_v8 = vadd.f32 %v3783_v21, %v6131_v40 }
 0x1c7   : > { %3092 = vst.msk [vmem:[%s6182_s8 + $0x3c] sm:$0xf] %vm3076_vm1, %v3546_v57  ;;  %v3123_v19 = vunpack.c.l.bf16 %v2955_v52  ;;  %v3124_v39 = vunpack.c.h.bf16 %v2955_v52  ;;  %v2336_v36 = vpop.f32.mrf.mxu1  ;;  %v2856_v30 = vpop.f32.mrf.mxu0  ;;  %v3121_v58 = vunpack.c.l.bf16 %v2954_v47  ;;  %v3122_v27 = vunpack.c.h.bf16 %v2954_v47 }
 0x1c8   : > { %v3264_v6 = vadd.f32 %v3263_v26, %v3262_v22  ;;  %3090 = vst.msk [vmem:[%s6182_s8 + $0x34] sm:$0xf] %vm3076_vm1, %v3544_v44  ;;  %v3163_v41 = vadd.f32 %v3162_v20, %v3161_v9  ;;  %3095 = vst.msk [vmem:[%s6182_s8 + $0x48] sm:$0xf] %vm3076_vm1, %v3549_v54  ;;  %v2324_v5 = vadd.f32 %v2323_v33, %v6133_v35 }
 0x1c9   : > { %v3226_v10 = vmul.f32 %v3123_v19, %v3123_v19  ;;  %v3227_v15 = vmul.f32 %v3124_v39, %v3124_v39  ;;  %v3787_v50 = vpop.f32.mrf.mxu1  ;;  %v3830_v14 = vpop.f32.mrf.mxu0  ;;  %v3168_v56 = vsel %vm1496_vm12, %v3123_v19, 0.0  ;;  %v3164_v16 = vsel %vm1496_vm12, %v3121_v58, 0.0 }
 0x1ca   : > { %v3224_v4 = vmul.f32 %v3121_v58, %v3121_v58  ;;  %v3225_v23 = vmul.f32 %v3122_v27, %v3122_v27  ;;  %v3170_v48 = vsel %vm1496_vm12, %v3124_v39, 0.0  ;;  %v3165_v11 = vadd.f32 %v3164_v16, %v3163_v41 }
 0x1cb   : > { %v3166_v60 = vsel %vm1496_vm12, %v3122_v27, 0.0  ;;  %v3266_v0 = vadd.f32 %v3265_v61, %v3264_v6  ;;  %v2339_v7 = vpop.f32.mrf.mxu1  ;;  %v2869_v40 = vpop.f32.mrf.mxu0  ;;  %v3271_v21 = vsel %vm1496_vm12, %v3226_v10, 0.0  ;;  %v2932_v20 = vadd.f32 %v2853_v13, %v2321_v25 }
 0x1cc   : > { %v3267_v35 = vsel %vm1496_vm12, %v3224_v4, 0.0  ;;  %v2345_v45 = vadd.f32 %v3786_v37, %v6135_v28  ;;  %v3273_v2 = vsel %vm1496_vm12, %v3227_v15, 0.0  ;;  %v3167_v62 = vadd.f32 %v3166_v60, %v3165_v11 }
 0x1cd   : > { %v3268_v26 = vadd.f32 %v3267_v35, %v3266_v0  ;;  %v2935_v59 = vadd.f32 %v3827_v12, %v2332_v8  ;;  %v3790_v31 = vpop.f32.mrf.mxu1  ;;  %v3831_v17 = vpop.f32.mrf.mxu0  ;;  %v3269_v33 = vsel %vm1496_vm12, %v3225_v23, 0.0  ;;  %v3547_v61 = vpack.c.bf16 %v2932_v20, %v2932_v20 }
 0x1ce   : > { %v2933_v18 = vadd.f32 %v2856_v30, %v2324_v5  ;;  %v2938_v53 = vadd.f32 %v3830_v14, %v2345_v45  ;;  %v3169_v49 = vadd.f32 %v3168_v56, %v3167_v62  ;;  %v2337_v37 = vadd.f32 %v2336_v36, %v6137_v1 }
 0x1cf   : > { %v3270_v34 = vadd.f32 %v3269_v33, %v3268_v26  ;;  %v2957_v52 = vpack.c.bf16 %v2935_v59, %v2934_v24  ;;  %v3550_v13 = vpack.c.bf16 %v2935_v59, %v2935_v59  ;;  %v2352_v28 = vpop.f32.mrf.mxu1  ;;  %v2872_v57 = vpop.f32.mrf.mxu0  ;;  %3093 = vst.msk [vmem:[%s6182_s8 + $0x40] sm:$0xf] %vm3076_vm1, %v3547_v61  ;;  %v2348_v6 = vadd.f32 %v3787_v50, %v6139_v3 }
 0x1d0   : > { %v2956_v12 = vpack.c.bf16 %v2933_v18, %v2932_v20  ;;  %v3548_v9 = vpack.c.bf16 %v2933_v18, %v2933_v18  ;;  %v3553_v22 = vpack.c.bf16 %v2938_v53, %v2938_v53  ;;  %v3171_v39 = vadd.f32 %v3170_v48, %v3169_v49 }
 0x1d1   : > { %v3272_v47 = vadd.f32 %v3271_v21, %v3270_v34  ;;  %3096 = vst.msk [vmem:[%s6182_s8 + $0x4c] sm:$0xf] %vm3076_vm1, %v3550_v13  ;;  %v3127_v44 = vunpack.c.l.bf16 %v2957_v52  ;;  %v3128_v19 = vunpack.c.h.bf16 %v2957_v52  ;;  %v3791_v25 = vpop.f32.mrf.mxu1  ;;  %v3834_v24 = vpop.f32.mrf.mxu0  ;;  %v2936_v1 = vadd.f32 %v2869_v40, %v2337_v37 }
 0x1d2   : > { %3094 = vst.msk [vmem:[%s6182_s8 + $0x44] sm:$0xf] %vm3076_vm1, %v3548_v9  ;;  %v3125_v54 = vunpack.c.l.bf16 %v2956_v12  ;;  %v3126_v30 = vunpack.c.h.bf16 %v2956_v12  ;;  %3099 = vst.msk [vmem:[%s6182_s8 + $0x58] sm:$0xf] %vm3076_vm1, %v3553_v22  ;;  %v2340_v27 = vadd.f32 %v2339_v7, %v6141_v42  ;;  %v2361_v41 = vadd.f32 %v3790_v31, %v6143_v38 }
 0x1d3   : > { %v3230_v36 = vmul.f32 %v3127_v44, %v3127_v44  ;;  %v3231_v58 = vmul.f32 %v3128_v19, %v3128_v19  ;;  %v2885_v10 = vpop.f32.mrf.mxu0  ;;  %v3176_v15 = vsel %vm1496_vm12, %v3127_v44, 0.0  ;;  %v2355_v56 = vpop.f32.mrf.mxu1  ;;  %v3178_v3 = vsel %vm1496_vm12, %v3128_v19, 0.0 }
 0x1d4   : > { %v3172_v8 = vsel %vm1496_vm12, %v3125_v54, 0.0  ;;  %v3228_v5 = vmul.f32 %v3125_v54, %v3125_v54  ;;  %v3229_v14 = vmul.f32 %v3126_v30, %v3126_v30  ;;  %v3174_v16 = vsel %vm1496_vm12, %v3126_v30, 0.0 }
 0x1d5   : > { %v3173_v50 = vadd.f32 %v3172_v8, %v3171_v39  ;;  %v3274_v4 = vadd.f32 %v3273_v2, %v3272_v47  ;;  %v3835_v23 = vpop.f32.mrf.mxu0  ;;  %v3279_v42 = vsel %vm1496_vm12, %v3230_v36, 0.0  ;;  %v3551_v48 = vpack.c.bf16 %v2936_v1, %v2936_v1  ;;  %v3794_v62 = vpop.f32.mrf.mxu1 }
 0x1d6   : > { %v3275_v38 = vsel %vm1496_vm12, %v3228_v5, 0.0  ;;  %v2939_v11 = vadd.f32 %v3831_v17, %v2348_v6  ;;  %v3281_v60 = vsel %vm1496_vm12, %v3231_v58, 0.0  ;;  %v2937_v40 = vadd.f32 %v2872_v57, %v2340_v27 }
 0x1d7   : > { %v3175_v0 = vadd.f32 %v3174_v16, %v3173_v50  ;;  %v3276_v7 = vadd.f32 %v3275_v38, %v3274_v4  ;;  %v2888_v21 = vpop.f32.mrf.mxu0  ;;  %v3277_v35 = vsel %vm1496_vm12, %v3229_v14, 0.0  ;;  %3097 = vst.msk [vmem:[%s6182_s8 + $0x50] sm:$0xf] %vm3076_vm1, %v3551_v48  ;;  %v2942_v2 = vadd.f32 %v3834_v24, %v2361_v41  ;;  %v2368_v47 = vpop.f32.mrf.mxu1 }
 0x1d8   : > { %v2959_v20 = vpack.c.bf16 %v2939_v11, %v2938_v53  ;;  %v3554_v45 = vpack.c.bf16 %v2939_v11, %v2939_v11  ;;  %v2958_v31 = vpack.c.bf16 %v2937_v40, %v2936_v1  ;;  %v3552_v17 = vpack.c.bf16 %v2937_v40, %v2937_v40 }
 0x1d9   : > { %v3177_v26 = vadd.f32 %v3176_v15, %v3175_v0  ;;  %v3278_v59 = vadd.f32 %v3277_v35, %v3276_v7  ;;  %v2353_v18 = vadd.f32 %v2352_v28, %v6147_v46  ;;  %v3557_v49 = vpack.c.bf16 %v2942_v2, %v2942_v2  ;;  %v3838_v34 = vpop.f32.mrf.mxu0  ;;  %v3795_v15 = vpop.f32.mrf.mxu1 }
 0x1da   : > { %3100 = vst.msk [vmem:[%s6182_s8 + $0x5c] sm:$0xf] %vm3076_vm1, %v3554_v45  ;;  %v3131_v33 = vunpack.c.l.bf16 %v2959_v20  ;;  %v3132_v61 = vunpack.c.h.bf16 %v2959_v20  ;;  %3098 = vst.msk [vmem:[%s6182_s8 + $0x54] sm:$0xf] %vm3076_vm1, %v3552_v17  ;;  %v3129_v53 = vunpack.c.l.bf16 %v2958_v31  ;;  %v3130_v13 = vunpack.c.h.bf16 %v2958_v31 }
 0x1db   : > { %v3280_v52 = vadd.f32 %v3279_v42, %v3278_v59  ;;  %v3179_v57 = vadd.f32 %v3178_v3, %v3177_v26  ;;  %v2364_v9 = vadd.f32 %v3791_v25, %v6151_v63  ;;  %3103 = vst.msk [vmem:[%s6182_s8 + $0x68] sm:$0xf] %vm3076_vm1, %v3557_v49  ;;  %v2356_v22 = vadd.f32 %v2355_v56, %v6155_v32  ;;  %v2901_v6 = vpop.f32.mrf.mxu0  ;;  %v2371_v7 = vpop.f32.mrf.mxu1 }
 0x1dc   : > { %v3184_v37 = vsel %vm1496_vm12, %v3131_v33, 0.0  ;;  %v3234_v12 = vmul.f32 %v3131_v33, %v3131_v33  ;;  %v3186_v46 = vsel %vm1496_vm12, %v3132_v61, 0.0  ;;  %v3180_v28 = vsel %vm1496_vm12, %v3129_v53, 0.0 }
 0x1dd   : > { %v3232_v44 = vmul.f32 %v3129_v53, %v3129_v53  ;;  %v3233_v19 = vmul.f32 %v3130_v13, %v3130_v13  ;;  %v3235_v39 = vmul.f32 %v3132_v61, %v3132_v61  ;;  %v3181_v24 = vadd.f32 %v3180_v28, %v3179_v57  ;;  %v3839_v4 = vpop.f32.mrf.mxu0 }
 0x1de   : > { %v3182_v54 = vsel %vm1496_vm12, %v3130_v13, 0.0  ;;  %v3282_v30 = vadd.f32 %v3281_v60, %v3280_v52  ;;  %v3287_v1 = vsel %vm1496_vm12, %v3234_v12, 0.0  ;;  %v2940_v25 = vadd.f32 %v2885_v10, %v2353_v18 }
 0x1df   : > { %v3283_v63 = vsel %vm1496_vm12, %v3232_v44, 0.0  ;;  %v2377_v32 = vadd.f32 %v3794_v62, %v6159_v55  ;;  %v3183_v36 = vadd.f32 %v3182_v54, %v3181_v24  ;;  %v3285_v27 = vsel %vm1496_vm12, %v3233_v19, 0.0  ;;  %v2904_v62 = vpop.f32.mrf.mxu0 }
 0x1e0   : > { %v3284_v58 = vadd.f32 %v3283_v63, %v3282_v30  ;;  %v2943_v41 = vadd.f32 %v3835_v23, %v2364_v9  ;;  %v3555_v8 = vpack.c.bf16 %v2940_v25, %v2940_v25  ;;  %v2369_v5 = vadd.f32 %v2368_v47, %v6163_v51 }
 0x1e1   : > { %v2941_v14 = vadd.f32 %v2888_v21, %v2356_v22  ;;  %v2946_v56 = vadd.f32 %v3838_v34, %v2377_v32  ;;  %v3185_v3 = vadd.f32 %v3184_v37, %v3183_v36  ;;  %v2380_v23 = vadd.f32 %v3795_v15, %v6165_v29 }
 0x1e2   : > { %v3286_v50 = vadd.f32 %v3285_v27, %v3284_v58  ;;  %v2961_v10 = vpack.c.bf16 %v2943_v41, %v2942_v2  ;;  %v3558_v16 = vpack.c.bf16 %v2943_v41, %v2943_v41  ;;  %3101 = vst.msk [vmem:[%s6182_s8 + $0x60] sm:$0xf] %vm3076_vm1, %v3555_v8  ;;  %v2944_v40 = vadd.f32 %v2901_v6, %v2369_v5 }
 0x1e3   : > { %v2960_v55 = vpack.c.bf16 %v2941_v14, %v2940_v25  ;;  %v3556_v42 = vpack.c.bf16 %v2941_v14, %v2941_v14  ;;  %v3561_v38 = vpack.c.bf16 %v2946_v56, %v2946_v56  ;;  %v3187_v11 = vadd.f32 %v3186_v46, %v3185_v3 }
 0x1e4   : > { %v3288_v48 = vadd.f32 %v3287_v1, %v3286_v50  ;;  %3104 = vst.msk [vmem:[%s6182_s8 + $0x6c] sm:$0xf] %vm3076_vm1, %v3558_v16  ;;  %v3135_v51 = vunpack.c.l.bf16 %v2961_v10  ;;  %v2947_v21 = vadd.f32 %v3839_v4, %v2380_v23  ;;  %v3289_v35 = vsel %vm1496_vm12, %v3235_v39, 0.0 }
 0x1e5   : > { %3102 = vst.msk [vmem:[%s6182_s8 + $0x64] sm:$0xf] %vm3076_vm1, %v3556_v42  ;;  %v3133_v60 = vunpack.c.l.bf16 %v2960_v55  ;;  %v3134_v0 = vunpack.c.h.bf16 %v2960_v55  ;;  %3107 = vst.msk [vmem:[%s6182_s8 + $0x78] sm:$0xf] %vm3076_vm1, %v3561_v38  ;;  %v3136_v20 = vunpack.c.h.bf16 %v2961_v10  ;;  %v2372_v17 = vadd.f32 %v2371_v7, %v6171_v43 }
 0x1e6   : > { %v3238_v26 = vmul.f32 %v3135_v51, %v3135_v51  ;;  %v3290_v31 = vadd.f32 %v3289_v35, %v3288_v48  ;;  %v3559_v18 = vpack.c.bf16 %v2944_v40, %v2944_v40  ;;  %v2963_v49 = vpack.c.bf16 %v2947_v21, %v2946_v56 }
 0x1e7   : > { %v3188_v29 = vsel %vm1496_vm12, %v3133_v60, 0.0  ;;  %v3236_v45 = vmul.f32 %v3133_v60, %v3133_v60  ;;  %v3237_v2 = vmul.f32 %v3134_v0, %v3134_v0  ;;  %v3190_v33 = vsel %vm1496_vm12, %v3134_v0, 0.0 }
 0x1e8   : > { %v3189_v59 = vadd.f32 %v3188_v29, %v3187_v11  ;;  %v3562_v53 = vpack.c.bf16 %v2947_v21, %v2947_v21  ;;  %v2945_v13 = vadd.f32 %v2904_v62, %v2372_v17  ;;  %v3192_v57 = vsel %vm1496_vm12, %v3135_v51, 0.0  ;;  %3105 = vst.msk [vmem:[%s6182_s8 + $0x70] sm:$0xf] %vm3076_vm1, %v3559_v18 }
 0x1e9   : > { %v3291_v61 = vsel %vm1496_vm12, %v3236_v45, 0.0  ;;  %v3239_v37 = vmul.f32 %v3136_v20, %v3136_v20  ;;  %v3293_v12 = vsel %vm1496_vm12, %v3237_v2, 0.0  ;;  %v3194_v46 = vsel %vm1496_vm12, %v3136_v20, 0.0 }
 0x1ea   : > { %v3191_v34 = vadd.f32 %v3190_v33, %v3189_v59  ;;  %v3292_v52 = vadd.f32 %v3291_v61, %v3290_v31  ;;  %3108 = vst.msk [vmem:[%s6182_s8 + $0x7c] sm:$0xf] %vm3076_vm1, %v3562_v53  ;;  %v2962_v22 = vpack.c.bf16 %v2945_v13, %v2944_v40  ;;  %v3560_v47 = vpack.c.bf16 %v2945_v13, %v2945_v13 }
 0x1eb   : > { %v3295_v28 = vsel %vm1496_vm12, %v3238_v26, 0.0  ;;  %v3139_v44 = vunpack.c.l.bf16 %v2963_v49  ;;  %v3297_v30 = vsel %vm1496_vm12, %v3239_v37, 0.0  ;;  %v3140_v6 = vunpack.c.h.bf16 %v2963_v49 }
 0x1ec   : > { %v3193_v9 = vadd.f32 %v3192_v57, %v3191_v34  ;;  %v3294_v43 = vadd.f32 %v3293_v12, %v3292_v52  ;;  %3106 = vst.msk [vmem:[%s6182_s8 + $0x74] sm:$0xf] %vm3076_vm1, %v3560_v47  ;;  %v3137_v39 = vunpack.c.l.bf16 %v2962_v22  ;;  %v3138_v24 = vunpack.c.h.bf16 %v2962_v22 }
 0x1ed   : > { %v3242_v58 = vmul.f32 %v3139_v44, %v3139_v44  ;;  %v3200_v5 = vsel %vm1496_vm12, %v3139_v44, 0.0  ;;  %v3243_v14 = vmul.f32 %v3140_v6, %v3140_v6  ;;  %v3202_v10 = vsel %vm1496_vm12, %v3140_v6, 0.0 }
 0x1ee   : > { %v3296_v19 = vadd.f32 %v3295_v28, %v3294_v43  ;;  %v3195_v54 = vadd.f32 %v3194_v46, %v3193_v9  ;;  %v3196_v1 = vsel %vm1496_vm12, %v3137_v39, 0.0  ;;  %v3240_v63 = vmul.f32 %v3137_v39, %v3137_v39 }
 0x1ef   : > { %v3241_v25 = vmul.f32 %v3138_v24, %v3138_v24  ;;  %v3198_v27 = vsel %vm1496_vm12, %v3138_v24, 0.0  ;;  %v3303_v16 = vsel %vm1496_vm12, %v3242_v58, 0.0  ;;  %v3305_v42 = vsel %vm1496_vm12, %v3243_v14, 0.0 }
 0x1f0   : > { %v3197_v32 = vadd.f32 %v3196_v1, %v3195_v54  ;;  %v3298_v36 = vadd.f32 %v3297_v30, %v3296_v19  ;;  %v3299_v41 = vsel %vm1496_vm12, %v3240_v63, 0.0 }
 0x1f1   : > { %v3301_v56 = vsel %vm1496_vm12, %v3241_v25, 0.0 }
 0x1f2   : > { %v3199_v15 = vadd.f32 %v3198_v27, %v3197_v32  ;;  %v3300_v8 = vadd.f32 %v3299_v41, %v3298_v36 }
 0x1f4   : > { %v3201_v3 = vadd.f32 %v3200_v5, %v3199_v15  ;;  %v3302_v50 = vadd.f32 %v3301_v56, %v3300_v8 }
 0x1f6   : > { %v3203_v4 = vadd.f32 %v3202_v10, %v3201_v3  ;;  %v3304_v55 = vadd.f32 %v3303_v16, %v3302_v50 }
 0x1f8   : > { %v3204_v23 = vrot.slane %v3203_v4, 4  ;;  %v3306_v38 = vadd.f32 %v3305_v42, %v3304_v55 }
 0x1fa   : > { %v3205_v48 = vadd.f32 %v3204_v23, %v3203_v4  ;;  %v3307_v51 = vrot.slane %v3306_v38, 4 }
 0x1fc   : > { %v3206_v11 = vrot.slane %v3205_v48, 2  ;;  %v3308_v60 = vadd.f32 %v3307_v51, %v3306_v38 }
 0x1fe   : > { %v3207_v0 = vadd.f32 %v3206_v11, %v3205_v48  ;;  %v3309_v7 = vrot.slane %v3308_v60, 2 }
 0x200   : > { %v3208_v40 = vrot.slane %v3207_v0, 1  ;;  %v3310_v21 = vadd.f32 %v3309_v7, %v3308_v60 }
 0x202   : > { %v3209_v35 = vadd.f32 %v3208_v40, %v3207_v0  ;;  %v3311_v20 = vrot.slane %v3310_v21, 1 }
 0x204   : > { %3211 = vst.msk [vmem:[%s268_s9] sm:$0x1] %vm3210_vm4, %v3209_v35  ;;  %v3312_v29 = vadd.f32 %v3311_v20, %v3310_v21 }
 0x206   : > { %3313 = vst.msk [vmem:[%s271_s12] sm:$0x1] %vm3210_vm4, %v3312_v29 }
 0x207 PF: > { %s17_s21 = sadd.s32 1, %s4207_s21  }
 0x208   : > { %p14_p5 = scmp.ge.s32.totalorder %s17_s21, 4  }
 0x20a   :  { %16 = sbr.rel (!%p14_p5) target bundleno = 1 (0x1), region = 90 }

</bundles_post_ra>
